<compile_context>
chip_gen: v7x
topology: tpu7x:2x2x1
jax: 0.10.0
libtpu: 0.0.40
codegen_flags: <defaults>
</compile_context>

<pallas_src>
import jax
import jax.numpy as jnp
from jax.experimental import pallas as pl
from jax.experimental.pallas import tpu as pltpu


# -----------------------------------------------------------------------------
# Model hyper-parameters (mirrors ToyNet.__init__)
# -----------------------------------------------------------------------------
NUM_STEPS = 50
STEPS_PAD = 64            # num_steps padded to a sublane-friendly multiple of 8
TIME_EMBED_DIM = 128      # DiffusionEmbedding embedding_dim
HIDDEN = 256              # projection_dim == hidden_dim
IO_DIM = 2                # ToyNet in/out feature dim
IO_PAD = 8                # tiny feature dim padded to 8 lanes (full-dim block)
TB = 256                  # batch tile: fills the 256-row MXU on v6e/v7x


def _silu(x):
    return x * jax.nn.sigmoid(x)


# -----------------------------------------------------------------------------
# Stage 1 kernel: projected time-embedding table for ALL diffusion steps.
#   table[s] = silu(silu(emb[s] @ W1 + b1) @ W2 + b2)        shape (64, 256)
# -----------------------------------------------------------------------------
def time_table_kernel(emb_ref, w1_ref, b1_ref, w2_ref, b2_ref, tab_ref):
    f32 = jnp.float32
    bf16 = jnp.bfloat16
    t = jnp.dot(emb_ref[...].astype(bf16), w1_ref[...],
                preferred_element_type=f32) + b1_ref[...]
    t = _silu(t)
    t = jnp.dot(t.astype(bf16), w2_ref[...],
                preferred_element_type=f32) + b2_ref[...]
    t = _silu(t)
    tab_ref[...] = t.astype(tab_ref.dtype)


# -----------------------------------------------------------------------------
# Stage 2 kernel: per-batch-tile forward pass.
# -----------------------------------------------------------------------------
def toynet_kernel(
    t_ref,               # (TB, 1)   int32 diffusion-step indices
    xin_ref,             # (TB, 8)   input x zero-padded from (TB, 2), f32
    ttab_ref,            # (64, 256) projected time-embedding table, bf16
    win_ref, bin_ref,    # input_projection (in-dim padded to 8): (8,256) bf16, (1,256) f32
    wr0_ref, br0_ref,    # res block linear 0 : (256,256) bf16, (1,256) f32
    wr1_ref, br1_ref,    # res block linear 1
    wr2_ref, br2_ref,    # res block linear 2
    wo1_ref, bo1_ref,    # out_projection[0]  : (256,256) bf16, (1,256) f32
    wo2_ref, bo2_ref,    # out_projection[2] (out-dim padded to 8): (256,8) bf16, (1,8) f32
    out_ref,             # (TB, 8)   only columns [:, :2] are meaningful
):
    f32 = jnp.float32
    bf16 = jnp.bfloat16
    tb = t_ref.shape[0]

    # --- in-kernel gather of the projected time embedding via one-hot matmul
    t_ids = t_ref[...]                                                  # (TB, 1) int32
    steps = jax.lax.broadcasted_iota(jnp.int32, (tb, STEPS_PAD), 1)     # (TB, 64)
    one_hot = jnp.where(t_ids == steps, 1.0, 0.0).astype(bf16)          # (TB, 64)
    temb = jnp.dot(one_hot, ttab_ref[...], preferred_element_type=f32)  # (TB, 256)

    # --- input_projection + add time embedding -------------------------------
    h = jnp.dot(xin_ref[...].astype(bf16), win_ref[...],
                preferred_element_type=f32) + bin_ref[...]
    h = h + temb

    # --- residual MLP stack (3x) and out_projection[0]: Linear -> SiLU -------
    for w_ref, b_ref in ((wr0_ref, br0_ref), (wr1_ref, br1_ref),
                         (wr2_ref, br2_ref), (wo1_ref, bo1_ref)):
        h = _silu(jnp.dot(h.astype(bf16), w_ref[...],
                          preferred_element_type=f32) + b_ref[...])

    # --- final Linear ---------------------------------------------------------
    out = jnp.dot(h.astype(bf16), wo2_ref[...],
                  preferred_element_type=f32) + bo2_ref[...]
    out_ref[...] = out.astype(out_ref.dtype)


# -----------------------------------------------------------------------------
# Parameter construction (deterministic, synthetic; f32 "logical" shapes)
# -----------------------------------------------------------------------------
def build_embedding_table(num_steps, half_dim):
    """Matches DiffusionEmbedding._build_embedding (torch semantics)."""
    steps = jnp.arange(num_steps, dtype=jnp.float32)[:, None]                  # (N, 1)
    freqs = 10.0 ** (jnp.arange(half_dim, dtype=jnp.float32)
                     / (half_dim - 1) * 4.0)[None, :]                          # (1, D/2)
    table = steps * freqs                                                      # (N, D/2)
    return jnp.concatenate([jnp.sin(table), jnp.cos(table)], axis=1)           # (N, D)


def init_params(key):
    def linear(key, din, dout, scale=0.05):
        kw, kb = jax.random.split(key)
        w = scale * jax.random.normal(kw, (din, dout), dtype=jnp.float32)
        b = scale * jax.random.normal(kb, (1, dout), dtype=jnp.float32)
        return w, b

    keys = jax.random.split(key, 8)
    p = {}
    p["w1"], p["b1"] = linear(keys[0], TIME_EMBED_DIM, HIDDEN)
    p["w2"], p["b2"] = linear(keys[1], HIDDEN, HIDDEN)
    p["win"], p["bin"] = linear(keys[2], IO_DIM, HIDDEN)
    p["wr0"], p["br0"] = linear(keys[3], HIDDEN, HIDDEN)
    p["wr1"], p["br1"] = linear(keys[4], HIDDEN, HIDDEN)
    p["wr2"], p["br2"] = linear(keys[5], HIDDEN, HIDDEN)
    p["wo1"], p["bo1"] = linear(keys[6], HIDDEN, HIDDEN)
    p["wo2"], p["bo2"] = linear(keys[7], HIDDEN, IO_DIM)
    return p


def pack_params(p):
    """Pad tiny dims, cast matmul weights to bf16 (biases stay f32)."""
    kp = {}
    for name in ("w1", "w2", "wr0", "wr1", "wr2", "wo1"):
        kp[name] = p[name].astype(jnp.bfloat16)
    for name in ("b1", "b2", "bin", "br0", "br1", "br2", "bo1"):
        kp[name] = p[name].astype(jnp.float32)
    kp["win"] = (jnp.zeros((IO_PAD, HIDDEN), jnp.float32)
                 .at[:IO_DIM].set(p["win"])).astype(jnp.bfloat16)
    kp["wo2"] = (jnp.zeros((HIDDEN, IO_PAD), jnp.float32)
                 .at[:, :IO_DIM].set(p["wo2"])).astype(jnp.bfloat16)
    kp["bo2"] = jnp.zeros((1, IO_PAD), jnp.float32).at[:, :IO_DIM].set(p["bo2"])
    return kp


# -----------------------------------------------------------------------------
# Wrapper
# -----------------------------------------------------------------------------
@jax.jit
def toynet_forward(x, t, emb_table, kp):
    """x: (B, 2) float32, t: (B,) int32 diffusion-step indices."""
    B = x.shape[0]
    B_pad = pl.cdiv(B, TB) * TB
    num_tiles = B_pad // TB

    # Glue: pad tiny feature dim to 8 lanes, pad batch to a multiple of TB,
    # make t a (B_pad, 1) column so the kernel can build the one-hot gather.
    xin = jnp.zeros((B_pad, IO_PAD), jnp.float32).at[:B, :IO_DIM].set(x)
    t2d = jnp.zeros((B_pad, 1), jnp.int32).at[:B, 0].set(t)
    emb_pad = jnp.zeros((STEPS_PAD, TIME_EMBED_DIM), jnp.float32).at[:NUM_STEPS].set(emb_table)

    vmem = pl.BlockSpec(memory_space=pltpu.MemorySpace.VMEM)

    # ---- stage 1: (64, 256) projected time-embedding table (one shot) -------
    ttab = pl.pallas_call(
        time_table_kernel,
        out_shape=jax.ShapeDtypeStruct((STEPS_PAD, HIDDEN), jnp.bfloat16),
        in_specs=[vmem] * 5,
        out_specs=vmem,
    )(emb_pad, kp["w1"], kp["b1"], kp["w2"], kp["b2"])

    # ---- stage 2: batch-tiled main forward -----------------------------------
    tile = lambda i: (i, 0)       # batch-tiled arrays
    const = lambda i: (0, 0)      # VMEM-resident weights / biases / table

    w_spec = pl.BlockSpec((HIDDEN, HIDDEN), const)
    b_spec = pl.BlockSpec((1, HIDDEN), const)

    in_specs = [
        pl.BlockSpec((TB, 1), tile),                 # t ids
        pl.BlockSpec((TB, IO_PAD), tile),            # xin
        pl.BlockSpec((STEPS_PAD, HIDDEN), const),    # time table
        pl.BlockSpec((IO_PAD, HIDDEN), const),       # win
        b_spec,                                      # bin
        w_spec, b_spec,                              # wr0, br0
        w_spec, b_spec,                              # wr1, br1
        w_spec, b_spec,                              # wr2, br2
        w_spec, b_spec,                              # wo1, bo1
        pl.BlockSpec((HIDDEN, IO_PAD), const),       # wo2
        pl.BlockSpec((1, IO_PAD), const),            # bo2
    ]

    out_padded = pl.pallas_call(
        toynet_kernel,
        out_shape=jax.ShapeDtypeStruct((B_pad, IO_PAD), jnp.float32),
        grid_spec=pltpu.PrefetchScalarGridSpec(
            num_scalar_prefetch=0,
            grid=(num_tiles,),
            in_specs=in_specs,
            out_specs=pl.BlockSpec((TB, IO_PAD), tile),
        ),
        compiler_params=pltpu.CompilerParams(
            dimension_semantics=("parallel",)),      # dual-TC sharding on v7x
    )(
        t2d, xin, ttab,
        kp["win"], kp["bin"],
        kp["wr0"], kp["br0"], kp["wr1"], kp["br1"], kp["wr2"], kp["br2"],
        kp["wo1"], kp["bo1"], kp["wo2"], kp["bo2"],
    )
    return out_padded[:B, :IO_DIM]                                             # (B, 2)


# -----------------------------------------------------------------------------
# Pure-JAX f32 reference (mirrors the PyTorch forward exactly).
# -----------------------------------------------------------------------------
def toynet_reference(x, t, emb_table, p):
    te = emb_table[t]
    te = _silu(te @ p["w1"] + p["b1"])
    te = _silu(te @ p["w2"] + p["b2"])
    h = x @ p["win"] + p["bin"] + te
    for w, b in ((p["wr0"], p["br0"]), (p["wr1"], p["br1"]),
                 (p["wr2"], p["br2"]), (p["wo1"], p["bo1"])):
        h = _silu(h @ w + b)
    return h @ p["wo2"] + p["bo2"]


if __name__ == "__main__":
    key = jax.random.PRNGKey(0)
    k_param, k_x, k_t = jax.random.split(key, 3)

    B = 500  # exercises batch padding (B_pad = 512 -> 2 grid tiles)
    x = jax.random.normal(k_x, (B, IO_DIM), dtype=jnp.float32)                 # (500, 2)
    t = jax.random.randint(k_t, (B,), 0, NUM_STEPS, dtype=jnp.int32)           # (500,)

    emb_table = build_embedding_table(NUM_STEPS, TIME_EMBED_DIM // 2)          # (50, 128)
    params = init_params(k_param)
    kparams = pack_params(params)

    out = toynet_forward(x, t, emb_table, kparams)
    out = jax.block_until_ready(out)

    ref = toynet_reference(x, t, emb_table, params)
    assert out.shape == (B, IO_DIM)
    # bf16 matmul operands vs f32 reference -> loosened tolerance
    assert jnp.allclose(out, ref, atol=2e-2, rtol=2e-2), "mismatch vs JAX reference"

    print("KERNEL_OK")
</pallas_src>

<mosaic_0001>
module attributes {stable_mosaic.version = 11 : i64} {
  func.func @time_table_kernel(%arg0: memref<64x128xf32, #tpu.memory_space<vmem>>, %arg1: memref<128x256xbf16, #tpu.memory_space<vmem>>, %arg2: memref<1x256xf32, #tpu.memory_space<vmem>>, %arg3: memref<256x256xbf16, #tpu.memory_space<vmem>>, %arg4: memref<1x256xf32, #tpu.memory_space<vmem>>, %arg5: memref<64x256xbf16, #tpu.memory_space<vmem>>) attributes {dimension_semantics = [], scalar_prefetch = 0 : i64, scratch_operands = 0 : i64, tpu.core_type = #tpu.core_type<tc>} {
    %c0 = arith.constant 0 : index
    %c0_0 = arith.constant 0 : index
    %0 = vector.load %arg0[%c0, %c0_0] : memref<64x128xf32, #tpu.memory_space<vmem>>, vector<64x128xf32>
    %1 = arith.truncf %0 : vector<64x128xf32> to vector<64x128xbf16>
    %c0_1 = arith.constant 0 : index
    %c0_2 = arith.constant 0 : index
    %2 = vector.load %arg1[%c0_1, %c0_2] : memref<128x256xbf16, #tpu.memory_space<vmem>>, vector<128x256xbf16>
    %cst = arith.constant dense<0.000000e+00> : vector<64x256xf32>
    %3 = tpu.matmul %1, %2, %cst {dimension_numbers = #tpu.dot_dimension_numbers<[1], [0], [0], [1], [0, 0, 1, 1], [], []>} : vector<64x128xbf16>, vector<128x256xbf16>, vector<64x256xf32> -> vector<64x256xf32>
    %c0_3 = arith.constant 0 : index
    %c0_4 = arith.constant 0 : index
    %4 = vector.load %arg2[%c0_3, %c0_4] : memref<1x256xf32, #tpu.memory_space<vmem>>, vector<1x256xf32>
    %5 = vector.broadcast %4 : vector<1x256xf32> to vector<64x256xf32>
    %6 = arith.addf %3, %5 : vector<64x256xf32>
    %7 = arith.negf %6 : vector<64x256xf32>
    %8 = math.exp %7 : vector<64x256xf32>
    %cst_5 = arith.constant 1.000000e+00 : f32
    %9 = vector.broadcast %cst_5 : f32 to vector<64x256xf32>
    %10 = arith.addf %9, %8 : vector<64x256xf32>
    %11 = arith.divf %9, %10 : vector<64x256xf32>
    %12 = arith.mulf %6, %11 : vector<64x256xf32>
    %13 = arith.truncf %12 : vector<64x256xf32> to vector<64x256xbf16>
    %c0_6 = arith.constant 0 : index
    %c0_7 = arith.constant 0 : index
    %14 = vector.load %arg3[%c0_6, %c0_7] : memref<256x256xbf16, #tpu.memory_space<vmem>>, vector<256x256xbf16>
    %cst_8 = arith.constant dense<0.000000e+00> : vector<64x256xf32>
    %15 = tpu.matmul %13, %14, %cst_8 {dimension_numbers = #tpu.dot_dimension_numbers<[1], [0], [0], [1], [0, 0, 1, 1], [], []>} : vector<64x256xbf16>, vector<256x256xbf16>, vector<64x256xf32> -> vector<64x256xf32>
    %c0_9 = arith.constant 0 : index
    %c0_10 = arith.constant 0 : index
    %16 = vector.load %arg4[%c0_9, %c0_10] : memref<1x256xf32, #tpu.memory_space<vmem>>, vector<1x256xf32>
    %17 = vector.broadcast %16 : vector<1x256xf32> to vector<64x256xf32>
    %18 = arith.addf %15, %17 : vector<64x256xf32>
    %19 = arith.negf %18 : vector<64x256xf32>
    %20 = math.exp %19 : vector<64x256xf32>
    %cst_11 = arith.constant 1.000000e+00 : f32
    %21 = vector.broadcast %cst_11 : f32 to vector<64x256xf32>
    %22 = arith.addf %21, %20 : vector<64x256xf32>
    %23 = arith.divf %21, %22 : vector<64x256xf32>
    %24 = arith.mulf %18, %23 : vector<64x256xf32>
    %25 = arith.truncf %24 : vector<64x256xf32> to vector<64x256xbf16>
    %c0_12 = arith.constant 0 : index
    %c0_13 = arith.constant 0 : index
    %26 = vector.load %arg5[%c0_12, %c0_13] : memref<64x256xbf16, #tpu.memory_space<vmem>>, vector<64x256xbf16>
    tpu.vector_store %arg5[%c0_12, %c0_13], %25 {strides = array<i32>} : memref<64x256xbf16, #tpu.memory_space<vmem>>, vector<64x256xbf16>,
    return
  }
}

module attributes {stable_mosaic.version = 11 : i64} {
  func.func @toynet_kernel(%arg0: i32, %arg1: memref<256x1xi32, #tpu.memory_space<vmem>>, %arg2: memref<256x8xf32, #tpu.memory_space<vmem>>, %arg3: memref<64x256xbf16, #tpu.memory_space<vmem>>, %arg4: memref<8x256xbf16, #tpu.memory_space<vmem>>, %arg5: memref<1x256xf32, #tpu.memory_space<vmem>>, %arg6: memref<256x256xbf16, #tpu.memory_space<vmem>>, %arg7: memref<1x256xf32, #tpu.memory_space<vmem>>, %arg8: memref<256x256xbf16, #tpu.memory_space<vmem>>, %arg9: memref<1x256xf32, #tpu.memory_space<vmem>>, %arg10: memref<256x256xbf16, #tpu.memory_space<vmem>>, %arg11: memref<1x256xf32, #tpu.memory_space<vmem>>, %arg12: memref<256x256xbf16, #tpu.memory_space<vmem>>, %arg13: memref<1x256xf32, #tpu.memory_space<vmem>>, %arg14: memref<256x8xbf16, #tpu.memory_space<vmem>>, %arg15: memref<1x8xf32, #tpu.memory_space<vmem>>, %arg16: memref<256x8xf32, #tpu.memory_space<vmem>>) attributes {dimension_semantics = [#tpu.dimension_semantics<parallel>], iteration_bounds = array<i64: 2>, scalar_prefetch = 0 : i64, scratch_operands = 0 : i64, tpu.core_type = #tpu.core_type<tc>, window_params = [{transform_indices = @transform_0, window_bounds = array<i64: 256, 1>}, {transform_indices = @transform_1, window_bounds = array<i64: 256, 8>}, {pipeline_mode = #tpu.pipeline_mode<synchronous>, transform_indices = @transform_2, window_bounds = array<i64: 64, 256>}, {pipeline_mode = #tpu.pipeline_mode<synchronous>, transform_indices = @transform_3, window_bounds = array<i64: 8, 256>}, {pipeline_mode = #tpu.pipeline_mode<synchronous>, transform_indices = @transform_4, window_bounds = array<i64: 1, 256>}, {pipeline_mode = #tpu.pipeline_mode<synchronous>, transform_indices = @transform_5, window_bounds = array<i64: 256, 256>}, {pipeline_mode = #tpu.pipeline_mode<synchronous>, transform_indices = @transform_6, window_bounds = array<i64: 1, 256>}, {pipeline_mode = #tpu.pipeline_mode<synchronous>, transform_indices = @transform_7, window_bounds = array<i64: 256, 256>}, {pipeline_mode = #tpu.pipeline_mode<synchronous>, transform_indices = @transform_8, window_bounds = array<i64: 1, 256>}, {pipeline_mode = #tpu.pipeline_mode<synchronous>, transform_indices = @transform_9, window_bounds = array<i64: 256, 256>}, {pipeline_mode = #tpu.pipeline_mode<synchronous>, transform_indices = @transform_10, window_bounds = array<i64: 1, 256>}, {pipeline_mode = #tpu.pipeline_mode<synchronous>, transform_indices = @transform_11, window_bounds = array<i64: 256, 256>}, {pipeline_mode = #tpu.pipeline_mode<synchronous>, transform_indices = @transform_12, window_bounds = array<i64: 1, 256>}, {pipeline_mode = #tpu.pipeline_mode<synchronous>, transform_indices = @transform_13, window_bounds = array<i64: 256, 8>}, {pipeline_mode = #tpu.pipeline_mode<synchronous>, transform_indices = @transform_14, window_bounds = array<i64: 1, 8>}, {transform_indices = @transform_15, window_bounds = array<i64: 256, 8>}]} {
    %c0 = arith.constant 0 : index
    %c0_0 = arith.constant 0 : index
    %0 = vector.load %arg1[%c0, %c0_0] : memref<256x1xi32, #tpu.memory_space<vmem>>, vector<256x1xi32>
    %1 = tpu.iota {dimensions = array<i32: 1>} : vector<256x64xi32>
    %2 = vector.broadcast %0 : vector<256x1xi32> to vector<256x64xi32>
    %3 = arith.cmpi eq, %2, %1 : vector<256x64xi32>
    %cst = arith.constant 1.000000e+00 : f32
    %cst_1 = arith.constant 0.000000e+00 : f32
    %4 = vector.broadcast %cst : f32 to vector<256x64xf32>
    %5 = vector.broadcast %cst_1 : f32 to vector<256x64xf32>
    %6 = arith.select %3, %4, %5 : vector<256x64xi1>, vector<256x64xf32>
    %7 = arith.truncf %6 : vector<256x64xf32> to vector<256x64xbf16>
    %c0_2 = arith.constant 0 : index
    %c0_3 = arith.constant 0 : index
    %8 = vector.load %arg3[%c0_2, %c0_3] : memref<64x256xbf16, #tpu.memory_space<vmem>>, vector<64x256xbf16>
    %cst_4 = arith.constant dense<0.000000e+00> : vector<256x256xf32>
    %9 = tpu.matmul %7, %8, %cst_4 {dimension_numbers = #tpu.dot_dimension_numbers<[1], [0], [0], [1], [0, 0, 1, 1], [], []>} : vector<256x64xbf16>, vector<64x256xbf16>, vector<256x256xf32> -> vector<256x256xf32>
    %c0_5 = arith.constant 0 : index
    %c0_6 = arith.constant 0 : index
    %10 = vector.load %arg2[%c0_5, %c0_6] : memref<256x8xf32, #tpu.memory_space<vmem>>, vector<256x8xf32>
    %11 = arith.truncf %10 : vector<256x8xf32> to vector<256x8xbf16>
    %c0_7 = arith.constant 0 : index
    %c0_8 = arith.constant 0 : index
    %12 = vector.load %arg4[%c0_7, %c0_8] : memref<8x256xbf16, #tpu.memory_space<vmem>>, vector<8x256xbf16>
    %cst_9 = arith.constant dense<0.000000e+00> : vector<256x256xf32>
    %13 = tpu.matmul %11, %12, %cst_9 {dimension_numbers = #tpu.dot_dimension_numbers<[1], [0], [0], [1], [0, 0, 1, 1], [], []>} : vector<256x8xbf16>, vector<8x256xbf16>, vector<256x256xf32> -> vector<256x256xf32>
    %c0_10 = arith.constant 0 : index
    %c0_11 = arith.constant 0 : index
    %14 = vector.load %arg5[%c0_10, %c0_11] : memref<1x256xf32, #tpu.memory_space<vmem>>, vector<1x256xf32>
    %15 = vector.broadcast %14 : vector<1x256xf32> to vector<256x256xf32>
    %16 = arith.addf %13, %15 : vector<256x256xf32>
    %17 = arith.addf %16, %9 : vector<256x256xf32>
    %18 = arith.truncf %17 : vector<256x256xf32> to vector<256x256xbf16>
    %c0_12 = arith.constant 0 : index
    %c0_13 = arith.constant 0 : index
    %19 = vector.load %arg6[%c0_12, %c0_13] : memref<256x256xbf16, #tpu.memory_space<vmem>>, vector<256x256xbf16>
    %cst_14 = arith.constant dense<0.000000e+00> : vector<256x256xf32>
    %20 = tpu.matmul %18, %19, %cst_14 {dimension_numbers = #tpu.dot_dimension_numbers<[1], [0], [0], [1], [0, 0, 1, 1], [], []>} : vector<256x256xbf16>, vector<256x256xbf16>, vector<256x256xf32> -> vector<256x256xf32>
    %c0_15 = arith.constant 0 : index
    %c0_16 = arith.constant 0 : index
    %21 = vector.load %arg7[%c0_15, %c0_16] : memref<1x256xf32, #tpu.memory_space<vmem>>, vector<1x256xf32>
    %22 = vector.broadcast %21 : vector<1x256xf32> to vector<256x256xf32>
    %23 = arith.addf %20, %22 : vector<256x256xf32>
    %24 = arith.negf %23 : vector<256x256xf32>
    %25 = math.exp %24 : vector<256x256xf32>
    %cst_17 = arith.constant 1.000000e+00 : f32
    %26 = vector.broadcast %cst_17 : f32 to vector<256x256xf32>
    %27 = arith.addf %26, %25 : vector<256x256xf32>
    %28 = arith.divf %26, %27 : vector<256x256xf32>
    %29 = arith.mulf %23, %28 : vector<256x256xf32>
    %30 = arith.truncf %29 : vector<256x256xf32> to vector<256x256xbf16>
    %c0_18 = arith.constant 0 : index
    %c0_19 = arith.constant 0 : index
    %31 = vector.load %arg8[%c0_18, %c0_19] : memref<256x256xbf16, #tpu.memory_space<vmem>>, vector<256x256xbf16>
    %cst_20 = arith.constant dense<0.000000e+00> : vector<256x256xf32>
    %32 = tpu.matmul %30, %31, %cst_20 {dimension_numbers = #tpu.dot_dimension_numbers<[1], [0], [0], [1], [0, 0, 1, 1], [], []>} : vector<256x256xbf16>, vector<256x256xbf16>, vector<256x256xf32> -> vector<256x256xf32>
    %c0_21 = arith.constant 0 : index
    %c0_22 = arith.constant 0 : index
    %33 = vector.load %arg9[%c0_21, %c0_22] : memref<1x256xf32, #tpu.memory_space<vmem>>, vector<1x256xf32>
    %34 = vector.broadcast %33 : vector<1x256xf32> to vector<256x256xf32>
    %35 = arith.addf %32, %34 : vector<256x256xf32>
    %36 = arith.negf %35 : vector<256x256xf32>
    %37 = math.exp %36 : vector<256x256xf32>
    %cst_23 = arith.constant 1.000000e+00 : f32
    %38 = vector.broadcast %cst_23 : f32 to vector<256x256xf32>
    %39 = arith.addf %38, %37 : vector<256x256xf32>
    %40 = arith.divf %38, %39 : vector<256x256xf32>
    %41 = arith.mulf %35, %40 : vector<256x256xf32>
    %42 = arith.truncf %41 : vector<256x256xf32> to vector<256x256xbf16>
    %c0_24 = arith.constant 0 : index
    %c0_25 = arith.constant 0 : index
    %43 = vector.load %arg10[%c0_24, %c0_25] : memref<256x256xbf16, #tpu.memory_space<vmem>>, vector<256x256xbf16>
    %cst_26 = arith.constant dense<0.000000e+00> : vector<256x256xf32>
    %44 = tpu.matmul %42, %43, %cst_26 {dimension_numbers = #tpu.dot_dimension_numbers<[1], [0], [0], [1], [0, 0, 1, 1], [], []>} : vector<256x256xbf16>, vector<256x256xbf16>, vector<256x256xf32> -> vector<256x256xf32>
    %c0_27 = arith.constant 0 : index
    %c0_28 = arith.constant 0 : index
    %45 = vector.load %arg11[%c0_27, %c0_28] : memref<1x256xf32, #tpu.memory_space<vmem>>, vector<1x256xf32>
    %46 = vector.broadcast %45 : vector<1x256xf32> to vector<256x256xf32>
    %47 = arith.addf %44, %46 : vector<256x256xf32>
    %48 = arith.negf %47 : vector<256x256xf32>
    %49 = math.exp %48 : vector<256x256xf32>
    %cst_29 = arith.constant 1.000000e+00 : f32
    %50 = vector.broadcast %cst_29 : f32 to vector<256x256xf32>
    %51 = arith.addf %50, %49 : vector<256x256xf32>
    %52 = arith.divf %50, %51 : vector<256x256xf32>
    %53 = arith.mulf %47, %52 : vector<256x256xf32>
    %54 = arith.truncf %53 : vector<256x256xf32> to vector<256x256xbf16>
    %c0_30 = arith.constant 0 : index
    %c0_31 = arith.constant 0 : index
    %55 = vector.load %arg12[%c0_30, %c0_31] : memref<256x256xbf16, #tpu.memory_space<vmem>>, vector<256x256xbf16>
    %cst_32 = arith.constant dense<0.000000e+00> : vector<256x256xf32>
    %56 = tpu.matmul %54, %55, %cst_32 {dimension_numbers = #tpu.dot_dimension_numbers<[1], [0], [0], [1], [0, 0, 1, 1], [], []>} : vector<256x256xbf16>, vector<256x256xbf16>, vector<256x256xf32> -> vector<256x256xf32>
    %c0_33 = arith.constant 0 : index
    %c0_34 = arith.constant 0 : index
    %57 = vector.load %arg13[%c0_33, %c0_34] : memref<1x256xf32, #tpu.memory_space<vmem>>, vector<1x256xf32>
    %58 = vector.broadcast %57 : vector<1x256xf32> to vector<256x256xf32>
    %59 = arith.addf %56, %58 : vector<256x256xf32>
    %60 = arith.negf %59 : vector<256x256xf32>
    %61 = math.exp %60 : vector<256x256xf32>
    %cst_35 = arith.constant 1.000000e+00 : f32
    %62 = vector.broadcast %cst_35 : f32 to vector<256x256xf32>
    %63 = arith.addf %62, %61 : vector<256x256xf32>
    %64 = arith.divf %62, %63 : vector<256x256xf32>
    %65 = arith.mulf %59, %64 : vector<256x256xf32>
    %66 = arith.truncf %65 : vector<256x256xf32> to vector<256x256xbf16>
    %c0_36 = arith.constant 0 : index
    %c0_37 = arith.constant 0 : index
    %67 = vector.load %arg14[%c0_36, %c0_37] : memref<256x8xbf16, #tpu.memory_space<vmem>>, vector<256x8xbf16>
    %cst_38 = arith.constant dense<0.000000e+00> : vector<256x8xf32>
    %68 = tpu.matmul %66, %67, %cst_38 {dimension_numbers = #tpu.dot_dimension_numbers<[1], [0], [0], [1], [0, 0, 1, 1], [], []>} : vector<256x256xbf16>, vector<256x8xbf16>, vector<256x8xf32> -> vector<256x8xf32>
    %c0_39 = arith.constant 0 : index
    %c0_40 = arith.constant 0 : index
    %69 = vector.load %arg15[%c0_39, %c0_40] : memref<1x8xf32, #tpu.memory_space<vmem>>, vector<1x8xf32>
    %70 = vector.broadcast %69 : vector<1x8xf32> to vector<256x8xf32>
    %71 = arith.addf %68, %70 : vector<256x8xf32>
    %c0_41 = arith.constant 0 : index
    %c0_42 = arith.constant 0 : index
    %72 = vector.load %arg16[%c0_41, %c0_42] : memref<256x8xf32, #tpu.memory_space<vmem>>, vector<256x8xf32>
    tpu.vector_store %arg16[%c0_41, %c0_42], %71 {strides = array<i32>} : memref<256x8xf32, #tpu.memory_space<vmem>>, vector<256x8xf32>,
    return
  }
  func.func @transform_0(%arg0: i32) -> (i32, i32) {
    %c0_i32 = arith.constant 0 : i32
    %c0_i32_0 = arith.constant 0 : i32
    return %arg0, %c0_i32 : i32, i32
  }
  func.func @transform_1(%arg0: i32) -> (i32, i32) {
    %c0_i32 = arith.constant 0 : i32
    %c0_i32_0 = arith.constant 0 : i32
    return %arg0, %c0_i32 : i32, i32
  }
  func.func @transform_2(%arg0: i32) -> (i32, i32) {
    %c0_i32 = arith.constant 0 : i32
    %c0_i32_0 = arith.constant 0 : i32
    %c0_i32_1 = arith.constant 0 : i32
    return %c0_i32, %c0_i32_0 : i32, i32
  }
  func.func @transform_3(%arg0: i32) -> (i32, i32) {
    %c0_i32 = arith.constant 0 : i32
    %c0_i32_0 = arith.constant 0 : i32
    %c0_i32_1 = arith.constant 0 : i32
    return %c0_i32, %c0_i32_0 : i32, i32
  }
  func.func @transform_4(%arg0: i32) -> (i32, i32) {
    %c0_i32 = arith.constant 0 : i32
    %c0_i32_0 = arith.constant 0 : i32
    %c0_i32_1 = arith.constant 0 : i32
    return %c0_i32, %c0_i32_0 : i32, i32
  }
  func.func @transform_5(%arg0: i32) -> (i32, i32) {
    %c0_i32 = arith.constant 0 : i32
    %c0_i32_0 = arith.constant 0 : i32
    %c0_i32_1 = arith.constant 0 : i32
    return %c0_i32, %c0_i32_0 : i32, i32
  }
  func.func @transform_6(%arg0: i32) -> (i32, i32) {
    %c0_i32 = arith.constant 0 : i32
    %c0_i32_0 = arith.constant 0 : i32
    %c0_i32_1 = arith.constant 0 : i32
    return %c0_i32, %c0_i32_0 : i32, i32
  }
  func.func @transform_7(%arg0: i32) -> (i32, i32) {
    %c0_i32 = arith.constant 0 : i32
    %c0_i32_0 = arith.constant 0 : i32
    %c0_i32_1 = arith.constant 0 : i32
    return %c0_i32, %c0_i32_0 : i32, i32
  }
  func.func @transform_8(%arg0: i32) -> (i32, i32) {
    %c0_i32 = arith.constant 0 : i32
    %c0_i32_0 = arith.constant 0 : i32
    %c0_i32_1 = arith.constant 0 : i32
    return %c0_i32, %c0_i32_0 : i32, i32
  }
  func.func @transform_9(%arg0: i32) -> (i32, i32) {
    %c0_i32 = arith.constant 0 : i32
    %c0_i32_0 = arith.constant 0 : i32
    %c0_i32_1 = arith.constant 0 : i32
    return %c0_i32, %c0_i32_0 : i32, i32
  }
  func.func @transform_10(%arg0: i32) -> (i32, i32) {
    %c0_i32 = arith.constant 0 : i32
    %c0_i32_0 = arith.constant 0 : i32
    %c0_i32_1 = arith.constant 0 : i32
    return %c0_i32, %c0_i32_0 : i32, i32
  }
  func.func @transform_11(%arg0: i32) -> (i32, i32) {
    %c0_i32 = arith.constant 0 : i32
    %c0_i32_0 = arith.constant 0 : i32
    %c0_i32_1 = arith.constant 0 : i32
    return %c0_i32, %c0_i32_0 : i32, i32
  }
  func.func @transform_12(%arg0: i32) -> (i32, i32) {
    %c0_i32 = arith.constant 0 : i32
    %c0_i32_0 = arith.constant 0 : i32
    %c0_i32_1 = arith.constant 0 : i32
    return %c0_i32, %c0_i32_0 : i32, i32
  }
  func.func @transform_13(%arg0: i32) -> (i32, i32) {
    %c0_i32 = arith.constant 0 : i32
    %c0_i32_0 = arith.constant 0 : i32
    %c0_i32_1 = arith.constant 0 : i32
    return %c0_i32, %c0_i32_0 : i32, i32
  }
  func.func @transform_14(%arg0: i32) -> (i32, i32) {
    %c0_i32 = arith.constant 0 : i32
    %c0_i32_0 = arith.constant 0 : i32
    %c0_i32_1 = arith.constant 0 : i32
    return %c0_i32, %c0_i32_0 : i32, i32
  }
  func.func @transform_15(%arg0: i32) -> (i32, i32) {
    %c0_i32 = arith.constant 0 : i32
    %c0_i32_0 = arith.constant 0 : i32
    return %arg0, %c0_i32 : i32, i32
  }
}

</mosaic_0001>

<bundles_post_ra>
// kernel: toynet_forward.2
= control target key start
LH: loop header
LB: loop body
LE: loop exit
PB: predicated region body
PF: predicated region fallthrough
CT: control target
= control target key end

     0   :  { %10 = vsyncpa [#allocation3], 0  ;;  %s1122_s18 = smov [#allocation2]   ;;  %s1454_s0 = inlined_call_operand.vmem [shape: f32[64,128], index: 0, kind: input, shape index: {}]   ;;  %s1455_s1 = inlined_call_operand.vmem [shape: bf16[128,256], index: 1, kind: input, shape index: {}]   ;;  %s1456_s2 = inlined_call_operand.vmem [shape: f32[1,256], index: 2, kind: input, shape index: {}]   ;;  %s1457_s3 = inlined_call_operand.hbm [shape: bf16[256,256], index: 3, kind: input, shape index: {}]   ;;  %s1458_s4 = inlined_call_operand.vmem [shape: f32[1,256], index: 4, kind: input, shape index: {}]   ;;  %s1459_s5 = inlined_call_operand.vmem [shape: bf16[64,256], index: 5, kind: output, shape index: {}]  }
   0x1   :  { %s22_s19 = sshll.u32 %s1122_s18, 4  ;;  %s1098_s22 = scalar_lea.hbm %s1457_s3, 4096  ;;  %s23_s19 = int_to_ptr.vmem [resolvable:$true] %s22_s19 }
   0x2   :  { %p1099_p0 = scmp.ne.s32.totalorder %s1457_s3, %s1098_s22  ;;  %p1102_p1 = scmp.lt.u32.totalorder %s1098_s22, %s1457_s3 }
   0x4   :  { %p1104_p2 = pnand %p1102_p1, %p1099_p0 }
   0x6   :  { %1107 = shalt.err (!%p1104_p2)
}
   0x7   :  { %s1108_s27 = scalar_lea.vmem %s23_s19, 4096  ;;  %p1113_p4 = scmp.lt.s32.totalorder %s23_s19, %s23_s19 }
   0x8   :  { %p1109_p3 = scmp.ne.s32.totalorder %s23_s19, %s1108_s27  ;;  %p1114_p5 = scmp.lt.s32.totalorder %s1108_s27, %s1108_s27 }
   0xa   :  { %p1115_p6 = por %p1114_p5, %p1113_p4 }
   0xc   :  { %p1116_p7 = pnand %p1115_p6, %p1109_p3 }
   0xe   :  { %1119 = shalt.err (!%p1116_p7)
}
   0xf   :  { %s1123_s28 = smov 128   ;;  %s1124_s29 = smov 8  }
  0x10   :  { %28 = dma.hbm_to_vmem [thread:$0]  %s1457_s3, 4096, %s23_s19, [#allocation3], %s1123_s28, %s1123_s28, %s1124_s29  }
  0x11   :  { %1120 = dma.done.wait [#allocation3], 4096  }
  0x12   :  { %1121 = vsyncadd [#allocation3], 4294963200  ;;  %v1125_v0 = vmov 0   ;;  %v898_v1 = vld [vmem:[%s1455_s1 + $0x4] ss:$8 sps:$4 sm:$0xff]   ;;  %v37_v33 = vld [vmem:[%s1454_s0 + $0x10] sm:$0xff]  ;;  %v65_v61 = vlaneseq }
  0x13   :  { %187 = vmatprep.mubr.bf16.mxu0 %v1125_v0  ;;  %v900_v2 = vld [vmem:[%s1455_s1] ss:$8 sps:$4 sm:$0xff]   ;;  %155 = vmatprep.subr.bf16.mxu0 %v898_v1  ;;  %v901_v3 = vld [vmem:[%s1455_s1 + $0x14] ss:$8 sps:$4 sm:$0xff]   ;;  %v903_v4 = vld [vmem:[%s1455_s1 + $0x10] ss:$8 sps:$4 sm:$0xff]  }
  0x14   :  { %156 = vmatpush1.bf16.msra.mxu0 %v900_v2  ;;  %v904_v5 = vld [vmem:[%s1455_s1 + $0x24] ss:$8 sps:$4 sm:$0xff]   ;;  %v906_v6 = vld [vmem:[%s1455_s1 + $0x20] ss:$8 sps:$4 sm:$0xff]   ;;  %v907_v7 = vld [vmem:[%s1455_s1 + $0x34] ss:$8 sps:$4 sm:$0xff]  }
  0x15   :  { %157 = vmatprep.subr.bf16.mxu0 %v901_v3  ;;  %v909_v8 = vld [vmem:[%s1455_s1 + $0x30] ss:$8 sps:$4 sm:$0xff]   ;;  %v910_v9 = vld [vmem:[%s1455_s1 + $0x44] ss:$8 sps:$4 sm:$0xff]   ;;  %v924_v11 = vld [vmem:[#allocation2] ss:$8 sps:$4 sm:$0xff]  }
  0x16   :  { %v922_v10 = vld [vmem:[#allocation2 + $0x4] ss:$8 sps:$4 sm:$0xff]   ;;  %v912_v12 = vld [vmem:[%s1455_s1 + $0x40] ss:$8 sps:$4 sm:$0xff]   ;;  %v925_v13 = vld [vmem:[#allocation2 + $0x14] ss:$8 sps:$4 sm:$0xff]  }
  0x17   :  { %v913_v14 = vld [vmem:[%s1455_s1 + $0x54] ss:$8 sps:$4 sm:$0xff]   ;;  %552 = vmatprep.subr.bf16.mxu1 %v922_v10  ;;  %v927_v15 = vld [vmem:[#allocation2 + $0x10] ss:$8 sps:$4 sm:$0xff]   ;;  %v928_v16 = vld [vmem:[#allocation2 + $0x24] ss:$8 sps:$4 sm:$0xff]  }
  0x18   :  { %158 = vmatpush1.bf16.msra.mxu0 %v903_v4  ;;  %553 = vmatpush1.bf16.msra.mxu1 %v924_v11  ;;  %v915_v17 = vld [vmem:[%s1455_s1 + $0x50] ss:$8 sps:$4 sm:$0xff]   ;;  %v916_v18 = vld [vmem:[%s1455_s1 + $0x64] ss:$8 sps:$4 sm:$0xff]   ;;  %v930_v19 = vld [vmem:[#allocation2 + $0x20] ss:$8 sps:$4 sm:$0xff]  }
  0x19   :  { %159 = vmatprep.subr.bf16.mxu0 %v904_v5  ;;  %554 = vmatprep.subr.bf16.mxu1 %v925_v13  ;;  %v918_v20 = vld [vmem:[%s1455_s1 + $0x60] ss:$8 sps:$4 sm:$0xff]   ;;  %v919_v21 = vld [vmem:[%s1455_s1 + $0x74] ss:$8 sps:$4 sm:$0xff]   ;;  %v933_v23 = vld [vmem:[#allocation2 + $0x30] ss:$8 sps:$4 sm:$0xff]  }
  0x1a   :  { %v931_v22 = vld [vmem:[#allocation2 + $0x34] ss:$8 sps:$4 sm:$0xff]   ;;  %v934_v24 = vld [vmem:[#allocation2 + $0x44] ss:$8 sps:$4 sm:$0xff]   ;;  %v921_v25 = vld [vmem:[%s1455_s1 + $0x70] ss:$8 sps:$4 sm:$0xff]  }
  0x1b   :  { %v35_v26 = vld [vmem:[%s1454_s0] sm:$0xff]  ;;  %v36_v27 = vld [vmem:[%s1454_s0 + $0x8] sm:$0xff]  ;;  %v937_v30 = vld [vmem:[#allocation2 + $0x54] ss:$8 sps:$4 sm:$0xff]   ;;  %v1244_v62 = vshrl.u32 %v65_v61, 7 }
  0x1c   :  { %160 = vmatpush1.bf16.msra.mxu0 %v906_v6  ;;  %555 = vmatpush1.bf16.msra.mxu1 %v927_v15  ;;  %v936_v28 = vld [vmem:[#allocation2 + $0x40] ss:$8 sps:$4 sm:$0xff]   ;;  %v43_v29 = vpack.c.bf16 %v36_v27, %v35_v26  ;;  %v939_v31 = vld [vmem:[#allocation2 + $0x50] ss:$8 sps:$4 sm:$0xff]   ;;  %v940_v32 = vld [vmem:[#allocation2 + $0x64] ss:$8 sps:$4 sm:$0xff]  }
  0x1d   :  { %161 = vmatprep.subr.bf16.mxu0 %v907_v7  ;;  %556 = vmatprep.subr.bf16.mxu1 %v928_v16  ;;  %v38_v34 = vld [vmem:[%s1454_s0 + $0x18] sm:$0xff]  ;;  %v942_v35 = vld [vmem:[#allocation2 + $0x60] ss:$8 sps:$4 sm:$0xff]   ;;  %v41_v40 = vld [vmem:[%s1454_s0 + $0x30] sm:$0xff]  ;;  %v67_v63 = vsub.s32 0, %v1244_v62  ;;  %v71_v1 = vsub.s32 1, %v1244_v62 }
  0x1e   :  { %v44_v36 = vpack.c.bf16 %v38_v34, %v37_v33  ;;  %v39_v37 = vld [vmem:[%s1454_s0 + $0x20] sm:$0xff]  ;;  %v40_v38 = vld [vmem:[%s1454_s0 + $0x28] sm:$0xff]  ;;  %v42_v41 = vld [vmem:[%s1454_s0 + $0x38] sm:$0xff] }
  0x1f   :  { %v45_v39 = vpack.c.bf16 %v40_v38, %v39_v37  ;;  %v46_v42 = vpack.c.bf16 %v42_v41, %v41_v40  ;;  %v943_v43 = vld [vmem:[#allocation2 + $0x74] ss:$8 sps:$4 sm:$0xff]   ;;  %v945_v44 = vld [vmem:[#allocation2 + $0x70] ss:$8 sps:$4 sm:$0xff]   ;;  %v946_v45 = vld [vmem:[#allocation2 + $0x84] ss:$8 sps:$4 sm:$0xff]  }
  0x20   :  { %162 = vmatpush1.bf16.msra.mxu0 %v909_v8  ;;  %557 = vmatpush1.bf16.msra.mxu1 %v930_v19  ;;  %v948_v46 = vld [vmem:[#allocation2 + $0x80] ss:$8 sps:$4 sm:$0xff]   ;;  %v949_v47 = vld [vmem:[#allocation2 + $0x94] ss:$8 sps:$4 sm:$0xff]   ;;  %v951_v48 = vld [vmem:[#allocation2 + $0x90] ss:$8 sps:$4 sm:$0xff]  }
  0x21   :  { %163 = vmatprep.subr.bf16.mxu0 %v910_v9  ;;  %558 = vmatprep.subr.bf16.mxu1 %v931_v22  ;;  %v952_v49 = vld [vmem:[#allocation2 + $0xa4] ss:$8 sps:$4 sm:$0xff]   ;;  %v954_v50 = vld [vmem:[#allocation2 + $0xa0] ss:$8 sps:$4 sm:$0xff]   ;;  %v955_v51 = vld [vmem:[#allocation2 + $0xb4] ss:$8 sps:$4 sm:$0xff]  }
  0x22   :  { %v957_v52 = vld [vmem:[#allocation2 + $0xb0] ss:$8 sps:$4 sm:$0xff]   ;;  %v958_v53 = vld [vmem:[#allocation2 + $0xc4] ss:$8 sps:$4 sm:$0xff]   ;;  %v960_v54 = vld [vmem:[#allocation2 + $0xc0] ss:$8 sps:$4 sm:$0xff]  }
  0x23   :  { %v961_v55 = vld [vmem:[#allocation2 + $0xd4] ss:$8 sps:$4 sm:$0xff]   ;;  %v963_v56 = vld [vmem:[#allocation2 + $0xd0] ss:$8 sps:$4 sm:$0xff]   ;;  %v964_v57 = vld [vmem:[#allocation2 + $0xe4] ss:$8 sps:$4 sm:$0xff]  }
  0x24   :  { %164 = vmatpush1.bf16.msra.mxu0 %v912_v12  ;;  %559 = vmatpush1.bf16.msra.mxu1 %v933_v23  ;;  %v966_v58 = vld [vmem:[#allocation2 + $0xe0] ss:$8 sps:$4 sm:$0xff]   ;;  %v967_v59 = vld [vmem:[#allocation2 + $0xf4] ss:$8 sps:$4 sm:$0xff]   ;;  %v969_v60 = vld [vmem:[#allocation2 + $0xf0] ss:$8 sps:$4 sm:$0xff]  }
  0x25   :  { %165 = vmatprep.subr.bf16.mxu0 %v913_v14  ;;  %560 = vmatprep.subr.bf16.mxu1 %v934_v24 }
  0x28   :  { %166 = vmatpush1.bf16.msra.mxu0 %v915_v17  ;;  %561 = vmatpush1.bf16.msra.mxu1 %v936_v28 }
  0x29   :  { %167 = vmatprep.subr.bf16.mxu0 %v916_v18  ;;  %562 = vmatprep.subr.bf16.mxu1 %v937_v30 }
  0x2c   :  { %168 = vmatpush1.bf16.msra.mxu0 %v918_v20  ;;  %563 = vmatpush1.bf16.msra.mxu1 %v939_v31 }
  0x2d   :  { %169 = vmatprep.subr.bf16.mxu0 %v919_v21  ;;  %564 = vmatprep.subr.bf16.mxu1 %v940_v32 }
  0x30   :  { %170 = vmatpush1.bf16.msra.mxu0 %v921_v25  ;;  %565 = vmatpush1.bf16.msra.mxu1 %v942_v35 }
  0x31   :  { %566 = vmatprep.subr.bf16.mxu1 %v943_v43 }
  0x33   :  { %188 = vmatmul.mubr.bf16.vlgmr.msra.gmra.mrb[0].mxu0 %v43_v29 }
  0x34   :  { %197 = vmatprep.mubr.bf16.mxu0 %v1125_v0  ;;  %567 = vmatpush1.bf16.msra.mxu1 %v945_v44 }
  0x35   :  { %568 = vmatprep.subr.bf16.mxu1 %v946_v45 }
  0x38   :  { %569 = vmatpush1.bf16.msra.mxu1 %v948_v46 }
  0x39   :  { %570 = vmatprep.subr.bf16.mxu1 %v949_v47 }
  0x3b   :  { %198 = vmatmul.mubr.bf16.gmra.mrb[4].mxu0 %v44_v36 }
  0x3c   :  { %207 = vmatprep.mubr.bf16.mxu0 %v1125_v0  ;;  %571 = vmatpush1.bf16.msra.mxu1 %v951_v48 }
  0x3d   :  { %572 = vmatprep.subr.bf16.mxu1 %v952_v49 }
  0x40   :  { %573 = vmatpush1.bf16.msra.mxu1 %v954_v50 }
  0x41   :  { %574 = vmatprep.subr.bf16.mxu1 %v955_v51 }
  0x43   :  { %208 = vmatmul.mubr.bf16.gmra.mrb[8].mxu0 %v45_v39 }
  0x44   :  { %217 = vmatprep.mubr.bf16.mxu0 %v1125_v0  ;;  %575 = vmatpush1.bf16.msra.mxu1 %v957_v52  ;;  %v63_v0 = vld [vmem:[%s1456_s2] sm:$0x3] }
  0x45   :  { %576 = vmatprep.subr.bf16.mxu1 %v958_v53  ;;  %v1253_v2 = vrot.slane %v63_v0, %v67_v63  ;;  %v1257_v3 = vrot.slane %v63_v0, %v71_v1 }
  0x48   :  { %577 = vmatpush1.bf16.msra.mxu1 %v960_v54 }
  0x49   :  { %578 = vmatprep.subr.bf16.mxu1 %v961_v55 }
  0x4b   :  { %218 = vmatmul.mubr.bf16.gmra.mrb[12].mxu0 %v46_v42 }
  0x4c   :  { %579 = vmatpush1.bf16.msra.mxu1 %v963_v56 }
  0x4d   :  { %580 = vmatprep.subr.bf16.mxu1 %v964_v57 }
  0x50   :  { %581 = vmatpush1.bf16.msra.mxu1 %v966_v58 }
  0x51   :  { %582 = vmatprep.subr.bf16.mxu1 %v967_v59 }
  0x54   :  { %583 = vmatpush1.bf16.msra.mxu1 %v969_v60 }
 0x106   :  { %v189_v4 = vpop.f32.mrb[0].mxu0 }
 0x107   :  { %v1260_v5 = vadd.f32 %v189_v4, %v1253_v2  ;;  %v191_v6 = vpop.f32.mrb[1].mxu0 }
 0x108   :  { %v1263_v7 = vadd.f32 %v191_v6, %v1257_v3  ;;  %v193_v8 = vpop.f32.mrb[2].mxu0 }
 0x109   :  { %v814_v9 = vmul.f32 -1.442695, %v1260_v5  ;;  %v1267_v10 = vadd.f32 %v193_v8, %v1253_v2  ;;  %v195_v11 = vpop.f32.mrb[3].mxu0 }
 0x10a   :  { %v815_v12 = vmul.f32 -1.442695, %v1263_v7  ;;  %v1271_v13 = vadd.f32 %v195_v11, %v1257_v3 }
 0x10b   :  { %970 = vpow2.f32 %v814_v9  ;;  %v816_v14 = vmul.f32 -1.442695, %v1267_v10 }
 0x10c   :  { %972 = vpow2.f32 %v815_v12  ;;  %v817_v15 = vmul.f32 -1.442695, %v1271_v13 }
 0x10d   :  { %974 = vpow2.f32 %v816_v14 }
 0x10e   :  { %976 = vpow2.f32 %v817_v15  ;;  %v199_v16 = vpop.f32.mrb[4].mxu0 }
 0x10f   :  { %v1276_v17 = vadd.f32 %v199_v16, %v1253_v2  ;;  %v201_v18 = vpop.f32.mrb[5].mxu0 }
 0x110   :  { %v1279_v19 = vadd.f32 %v201_v18, %v1257_v3  ;;  %v203_v20 = vpop.f32.mrb[6].mxu0 }
 0x111   :  { %v818_v21 = vmul.f32 -1.442695, %v1276_v17  ;;  %v1283_v22 = vadd.f32 %v203_v20, %v1253_v2  ;;  %v205_v23 = vpop.f32.mrb[7].mxu0 }
 0x112   :  { %v819_v24 = vmul.f32 -1.442695, %v1279_v19  ;;  %v1287_v25 = vadd.f32 %v205_v23, %v1257_v3 }
 0x113   :  { %978 = vpow2.f32 %v818_v21  ;;  %v820_v26 = vmul.f32 -1.442695, %v1283_v22 }
 0x114   :  { %980 = vpow2.f32 %v819_v24  ;;  %v821_v27 = vmul.f32 -1.442695, %v1287_v25 }
 0x115   :  { %v971_v28 = vpop.eup %970  ;;  %982 = vpow2.f32 %v820_v26 }
 0x116   :  { %v973_v29 = vpop.eup %972  ;;  %v276_v30 = vadd.f32 1.0, %v971_v28  ;;  %984 = vpow2.f32 %v821_v27  ;;  %v209_v31 = vpop.f32.mrb[8].mxu0 }
 0x117   :  { %v975_v32 = vpop.eup %974  ;;  %v277_v33 = vadd.f32 1.0, %v973_v29  ;;  %v1292_v34 = vadd.f32 %v209_v31, %v1253_v2  ;;  %v211_v35 = vpop.f32.mrb[9].mxu0 }
 0x118   :  { %v977_v36 = vpop.eup %976  ;;  %986 = vrcp.f32 %v276_v30  ;;  %v278_v37 = vadd.f32 1.0, %v975_v32  ;;  %v1295_v38 = vadd.f32 %v211_v35, %v1257_v3  ;;  %v213_v39 = vpop.f32.mrb[10].mxu0 }
 0x119   :  { %988 = vrcp.f32 %v277_v33  ;;  %v279_v40 = vadd.f32 1.0, %v977_v36  ;;  %v822_v41 = vmul.f32 -1.442695, %v1292_v34  ;;  %v1299_v42 = vadd.f32 %v213_v39, %v1253_v2  ;;  %v215_v43 = vpop.f32.mrb[11].mxu0 }
 0x11a   :  { %990 = vrcp.f32 %v278_v37  ;;  %v823_v44 = vmul.f32 -1.442695, %v1295_v38  ;;  %v1303_v45 = vadd.f32 %v215_v43, %v1257_v3 }
 0x11b   :  { %992 = vrcp.f32 %v279_v40  ;;  %v824_v46 = vmul.f32 -1.442695, %v1299_v42 }
 0x11c   :  { %994 = vpow2.f32 %v822_v41  ;;  %v825_v47 = vmul.f32 -1.442695, %v1303_v45 }
 0x11d   :  { %v979_v48 = vpop.eup %978  ;;  %996 = vpow2.f32 %v823_v44 }
 0x11e   :  { %v981_v49 = vpop.eup %980  ;;  %v280_v50 = vadd.f32 1.0, %v979_v48  ;;  %998 = vpow2.f32 %v824_v46  ;;  %v219_v51 = vpop.f32.mrb[12].mxu0 }
 0x11f   :  { %v983_v52 = vpop.eup %982  ;;  %v281_v53 = vadd.f32 1.0, %v981_v49  ;;  %1000 = vpow2.f32 %v825_v47  ;;  %v1308_v54 = vadd.f32 %v219_v51, %v1253_v2  ;;  %v221_v55 = vpop.f32.mrb[13].mxu0 }
 0x120   :  { %v985_v56 = vpop.eup %984  ;;  %1002 = vrcp.f32 %v280_v50  ;;  %v282_v57 = vadd.f32 1.0, %v983_v52  ;;  %v1311_v58 = vadd.f32 %v221_v55, %v1257_v3  ;;  %v223_v59 = vpop.f32.mrb[14].mxu0 }
 0x121   :  { %1004 = vrcp.f32 %v281_v53  ;;  %v283_v60 = vadd.f32 1.0, %v985_v56  ;;  %v826_v61 = vmul.f32 -1.442695, %v1308_v54  ;;  %v1315_v0 = vadd.f32 %v223_v59, %v1253_v2  ;;  %v225_v4 = vpop.f32.mrb[15].mxu0 }
 0x122   :  { %v987_v6 = vpop.eup %986  ;;  %1006 = vrcp.f32 %v282_v57  ;;  %v827_v8 = vmul.f32 -1.442695, %v1311_v58  ;;  %v1319_v9 = vadd.f32 %v225_v4, %v1257_v3 }
 0x123   :  { %v989_v11 = vpop.eup %988  ;;  %1008 = vrcp.f32 %v283_v60  ;;  %v828_v12 = vmul.f32 -1.442695, %v1315_v0  ;;  %v324_v2 = vmul.f32 %v987_v6, %v1260_v5 }
 0x124   :  { %v991_v14 = vpop.eup %990  ;;  %1010 = vpow2.f32 %v826_v61  ;;  %v829_v15 = vmul.f32 -1.442695, %v1319_v9  ;;  %v325_v21 = vmul.f32 %v989_v11, %v1263_v7 }
 0x125   :  { %v993_v16 = vpop.eup %992  ;;  %v326_v18 = vmul.f32 %v991_v14, %v1267_v10  ;;  %1012 = vpow2.f32 %v827_v8 }
 0x126   :  { %v995_v20 = vpop.eup %994  ;;  %1014 = vpow2.f32 %v828_v12  ;;  %v327_v3 = vmul.f32 %v993_v16, %v1271_v13 }
 0x127   :  { %v997_v23 = vpop.eup %996  ;;  %v284_v24 = vadd.f32 1.0, %v995_v20  ;;  %1016 = vpow2.f32 %v829_v15  ;;  %v340_v26 = vpack.c.bf16 %v326_v18, %v324_v2 }
 0x128   :  { %v999_v27 = vpop.eup %998  ;;  %v285_v28 = vadd.f32 1.0, %v997_v23  ;;  %v341_v29 = vpack.c.bf16 %v327_v3, %v325_v21 }
 0x129   :  { %v1001_v30 = vpop.eup %1000  ;;  %1018 = vrcp.f32 %v284_v24  ;;  %v286_v31 = vadd.f32 1.0, %v999_v27 }
 0x12a   :  { %v1003_v5 = vpop.eup %1002  ;;  %1020 = vrcp.f32 %v285_v28  ;;  %v287_v10 = vadd.f32 1.0, %v1001_v30  ;;  %584 = vmatprep.mubr.bf16.mxu1 %v341_v29 }
 0x12b   :  { %v1005_v32 = vpop.eup %1004  ;;  %1022 = vrcp.f32 %v286_v31  ;;  %585 = vmatmul.mubr.bf16.vlgmr.msra.gmra.mrb[0].mxu1 %v340_v26  ;;  %v328_v33 = vmul.f32 %v1003_v5, %v1276_v17 }
 0x12c   :  { %v1007_v7 = vpop.eup %1006  ;;  %1024 = vrcp.f32 %v287_v10  ;;  %v329_v37 = vmul.f32 %v1005_v32, %v1279_v19 }
 0x12d   :  { %v1009_v13 = vpop.eup %1008  ;;  %v330_v35 = vmul.f32 %v1007_v7, %v1283_v22 }
 0x12e   :  { %v1011_v36 = vpop.eup %1010  ;;  %v331_v39 = vmul.f32 %v1009_v13, %v1287_v25 }
 0x12f   :  { %v1013_v40 = vpop.eup %1012  ;;  %v288_v41 = vadd.f32 1.0, %v1011_v36  ;;  %v342_v43 = vpack.c.bf16 %v330_v35, %v328_v33 }
 0x130   :  { %v1015_v44 = vpop.eup %1014  ;;  %v289_v46 = vadd.f32 1.0, %v1013_v40  ;;  %v343_v47 = vpack.c.bf16 %v331_v39, %v329_v37 }
 0x131   :  { %v1017_v48 = vpop.eup %1016  ;;  %1026 = vrcp.f32 %v288_v41  ;;  %v290_v49 = vadd.f32 1.0, %v1015_v44 }
 0x132   :  { %1028 = vrcp.f32 %v289_v46  ;;  %v291_v50 = vadd.f32 1.0, %v1017_v48  ;;  %594 = vmatprep.mubr.bf16.mxu1 %v343_v47 }
 0x133   :  { %v1019_v17 = vpop.eup %1018  ;;  %1030 = vrcp.f32 %v290_v49  ;;  %595 = vmatmul.mubr.bf16.gmra.mrb[4].mxu1 %v342_v43 }
 0x134   :  { %v1021_v22 = vpop.eup %1020  ;;  %1032 = vrcp.f32 %v291_v50  ;;  %v332_v25 = vmul.f32 %v1019_v17, %v1292_v34 }
 0x135   :  { %v1023_v19 = vpop.eup %1022  ;;  %v333_v53 = vmul.f32 %v1021_v22, %v1295_v38 }
 0x136   :  { %v1025_v51 = vpop.eup %1024  ;;  %v334_v52 = vmul.f32 %v1023_v19, %v1299_v42 }
 0x137   :  { %v335_v55 = vmul.f32 %v1025_v51, %v1303_v45  ;;  %v380_v45 = vld [vmem:[%s1458_s4] sm:$0x3] }
 0x138   :  { %v344_v56 = vpack.c.bf16 %v334_v52, %v332_v25  ;;  %v1344_v12 = vrot.slane %v380_v45, %v67_v63 }
 0x139   :  { %v345_v57 = vpack.c.bf16 %v335_v55, %v333_v53 }
 0x13b   :  { %v1027_v59 = vpop.eup %1026  ;;  %604 = vmatprep.mubr.bf16.mxu1 %v345_v57 }
 0x13c   :  { %v1029_v60 = vpop.eup %1028  ;;  %605 = vmatmul.mubr.bf16.gmra.mrb[8].mxu1 %v344_v56  ;;  %v336_v6 = vmul.f32 %v1027_v59, %v1308_v54  ;;  %v1348_v54 = vrot.slane %v380_v45, %v71_v1 }
 0x13d   :  { %v1031_v61 = vpop.eup %1030  ;;  %v337_v34 = vmul.f32 %v1029_v60, %v1311_v58 }
 0x13e   :  { %v1033_v4 = vpop.eup %1032  ;;  %v338_v8 = vmul.f32 %v1031_v61, %v1315_v0 }
 0x13f   :  { %v339_v42 = vmul.f32 %v1033_v4, %v1319_v9 }
 0x140   :  { %v346_v11 = vpack.c.bf16 %v338_v8, %v336_v6 }
 0x141   :  { %v347_v38 = vpack.c.bf16 %v339_v42, %v337_v34 }
 0x143   :  { %614 = vmatprep.mubr.bf16.mxu1 %v347_v38 }
 0x144   :  { %615 = vmatmul.mubr.bf16.gmra.mrb[12].mxu1 %v346_v11 }
 0x1fe   :  { %v586_v0 = vpop.f32.mrb[0].mxu1 }
 0x1ff   :  { %v1351_v58 = vadd.f32 %v586_v0, %v1344_v12  ;;  %v588_v9 = vpop.f32.mrb[1].mxu1 }
 0x200   :  { %v1354_v14 = vadd.f32 %v588_v9, %v1348_v54  ;;  %v590_v15 = vpop.f32.mrb[2].mxu1 }
 0x201   :  { %v862_v16 = vmul.f32 -1.442695, %v1351_v58  ;;  %v1358_v2 = vadd.f32 %v590_v15, %v1344_v12  ;;  %v592_v63 = vpop.f32.mrb[3].mxu1 }
 0x202   :  { %v863_v18 = vmul.f32 -1.442695, %v1354_v14  ;;  %v1362_v62 = vadd.f32 %v592_v63, %v1348_v54 }
 0x203   :  { %1034 = vpow2.f32 %v862_v16  ;;  %v864_v1 = vmul.f32 -1.442695, %v1358_v2 }
 0x204   :  { %1036 = vpow2.f32 %v863_v18  ;;  %v865_v20 = vmul.f32 -1.442695, %v1362_v62 }
 0x205   :  { %1038 = vpow2.f32 %v864_v1 }
 0x206   :  { %1040 = vpow2.f32 %v865_v20  ;;  %v596_v21 = vpop.f32.mrb[4].mxu1 }
 0x207   :  { %v1367_v3 = vadd.f32 %v596_v21, %v1344_v12  ;;  %v598_v23 = vpop.f32.mrb[5].mxu1 }
 0x208   :  { %v1370_v24 = vadd.f32 %v598_v23, %v1348_v54  ;;  %v600_v26 = vpop.f32.mrb[6].mxu1 }
 0x209   :  { %v866_v27 = vmul.f32 -1.442695, %v1367_v3  ;;  %v1374_v28 = vadd.f32 %v600_v26, %v1344_v12  ;;  %v602_v29 = vpop.f32.mrb[7].mxu1 }
 0x20a   :  { %v867_v30 = vmul.f32 -1.442695, %v1370_v24  ;;  %v1378_v31 = vadd.f32 %v602_v29, %v1348_v54 }
 0x20b   :  { %1042 = vpow2.f32 %v866_v27  ;;  %v868_v5 = vmul.f32 -1.442695, %v1374_v28 }
 0x20c   :  { %1044 = vpow2.f32 %v867_v30  ;;  %v869_v10 = vmul.f32 -1.442695, %v1378_v31 }
 0x20d   :  { %v1035_v32 = vpop.eup %1034  ;;  %1046 = vpow2.f32 %v868_v5 }
 0x20e   :  { %v1037_v7 = vpop.eup %1036  ;;  %v673_v13 = vadd.f32 1.0, %v1035_v32  ;;  %1048 = vpow2.f32 %v869_v10 }
 0x20f   :  { %v1039_v33 = vpop.eup %1038  ;;  %v674_v35 = vadd.f32 1.0, %v1037_v7  ;;  %v606_v36 = vpop.f32.mrb[8].mxu1 }
 0x210   :  { %v1041_v37 = vpop.eup %1040  ;;  %1050 = vrcp.f32 %v673_v13  ;;  %v675_v39 = vadd.f32 1.0, %v1039_v33  ;;  %v1383_v40 = vadd.f32 %v606_v36, %v1344_v12  ;;  %v608_v41 = vpop.f32.mrb[9].mxu1 }
 0x211   :  { %1052 = vrcp.f32 %v674_v35  ;;  %v676_v43 = vadd.f32 1.0, %v1041_v37  ;;  %v1386_v44 = vadd.f32 %v608_v41, %v1348_v54  ;;  %v610_v46 = vpop.f32.mrb[10].mxu1 }
 0x212   :  { %1054 = vrcp.f32 %v675_v39  ;;  %v870_v47 = vmul.f32 -1.442695, %v1383_v40  ;;  %v1390_v48 = vadd.f32 %v610_v46, %v1344_v12  ;;  %v612_v49 = vpop.f32.mrb[11].mxu1 }
 0x213   :  { %1056 = vrcp.f32 %v676_v43  ;;  %v871_v50 = vmul.f32 -1.442695, %v1386_v44  ;;  %v1394_v17 = vadd.f32 %v612_v49, %v1348_v54 }
 0x214   :  { %1058 = vpow2.f32 %v870_v47  ;;  %v872_v22 = vmul.f32 -1.442695, %v1390_v48 }
 0x215   :  { %v1043_v19 = vpop.eup %1042  ;;  %1060 = vpow2.f32 %v871_v50  ;;  %v873_v51 = vmul.f32 -1.442695, %v1394_v17 }
 0x216   :  { %v1045_v25 = vpop.eup %1044  ;;  %v677_v52 = vadd.f32 1.0, %v1043_v19  ;;  %1062 = vpow2.f32 %v872_v22 }
 0x217   :  { %v1047_v53 = vpop.eup %1046  ;;  %v678_v55 = vadd.f32 1.0, %v1045_v25  ;;  %1064 = vpow2.f32 %v873_v51  ;;  %v616_v56 = vpop.f32.mrb[12].mxu1 }
 0x218   :  { %v1049_v57 = vpop.eup %1048  ;;  %1066 = vrcp.f32 %v677_v52  ;;  %v679_v59 = vadd.f32 1.0, %v1047_v53  ;;  %v1399_v60 = vadd.f32 %v616_v56, %v1344_v12  ;;  %v618_v61 = vpop.f32.mrb[13].mxu1 }
 0x219   :  { %1068 = vrcp.f32 %v678_v55  ;;  %v680_v4 = vadd.f32 1.0, %v1049_v57  ;;  %v1402_v6 = vadd.f32 %v618_v61, %v1348_v54  ;;  %v620_v8 = vpop.f32.mrb[14].mxu1 }
 0x21a   :  { %v1051_v34 = vpop.eup %1050  ;;  %1070 = vrcp.f32 %v679_v59  ;;  %v874_v42 = vmul.f32 -1.442695, %v1399_v60  ;;  %v1406_v11 = vadd.f32 %v620_v8, %v1344_v12  ;;  %v622_v38 = vpop.f32.mrb[15].mxu1 }
 0x21b   :  { %v1053_v45 = vpop.eup %1052  ;;  %v721_v0 = vmul.f32 %v1051_v34, %v1351_v58  ;;  %1072 = vrcp.f32 %v680_v4  ;;  %v875_v9 = vmul.f32 -1.442695, %v1402_v6  ;;  %v1411_v15 = vadd.f32 %v622_v38, %v1348_v54 }
 0x21c   :  { %v1055_v16 = vpop.eup %1054  ;;  %v722_v63 = vmul.f32 %v1053_v45, %v1354_v14  ;;  %1074 = vpow2.f32 %v874_v42  ;;  %v876_v18 = vmul.f32 -1.442695, %v1406_v11 }
 0x21d   :  { %v1057_v1 = vpop.eup %1056  ;;  %v723_v12 = vmul.f32 %v1055_v16, %v1358_v2  ;;  %1076 = vpow2.f32 %v875_v9  ;;  %v877_v20 = vmul.f32 -1.442695, %v1411_v15 }
 0x21e   :  { %v1059_v21 = vpop.eup %1058  ;;  %v886_v58 = vpack.c.bf16 %v722_v63, %v721_v0  ;;  %v724_v23 = vmul.f32 %v1057_v1, %v1362_v62  ;;  %1078 = vpow2.f32 %v876_v18 }
 0x21f   :  { %v1061_v26 = vpop.eup %1060  ;;  %v681_v54 = vadd.f32 1.0, %v1059_v21  ;;  %1080 = vpow2.f32 %v877_v20 }
 0x220   :  { %v1063_v27 = vpop.eup %1062  ;;  %785 = vst [vmem:[%s1459_s5] sm:$0xff] %v886_v58  ;;  %v887_v14 = vpack.c.bf16 %v724_v23, %v723_v12  ;;  %v682_v29 = vadd.f32 1.0, %v1061_v26 }
 0x221   :  { %v1065_v30 = vpop.eup %1064  ;;  %1082 = vrcp.f32 %v681_v54  ;;  %v683_v2 = vadd.f32 1.0, %v1063_v27 }
 0x222   :  { %v1067_v5 = vpop.eup %1066  ;;  %786 = vst [vmem:[%s1459_s5 + $0x8] sm:$0xff] %v887_v14  ;;  %1084 = vrcp.f32 %v682_v29  ;;  %v684_v62 = vadd.f32 1.0, %v1065_v30 }
 0x223   :  { %v1069_v10 = vpop.eup %1068  ;;  %v725_v32 = vmul.f32 %v1067_v5, %v1367_v3  ;;  %1086 = vrcp.f32 %v683_v2 }
 0x224   :  { %v1071_v7 = vpop.eup %1070  ;;  %v726_v13 = vmul.f32 %v1069_v10, %v1370_v24  ;;  %1088 = vrcp.f32 %v684_v62 }
 0x225   :  { %v1073_v33 = vpop.eup %1072  ;;  %v727_v35 = vmul.f32 %v1071_v7, %v1374_v28 }
 0x226   :  { %v1075_v36 = vpop.eup %1074  ;;  %v888_v37 = vpack.c.bf16 %v726_v13, %v725_v32  ;;  %v728_v39 = vmul.f32 %v1073_v33, %v1378_v31 }
 0x227   :  { %v1077_v41 = vpop.eup %1076  ;;  %v685_v43 = vadd.f32 1.0, %v1075_v36 }
 0x228   :  { %v1079_v46 = vpop.eup %1078  ;;  %787 = vst [vmem:[%s1459_s5 + $0x10] sm:$0xff] %v888_v37  ;;  %v889_v3 = vpack.c.bf16 %v728_v39, %v727_v35  ;;  %v686_v47 = vadd.f32 1.0, %v1077_v41 }
 0x229   :  { %v1081_v49 = vpop.eup %1080  ;;  %1090 = vrcp.f32 %v685_v43  ;;  %v687_v24 = vadd.f32 1.0, %v1079_v46 }
 0x22a   :  { %788 = vst [vmem:[%s1459_s5 + $0x18] sm:$0xff] %v889_v3  ;;  %1092 = vrcp.f32 %v686_v47  ;;  %v688_v28 = vadd.f32 1.0, %v1081_v49 }
 0x22b   :  { %v1083_v50 = vpop.eup %1082  ;;  %1094 = vrcp.f32 %v687_v24 }
 0x22c   :  { %v1085_v31 = vpop.eup %1084  ;;  %v729_v22 = vmul.f32 %v1083_v50, %v1383_v40  ;;  %1096 = vrcp.f32 %v688_v28 }
 0x22d   :  { %v1087_v19 = vpop.eup %1086  ;;  %v730_v51 = vmul.f32 %v1085_v31, %v1386_v44 }
 0x22e   :  { %v1089_v25 = vpop.eup %1088  ;;  %v731_v52 = vmul.f32 %v1087_v19, %v1390_v48 }
 0x22f   :  { %v890_v53 = vpack.c.bf16 %v730_v51, %v729_v22  ;;  %v732_v55 = vmul.f32 %v1089_v25, %v1394_v17 }
 0x231   :  { %789 = vst [vmem:[%s1459_s5 + $0x20] sm:$0xff] %v890_v53  ;;  %v891_v56 = vpack.c.bf16 %v732_v55, %v731_v52 }
 0x233   :  { %v1091_v57 = vpop.eup %1090  ;;  %790 = vst [vmem:[%s1459_s5 + $0x28] sm:$0xff] %v891_v56 }
 0x234   :  { %v1093_v40 = vpop.eup %1092  ;;  %v733_v59 = vmul.f32 %v1091_v57, %v1399_v60 }
 0x235   :  { %v1095_v44 = vpop.eup %1094  ;;  %v734_v61 = vmul.f32 %v1093_v40, %v1402_v6 }
 0x236   :  { %v1097_v48 = vpop.eup %1096  ;;  %v735_v4 = vmul.f32 %v1095_v44, %v1406_v11 }
 0x237   :  { %v892_v17 = vpack.c.bf16 %v734_v61, %v733_v59  ;;  %v736_v8 = vmul.f32 %v1097_v48, %v1411_v15 }
 0x239   :  { %791 = vst [vmem:[%s1459_s5 + $0x30] sm:$0xff] %v892_v17  ;;  %v893_v34 = vpack.c.bf16 %v736_v8, %v735_v4 }
 0x23b   :  { %792 = vst [vmem:[%s1459_s5 + $0x38] sm:$0xff] %v893_v34 }
 0x23c   :  { %797 = vsyncpa [#allocation3], 1 }

// kernel: toynet_forward.3
= control target key start
LH: loop header
LB: loop body
LE: loop exit
PB: predicated region body
PF: predicated region fallthrough
CT: control target
= control target key end

     0   :  { %s7389_s18 = smov 0   ;;  %s9693_s0 = inlined_call_operand.vmem [shape: s32[512,1], index: 0, kind: input, shape index: {}]   ;;  %s9694_s1 = inlined_call_operand.vmem [shape: f32[512,8], index: 1, kind: input, shape index: {}]   ;;  %s9695_s2 = inlined_call_operand.vmem [shape: bf16[64,256], index: 2, kind: input, shape index: {}]   ;;  %s9696_s3 = inlined_call_operand.vmem [shape: bf16[8,256], index: 3, kind: input, shape index: {}]   ;;  %s9697_s4 = inlined_call_operand.vmem [shape: f32[1,256], index: 4, kind: input, shape index: {}]   ;;  %s9698_s5 = inlined_call_operand.vmem [shape: bf16[256,256], index: 5, kind: input, shape index: {}]   ;;  %s9699_s6 = inlined_call_operand.vmem [shape: f32[1,256], index: 6, kind: input, shape index: {}]   ;;  %s9700_s7 = inlined_call_operand.vmem [shape: bf16[256,256], index: 7, kind: input, shape index: {}]   ;;  %s9701_s8 = inlined_call_operand.vmem [shape: f32[1,256], index: 8, kind: input, shape index: {}]   ;;  %s9702_s9 = inlined_call_operand.vmem [shape: bf16[256,256], index: 9, kind: input, shape index: {}]   ;;  %s9703_s10 = inlined_call_operand.vmem [shape: f32[1,256], index: 10, kind: input, shape index: {}]   ;;  %s9704_s11 = inlined_call_operand.vmem [shape: bf16[256,256], index: 11, kind: input, shape index: {}]   ;;  %s9705_s12 = inlined_call_operand.vmem [shape: f32[1,256], index: 12, kind: input, shape index: {}]   ;;  %s9706_s13 = inlined_call_operand.vmem [shape: bf16[256,8], index: 13, kind: input, shape index: {}]   ;;  %s9707_s14 = inlined_call_operand.vmem [shape: f32[1,8], index: 14, kind: input, shape index: {}]   ;;  %s9708_s15 = inlined_call_operand.vmem [shape: f32[512,8], index: 15, kind: output, shape index: {}]  }
   0x1 LB: > { %s5336_s19 = sadd.s32 4294967295, %s7305_s18   ;;  %p5340_p0 = scmp.ge.s32.totalorder %s7305_s18, 1  ;;  %s7305_s18 = sphi %s7389_s18, %s25_s18  }
   0x2   : > { %p449_p1 = scmp.lt.s32.totalorder %s7305_s18, 3 }
   0x4   : > { %p450_p2 = pnand %p5340_p0, %p449_p1 }
   0x5   : > { %s5341_s20 = sshll.u32 (!%p450_p2), %s5336_s19, 5  ;;  %v6053_v0 = vld [vmem:[%s9695_s2 + $0x4] ss:$8 sps:$4 sm:$0xff] (!%p450_p2)   ;;  %v7307_v1 = vmov (!%p450_p2), 0   ;;  %v6055_v2 = vld [vmem:[%s9695_s2] ss:$8 sps:$4 sm:$0xff] (!%p450_p2)   ;;  %v553_v45 = vlaneseq (!%p450_p2) }
   0x6   : > { %453 = sbr.rel (%p450_p2) target bundleno = 1794 (0x702), region = 80  ;;  %6052 = vset.pattern.permute.xlu1 (!%p450_p2), %v7307_v1  ;;  %6051 = vset.pattern.permute.xlu0 (!%p450_p2), %v7307_v1  ;;  %p503_p3 = scmp.lt.s32.totalorder (!%p450_p2), %s5341_s20, 63  ;;  %v6056_v3 = vld [vmem:[%s9695_s2 + $0x14] ss:$8 sps:$4 sm:$0xff] (!%p450_p2)   ;;  %v6058_v4 = vld [vmem:[%s9695_s2 + $0x10] ss:$8 sps:$4 sm:$0xff] (!%p450_p2)  }
   0x7   : > { %828 = vmatprep.subr.bf16.mxu0 (!%p450_p2), %v6053_v0  ;;  %860 = vmatprep.mubr.bf16.mxu0 (!%p450_p2), %v7307_v1  ;;  %v6059_v5 = vld [vmem:[%s9695_s2 + $0x24] ss:$8 sps:$4 sm:$0xff] (!%p450_p2)   ;;  %v6061_v14 = vld [vmem:[%s9695_s2 + $0x20] ss:$8 sps:$4 sm:$0xff] (!%p450_p2)   ;;  %v6062_v15 = vld [vmem:[%s9695_s2 + $0x34] ss:$8 sps:$4 sm:$0xff] (!%p450_p2)  }
   0x8   : > { %829 = vmatpush1.bf16.msra.mxu0 (!%p450_p2), %v6055_v2  ;;  %5905 = vmatprep.subr.bf16.mxu1 (!%p450_p2), %v6053_v0  ;;  %v6064_v16 = vld [vmem:[%s9695_s2 + $0x30] ss:$8 sps:$4 sm:$0xff] (!%p450_p2)   ;;  %v1069_v17 = vld [vmem:[%s9696_s3] sm:$0xff] (!%p450_p2)  ;;  %vm1136_vm0 = vcmask (!%p450_p2), 1043456   ;;  %v7473_v46 = vand.u32 (!%p450_p2), 127, %v553_v45  ;;  %v7308_v51 = vmov (!%p450_p2), 0.0  }
   0x9   : > { %830 = vmatprep.subr.bf16.mxu0 (!%p450_p2), %v6056_v3  ;;  %5909 = vmatpush1.bf16.msra.mxu1 (!%p450_p2), %v6055_v2  ;;  %v5371_v20 = vcombine.low (!%p450_p2), %v1069_v17, %v1069_v17  ;;  %v5372_v21 = vcombine.high (!%p450_p2), %v1069_v17, %v1069_v17  ;;  %vm779_vm3 = vcmask (!%p450_p2), 523264  }
   0xa   : > { %5906 = vmatprep.subr.bf16.mxu1 (!%p450_p2), %v6056_v3  ;;  %940 = vmatprep.mubr.bf16.mxu1 (!%p450_p2), %v7307_v1 }
   0xb   : > { %v7447_v22 = vsel (!%p450_p2), %vm1136_vm0, %v5371_v20, 0 }
   0xc   : > { %831 = vmatpush1.bf16.msra.mxu0 (!%p450_p2), %v6058_v4 }
   0xd   : > { %s9710_s20 = smov (!%p503_p3, %s5341_s20), 63  ;;  %832 = vmatprep.subr.bf16.mxu0 %v6059_v5  ;;  %5910 = vmatpush1.bf16.msra.mxu1 %v6058_v4 }
   0xe   : > { %s7415_s16 = sshll.u32 %s9710_s20, 3  ;;  %5907 = vmatprep.subr.bf16.mxu1 %v6059_v5 }
   0xf   : > { %s7422_s21 = scalar_lea.vmem %s9693_s0, %s7415_s16  ;;  %s7579_s17 = scalar_lea.vmem %s9694_s1, %s7415_s16 }
  0x10   : > { %v523_v6 = vld [vmem:[%s7422_s21 + $0x10] sm:$0xff]  ;;  %v521_v7 = vld [vmem:[%s7422_s21] sm:$0xff]  ;;  %v524_v8 = vld [vmem:[%s7422_s21 + $0x18] sm:$0xff]  ;;  %833 = vmatpush1.bf16.msra.mxu0 %v6061_v14  ;;  %s9592_s26 = scalar_lea.vmem %s9708_s15, %s7415_s16 }
  0x11   : > { %562 = vperm.xlu1 %6052, %v523_v6   ;;  %556 = vperm.xlu0 %6051, %v521_v7   ;;  %v522_v9 = vld [vmem:[%s7422_s21 + $0x8] sm:$0xff]  ;;  %v525_v11 = vld [vmem:[%s7422_s21 + $0x20] sm:$0xff]  ;;  %v528_v12 = vld [vmem:[%s7422_s21 + $0x38] sm:$0xff] }
  0x12   : > { %v526_v10 = vld [vmem:[%s7422_s21 + $0x28] sm:$0xff]  ;;  %v527_v13 = vld [vmem:[%s7422_s21 + $0x30] sm:$0xff]  ;;  %v529_v19 = vld [vmem:[%s7422_s21 + $0x40] sm:$0xff]  ;;  %5911 = vmatpush1.bf16.msra.mxu1 %v6061_v14  ;;  %834 = vmatprep.subr.bf16.mxu0 %v6062_v15 }
  0x13   : > { %v530_v18 = vld [vmem:[%s7422_s21 + $0x48] sm:$0xff]  ;;  %5908 = vmatprep.subr.bf16.mxu1 %v6062_v15  ;;  %v532_v23 = vld [vmem:[%s7422_s21 + $0x58] sm:$0xff]  ;;  %v531_v24 = vld [vmem:[%s7422_s21 + $0x50] sm:$0xff] }
  0x14   : > { %835 = vmatpush1.bf16.msra.mxu0 %v6064_v16  ;;  %v534_v25 = vld [vmem:[%s7422_s21 + $0x68] sm:$0xff]  ;;  %v533_v26 = vld [vmem:[%s7422_s21 + $0x60] sm:$0xff]  ;;  %v536_v27 = vld [vmem:[%s7422_s21 + $0x78] sm:$0xff] }
  0x15   : > { %565 = vperm.xlu1 %6052, %v524_v8   ;;  %559 = vperm.xlu0 %6051, %v522_v9   ;;  %v535_v28 = vld [vmem:[%s7422_s21 + $0x70] sm:$0xff]  ;;  %v538_v29 = vld [vmem:[%s7422_s21 + $0x88] sm:$0xff]  ;;  %v537_v30 = vld [vmem:[%s7422_s21 + $0x80] sm:$0xff] }
  0x16   : > { %5912 = vmatpush1.bf16.msra.mxu1 %v6064_v16  ;;  %5373 = vmatprep.subr.msk.bf16.mxu0 %vm1136_vm0, %v5372_v21  ;;  %v540_v31 = vld [vmem:[%s7422_s21 + $0x98] sm:$0xff]  ;;  %v539_v32 = vld [vmem:[%s7422_s21 + $0x90] sm:$0xff]  ;;  %v542_v33 = vld [vmem:[%s7422_s21 + $0xa8] sm:$0xff] }
  0x17   : > { %v541_v34 = vld [vmem:[%s7422_s21 + $0xa0] sm:$0xff]  ;;  %v544_v35 = vld [vmem:[%s7422_s21 + $0xb8] sm:$0xff]  ;;  %v543_v36 = vld [vmem:[%s7422_s21 + $0xb0] sm:$0xff] }
  0x18   : > { %v546_v37 = vld [vmem:[%s7422_s21 + $0xc8] sm:$0xff]  ;;  %v545_v38 = vld [vmem:[%s7422_s21 + $0xc0] sm:$0xff]  ;;  %v548_v39 = vld [vmem:[%s7422_s21 + $0xd8] sm:$0xff] }
  0x19   : > { %571 = vperm.xlu1 %6052, %v526_v10   ;;  %568 = vperm.xlu0 %6051, %v525_v11   ;;  %v547_v40 = vld [vmem:[%s7422_s21 + $0xd0] sm:$0xff]  ;;  %v550_v41 = vld [vmem:[%s7422_s21 + $0xe8] sm:$0xff]  ;;  %v549_v42 = vld [vmem:[%s7422_s21 + $0xe0] sm:$0xff] }
  0x1a   : > { %v552_v43 = vld [vmem:[%s7422_s21 + $0xf8] sm:$0xff]  ;;  %v551_v44 = vld [vmem:[%s7422_s21 + $0xf0] sm:$0xff] }
  0x1d   : > { %577 = vperm.xlu1 %6052, %v528_v12   ;;  %574 = vperm.xlu0 %6051, %v527_v13  }
  0x21   : > { %583 = vperm.xlu1 %6052, %v530_v18   ;;  %580 = vperm.xlu0 %6051, %v529_v19  }
  0x25   : > { %589 = vperm.xlu1 %6052, %v532_v23   ;;  %586 = vperm.xlu0 %6051, %v531_v24  }
  0x29   : > { %595 = vperm.xlu1 %6052, %v534_v25   ;;  %592 = vperm.xlu0 %6051, %v533_v26  }
  0x2d   : > { %601 = vperm.xlu1 %6052, %v536_v27   ;;  %598 = vperm.xlu0 %6051, %v535_v28  }
  0x31   : > { %607 = vperm.xlu1 %6052, %v538_v29   ;;  %604 = vperm.xlu0 %6051, %v537_v30  }
  0x35   : > { %613 = vperm.xlu1 %6052, %v540_v31   ;;  %610 = vperm.xlu0 %6051, %v539_v32  }
  0x39   : > { %619 = vperm.xlu1 %6052, %v542_v33   ;;  %616 = vperm.xlu0 %6051, %v541_v34  }
  0x3d   : > { %625 = vperm.xlu1 %6052, %v544_v35   ;;  %622 = vperm.xlu0 %6051, %v543_v36  }
  0x41   : > { %631 = vperm.xlu1 %6052, %v546_v37   ;;  %628 = vperm.xlu0 %6051, %v545_v38  }
  0x45   : > { %637 = vperm.xlu1 %6052, %v548_v39   ;;  %634 = vperm.xlu0 %6051, %v547_v40  }
  0x49   : > { %643 = vperm.xlu1 %6052, %v550_v41   ;;  %640 = vperm.xlu0 %6051, %v549_v42  }
  0x4d   : > { %649 = vperm.xlu1 %6052, %v552_v43   ;;  %646 = vperm.xlu0 %6051, %v551_v44  }
  0x90   : > { %v563_v47 = vpop.permute.xlu1 %562  ;;  %v557_v48 = vpop.permute.xlu0 %556 }
  0x91   : > { %vm651_vm1 = vcmp.eq.s32.totalorder %v557_v48, %v7473_v46  ;;  %vm653_vm4 = vcmp.eq.s32.totalorder %v563_v47, %v7473_v46 }
  0x92   : > { %v683_v52 = vsel %vm651_vm1, 1.0, %v7308_v51  ;;  %v685_v57 = vsel %vm653_vm4, 1.0, %v7308_v51 }
  0x94   : > { %v566_v49 = vpop.permute.xlu1 %565  ;;  %v560_v50 = vpop.permute.xlu0 %559 }
  0x95   : > { %vm652_vm2 = vcmp.eq.s32.totalorder %v560_v50, %v7473_v46  ;;  %vm654_vm5 = vcmp.eq.s32.totalorder %v566_v49, %v7473_v46 }
  0x96   : > { %v684_v53 = vsel %vm652_vm2, 1.0, %v7308_v51  ;;  %v686_v58 = vsel %vm654_vm5, 1.0, %v7308_v51 }
  0x97   : > { %v715_v54 = vpack.c.bf16 %v684_v53, %v683_v52  ;;  %v716_v61 = vpack.c.bf16 %v686_v58, %v685_v57 }
  0x98   : > { %v572_v55 = vpop.permute.xlu1 %571  ;;  %v569_v56 = vpop.permute.xlu0 %568 }
  0x99   : > { %5355 = vmatmul.mubr.msk.bf16.vlgmr.msra.gmra.mrb[0].mxu0 %vm779_vm3, %v715_v54  ;;  %vm656_vm6 = vcmp.eq.s32.totalorder %v572_v55, %v7473_v46  ;;  %vm655_vm7 = vcmp.eq.s32.totalorder %v569_v56, %v7473_v46 }
  0x9a   : > { %1144 = vmatpush1.bf16.msra.mxu0 %v7447_v22  ;;  %870 = vmatprep.mubr.bf16.mxu0 %v7307_v1  ;;  %v688_v0 = vsel %vm656_vm6, 1.0, %v7308_v51  ;;  %v687_v2 = vsel %vm655_vm7, 1.0, %v7308_v51 }
  0x9b   : > { %v717_v5 = vpack.c.bf16 %v688_v0, %v687_v2 }
  0x9c   : > { %v578_v59 = vpop.permute.xlu1 %577  ;;  %v575_v60 = vpop.permute.xlu0 %574 }
  0x9d   : > { %vm658_vm8 = vcmp.eq.s32.totalorder %v578_v59, %v7473_v46  ;;  %vm657_vm9 = vcmp.eq.s32.totalorder %v575_v60, %v7473_v46 }
  0x9e   : > { %v690_v8 = vsel %vm658_vm8, 1.0, %v7308_v51  ;;  %v689_v9 = vsel %vm657_vm9, 1.0, %v7308_v51 }
  0x9f   : > { %v718_v12 = vpack.c.bf16 %v690_v8, %v689_v9 }
  0xa0   : > { %v584_v62 = vpop.permute.xlu1 %583  ;;  %v581_v63 = vpop.permute.xlu0 %580 }
  0xa1   : > { %5356 = vmatmul.mubr.msk.bf16.gmra.mrb[4].mxu0 %vm779_vm3, %v716_v61  ;;  %vm660_vm10 = vcmp.eq.s32.totalorder %v584_v62, %v7473_v46  ;;  %vm659_vm11 = vcmp.eq.s32.totalorder %v581_v63, %v7473_v46 }
  0xa2   : > { %880 = vmatprep.mubr.bf16.mxu0 %v7307_v1  ;;  %v692_v18 = vsel %vm660_vm10, 1.0, %v7308_v51  ;;  %v691_v19 = vsel %vm659_vm11, 1.0, %v7308_v51 }
  0xa3   : > { %v719_v22 = vpack.c.bf16 %v692_v18, %v691_v19  ;;  %v6079_v18 = vld [vmem:[%s9698_s5 + $0x40] ss:$8 sps:$4 sm:$0xff]  }
  0xa4   : > { %v590_v3 = vpop.permute.xlu1 %589  ;;  %v587_v4 = vpop.permute.xlu0 %586  ;;  %v1025_v19 = vld [vmem:[%s7579_s17 + $0x20] sm:$0xff] }
  0xa5   : > { %vm662_vm0 = vcmp.eq.s32.totalorder %v590_v3, %v7473_v46  ;;  %vm661_vm1 = vcmp.eq.s32.totalorder %v587_v4, %v7473_v46  ;;  %v6067_v3 = vld [vmem:[%s9698_s5] ss:$8 sps:$4 sm:$0xff]   ;;  %v6069_v4 = vld [vmem:[%s9698_s5 + $0x4] ss:$8 sps:$4 sm:$0xff]  }
  0xa6   : > { %v694_v28 = vsel %vm662_vm0, 1.0, %v7308_v51  ;;  %v693_v29 = vsel %vm661_vm1, 1.0, %v7308_v51  ;;  %1636 = vmatprep.subr.bf16.mxu1 %v6069_v4  ;;  %v1044_v4 = vld [vmem:[%s7579_s17 + $0xb8] sm:$0xff] }
  0xa7   : > { %v720_v32 = vpack.c.bf16 %v694_v28, %v693_v29  ;;  %v1031_v28 = vld [vmem:[%s7579_s17 + $0x50] sm:$0xff]  ;;  %v1032_v29 = vld [vmem:[%s7579_s17 + $0x58] sm:$0xff] }
  0xa8   : > { %v596_v6 = vpop.permute.xlu1 %595  ;;  %v593_v7 = vpop.permute.xlu0 %592 }
  0xa9   : > { %5357 = vmatmul.mubr.msk.bf16.gmra.mrb[8].mxu0 %vm779_vm3, %v717_v5  ;;  %vm664_vm5 = vcmp.eq.s32.totalorder %v596_v6, %v7473_v46  ;;  %vm663_vm6 = vcmp.eq.s32.totalorder %v593_v7, %v7473_v46  ;;  %v1021_v5 = vld [vmem:[%s7579_s17] sm:$0xff]  ;;  %v1022_v6 = vld [vmem:[%s7579_s17 + $0x8] sm:$0xff]  ;;  %v6072_v7 = vld [vmem:[%s9698_s5 + $0x14] ss:$8 sps:$4 sm:$0xff]  }
  0xaa   : > { %890 = vmatprep.mubr.bf16.mxu0 %v7307_v1  ;;  %v696_v38 = vsel %vm664_vm5, 1.0, %v7308_v51  ;;  %v695_v39 = vsel %vm663_vm6, 1.0, %v7308_v51  ;;  %v1053_v9 = vpack.c.bf16 %v1022_v6, %v1021_v5  ;;  %v6111_v5 = vld [vmem:[%s9698_s5 + $0xe4] ss:$8 sps:$4 sm:$0xff]   ;;  %v6109_v6 = vld [vmem:[%s9698_s5 + $0xe0] ss:$8 sps:$4 sm:$0xff]  }
  0xab   : > { %v721_v44 = vpack.c.bf16 %v696_v38, %v695_v39  ;;  %v6087_v38 = vld [vmem:[%s9698_s5 + $0x64] ss:$8 sps:$4 sm:$0xff]   ;;  %v6085_v39 = vld [vmem:[%s9698_s5 + $0x60] ss:$8 sps:$4 sm:$0xff]  }
  0xac   : > { %v7498_v10 = vpop.permute.xlu1 %601  ;;  %v7500_v11 = vpop.permute.xlu0 %598 }
  0xad   : > { %vm666_vm11 = vcmp.eq.s32.totalorder %v7498_v10, %v7473_v46  ;;  %v6075_v10 = vld [vmem:[%s9698_s5 + $0x24] ss:$8 sps:$4 sm:$0xff]  }
  0xae   : > { %v698_v57 = vsel %vm666_vm11, 1.0, %v7308_v51 }
  0xb0   : > { %v608_v13 = vpop.permute.xlu1 %607  ;;  %v605_v14 = vpop.permute.xlu0 %604 }
  0xb1   : > { %vm668_vm12 = vcmp.eq.s32.totalorder %v608_v13, %v7473_v46  ;;  %vm667_vm13 = vcmp.eq.s32.totalorder %v605_v14, %v7473_v46  ;;  %5358 = vmatmul.mubr.msk.bf16.gmra.mrb[12].mxu0 %vm779_vm3, %v718_v12  ;;  %v6078_v12 = vld [vmem:[%s9698_s5 + $0x34] ss:$8 sps:$4 sm:$0xff]  }
  0xb2   : > { %v700_v15 = vsel %vm668_vm12, 1.0, %v7308_v51  ;;  %v699_v16 = vsel %vm667_vm13, 1.0, %v7308_v51  ;;  %900 = vmatprep.mubr.bf16.mxu0 %v7307_v1  ;;  %vm665_vm12 = vcmp.eq.s32.totalorder %v7500_v11, %v7473_v46  ;;  %v6073_v11 = vld [vmem:[%s9698_s5 + $0x20] ss:$8 sps:$4 sm:$0xff]   ;;  %v1023_v13 = vld [vmem:[%s7579_s17 + $0x10] sm:$0xff]  ;;  %v1024_v14 = vld [vmem:[%s7579_s17 + $0x18] sm:$0xff] }
  0xb3   : > { %v723_v17 = vpack.c.bf16 %v700_v15, %v699_v16  ;;  %v697_v58 = vsel %vm665_vm12, 1.0, %v7308_v51  ;;  %v6076_v15 = vld [vmem:[%s9698_s5 + $0x30] ss:$8 sps:$4 sm:$0xff]   ;;  %v1054_v16 = vpack.c.bf16 %v1024_v14, %v1023_v13 }
  0xb4   : > { %v614_v20 = vpop.permute.xlu1 %613  ;;  %v611_v21 = vpop.permute.xlu0 %610  ;;  %v722_v63 = vpack.c.bf16 %v698_v57, %v697_v58  ;;  %v6102_v58 = vld [vmem:[%s9698_s5 + $0xb4] ss:$8 sps:$4 sm:$0xff]  }
  0xb5   : > { %vm670_vm14 = vcmp.eq.s32.totalorder %v614_v20, %v7473_v46  ;;  %vm669_vm15 = vcmp.eq.s32.totalorder %v611_v21, %v7473_v46  ;;  %5363 = vmatmul.mubr.msk.bf16.vlgmr.msra.gmra.mrb[0].mxu1 %vm779_vm3, %v723_v17  ;;  %v6081_v17 = vld [vmem:[%s9698_s5 + $0x44] ss:$8 sps:$4 sm:$0xff]   ;;  %v1048_v13 = vld [vmem:[%s7579_s17 + $0xd8] sm:$0xff] }
  0xb6   : > { %950 = vmatprep.mubr.bf16.mxu1 %v7307_v1  ;;  %v702_v23 = vsel %vm670_vm14, 1.0, %v7308_v51  ;;  %v701_v24 = vsel %vm669_vm15, 1.0, %v7308_v51  ;;  %1637 = vmatpush1.bf16.msra.mxu1 %v6067_v3  ;;  %v1026_v20 = vld [vmem:[%s7579_s17 + $0x28] sm:$0xff]  ;;  %v1043_v3 = vld [vmem:[%s7579_s17 + $0xb0] sm:$0xff] }
  0xb7   : > { %v724_v27 = vpack.c.bf16 %v702_v23, %v701_v24  ;;  %1638 = vmatprep.subr.bf16.mxu1 %v6072_v7  ;;  %v1055_v21 = vpack.c.bf16 %v1026_v20, %v1025_v19  ;;  %v1028_v23 = vld [vmem:[%s7579_s17 + $0x38] sm:$0xff]  ;;  %v1064_v7 = vpack.c.bf16 %v1044_v4, %v1043_v3 }
  0xb8   : > { %v620_v25 = vpop.permute.xlu1 %619  ;;  %v617_v26 = vpop.permute.xlu0 %616  ;;  %v1052_v19 = vld [vmem:[%s7579_s17 + $0xf8] sm:$0xff] }
  0xb9   : > { %5359 = vmatmul.mubr.msk.bf16.gmra.mrb[16].mxu0 %vm779_vm3, %v719_v22  ;;  %vm672_vm2 = vcmp.eq.s32.totalorder %v620_v25, %v7473_v46  ;;  %vm671_vm4 = vcmp.eq.s32.totalorder %v617_v26, %v7473_v46  ;;  %v1027_v22 = vld [vmem:[%s7579_s17 + $0x30] sm:$0xff]  ;;  %v1029_v25 = vld [vmem:[%s7579_s17 + $0x40] sm:$0xff]  ;;  %v1030_v26 = vld [vmem:[%s7579_s17 + $0x48] sm:$0xff] }
  0xba   : > { %910 = vmatprep.mubr.bf16.mxu0 %v7307_v1  ;;  %v704_v33 = vsel %vm672_vm2, 1.0, %v7308_v51  ;;  %v703_v34 = vsel %vm671_vm4, 1.0, %v7308_v51  ;;  %vm1087_vm4 = vcmask 64512   ;;  %v1056_v24 = vpack.c.bf16 %v1028_v23, %v1027_v22  ;;  %v6118_v4 = vld [vmem:[%s9700_s7 + $0x10] ss:$8 sps:$4 sm:$0xff]  }
  0xbb   : > { %v725_v37 = vpack.c.bf16 %v704_v33, %v703_v34  ;;  %v6084_v34 = vld [vmem:[%s9698_s5 + $0x54] ss:$8 sps:$4 sm:$0xff]  }
  0xbc   : > { %v626_v30 = vpop.permute.xlu1 %625  ;;  %v623_v31 = vpop.permute.xlu0 %622 }
  0xbd   : > { %5364 = vmatmul.mubr.msk.bf16.gmra.mrb[4].mxu1 %vm779_vm3, %v724_v27  ;;  %vm674_vm7 = vcmp.eq.s32.totalorder %v626_v30, %v7473_v46  ;;  %vm673_vm8 = vcmp.eq.s32.totalorder %v623_v31, %v7473_v46  ;;  %v1057_v27 = vpack.c.bf16 %v1030_v26, %v1029_v25  ;;  %v1058_v30 = vpack.c.bf16 %v1032_v29, %v1031_v28  ;;  %v1033_v31 = vld [vmem:[%s7579_s17 + $0x60] sm:$0xff] }
  0xbe   : > { %960 = vmatprep.mubr.bf16.mxu1 %v7307_v1  ;;  %v706_v48 = vsel %vm674_vm7, 1.0, %v7308_v51  ;;  %v705_v49 = vsel %vm673_vm8, 1.0, %v7308_v51 }
  0xbf   : > { %v726_v55 = vpack.c.bf16 %v706_v48, %v705_v49  ;;  %v6091_v48 = vld [vmem:[%s9698_s5 + $0x80] ss:$8 sps:$4 sm:$0xff]  }
  0xc0   : > { %v632_v35 = vpop.permute.xlu1 %631  ;;  %v629_v36 = vpop.permute.xlu0 %628 }
  0xc1   : > { %5360 = vmatmul.mubr.msk.bf16.gmra.mrb[20].mxu0 %vm779_vm3, %v720_v32  ;;  %vm676_vm15 = vcmp.eq.s32.totalorder %v632_v35, %v7473_v46  ;;  %vm675_vm0 = vcmp.eq.s32.totalorder %v629_v36, %v7473_v46  ;;  %v1034_v32 = vld [vmem:[%s7579_s17 + $0x68] sm:$0xff]  ;;  %v6082_v35 = vld [vmem:[%s9698_s5 + $0x50] ss:$8 sps:$4 sm:$0xff]  }
  0xc2   : > { %920 = vmatprep.mubr.bf16.mxu0 %v7307_v1  ;;  %v708_v2 = vsel %vm676_vm15, 1.0, %v7308_v51  ;;  %v1059_v33 = vpack.c.bf16 %v1034_v32, %v1033_v31  ;;  %v1035_v36 = vld [vmem:[%s7579_s17 + $0x70] sm:$0xff] }
  0xc4   : > { %v638_v40 = vpop.permute.xlu1 %637  ;;  %v635_v41 = vpop.permute.xlu0 %634 }
  0xc5   : > { %vm678_vm9 = vcmp.eq.s32.totalorder %v638_v40, %v7473_v46  ;;  %vm677_vm10 = vcmp.eq.s32.totalorder %v635_v41, %v7473_v46  ;;  %5365 = vmatmul.mubr.msk.bf16.gmra.mrb[8].mxu1 %vm779_vm3, %v725_v37  ;;  %v1036_v37 = vld [vmem:[%s7579_s17 + $0x78] sm:$0xff] }
  0xc6   : > { %v7542_v42 = vsel %vm678_vm9, 1.0, %v7308_v51  ;;  %v7545_v43 = vsel %vm677_vm10, 1.0, %v7308_v51  ;;  %970 = vmatprep.mubr.bf16.mxu1 %v7307_v1  ;;  %v1060_v40 = vpack.c.bf16 %v1036_v37, %v1035_v36  ;;  %v6090_v41 = vld [vmem:[%s9698_s5 + $0x74] ss:$8 sps:$4 sm:$0xff]   ;;  %v1073_v36 = vshrl.u32 %v553_v45, 7 }
  0xc7   : > { %v728_v47 = vpack.c.bf16 %v7542_v42, %v7545_v43  ;;  %v6088_v42 = vld [vmem:[%s9698_s5 + $0x70] ss:$8 sps:$4 sm:$0xff]   ;;  %v1037_v43 = vld [vmem:[%s7579_s17 + $0x80] sm:$0xff] }
  0xc8   : > { %v644_v50 = vpop.permute.xlu1 %643  ;;  %v641_v52 = vpop.permute.xlu0 %640  ;;  %v6117_v45 = vld [vmem:[%s9700_s7 + $0x4] ss:$8 sps:$4 sm:$0xff]  }
  0xc9   : > { %vm680_vm13 = vcmp.eq.s32.totalorder %v644_v50, %v7473_v46  ;;  %vm679_vm14 = vcmp.eq.s32.totalorder %v641_v52, %v7473_v46  ;;  %5361 = vmatmul.mubr.msk.bf16.gmra.mrb[24].mxu0 %vm779_vm3, %v721_v44  ;;  %v1038_v44 = vld [vmem:[%s7579_s17 + $0x88] sm:$0xff]  ;;  %v6096_v50 = vld [vmem:[%s9698_s5 + $0x94] ss:$8 sps:$4 sm:$0xff]   ;;  %v6094_v52 = vld [vmem:[%s9698_s5 + $0x90] ss:$8 sps:$4 sm:$0xff]  }
  0xca   : > { %v7560_v53 = vsel %vm680_vm13, 1.0, %v7308_v51  ;;  %v711_v54 = vsel %vm679_vm14, 1.0, %v7308_v51  ;;  %930 = vmatprep.mubr.bf16.mxu0 %v7307_v1  ;;  %v1061_v49 = vpack.c.bf16 %v1038_v44, %v1037_v43 }
  0xcb   : > { %v729_v56 = vpack.c.bf16 %v7560_v53, %v711_v54  ;;  %v1039_v53 = vld [vmem:[%s7579_s17 + $0x90] sm:$0xff]  ;;  %v1040_v54 = vld [vmem:[%s7579_s17 + $0x98] sm:$0xff] }
  0xcc   : > { %v650_v59 = vpop.permute.xlu1 %649  ;;  %v647_v60 = vpop.permute.xlu0 %646  ;;  %v1062_v57 = vpack.c.bf16 %v1040_v54, %v1039_v53 }
  0xcd   : > { %vm682_vm1 = vcmp.eq.s32.totalorder %v650_v59, %v7473_v46  ;;  %vm681_vm2 = vcmp.eq.s32.totalorder %v647_v60, %v7473_v46  ;;  %5366 = vmatmul.mubr.msk.bf16.gmra.mrb[12].mxu1 %vm779_vm3, %v726_v55  ;;  %v707_v46 = vsel %vm675_vm0, 1.0, %v7308_v51  ;;  %v6099_v55 = vld [vmem:[%s9698_s5 + $0xa4] ss:$8 sps:$4 sm:$0xff]   ;;  %v6100_v59 = vld [vmem:[%s9698_s5 + $0xb0] ss:$8 sps:$4 sm:$0xff]  }
  0xce   : > { %v714_v61 = vsel %vm682_vm1, 1.0, %v7308_v51  ;;  %v713_v62 = vsel %vm681_vm2, 1.0, %v7308_v51  ;;  %980 = vmatprep.mubr.bf16.mxu1 %v7307_v1  ;;  %v727_v8 = vpack.c.bf16 %v708_v2, %v707_v46  ;;  %v6070_v51 = vld [vmem:[%s9698_s5 + $0x10] ss:$8 sps:$4 sm:$0xff]   ;;  %v1041_v60 = vld [vmem:[%s7579_s17 + $0xa0] sm:$0xff] }
  0xcf   : > { %v730_v0 = vpack.c.bf16 %v714_v61, %v713_v62  ;;  %1639 = vmatpush1.bf16.msra.mxu1 %v6070_v51  ;;  %v1042_v61 = vld [vmem:[%s7579_s17 + $0xa8] sm:$0xff]  ;;  %v6108_v2 = vld [vmem:[%s9698_s5 + $0xd4] ss:$8 sps:$4 sm:$0xff]   ;;  %v6106_v46 = vld [vmem:[%s9698_s5 + $0xd0] ss:$8 sps:$4 sm:$0xff]  }
  0xd0   : > { %1640 = vmatprep.subr.bf16.mxu1 %v6075_v10  ;;  %v6105_v62 = vld [vmem:[%s9698_s5 + $0xc4] ss:$8 sps:$4 sm:$0xff]   ;;  %v6112_v51 = vld [vmem:[%s9698_s5 + $0xf0] ss:$8 sps:$4 sm:$0xff]  }
  0xd1   : > { %5362 = vmatmul.mubr.msk.bf16.gmra.mrb[28].mxu0 %vm779_vm3, %v722_v63  ;;  %v6103_v63 = vld [vmem:[%s9698_s5 + $0xc0] ss:$8 sps:$4 sm:$0xff]  }
  0xd2   : > { %1175 = vmatprep.mubr.bf16.mxu0 %v7307_v1  ;;  %v1046_v10 = vld [vmem:[%s7579_s17 + $0xc8] sm:$0xff] }
  0xd3   : > { %1641 = vmatpush1.bf16.msra.mxu1 %v6073_v11 }
  0xd4   : > { %1642 = vmatprep.subr.bf16.mxu1 %v6078_v12  ;;  %v1047_v12 = vld [vmem:[%s7579_s17 + $0xd0] sm:$0xff] }
  0xd5   : > { %5367 = vmatmul.mubr.msk.bf16.gmra.mrb[16].mxu1 %vm779_vm3, %v727_v8  ;;  %v6114_v8 = vld [vmem:[%s9698_s5 + $0xf4] ss:$8 sps:$4 sm:$0xff]   ;;  %v1066_v14 = vpack.c.bf16 %v1048_v13, %v1047_v12 }
  0xd6   : > { %990 = vmatprep.mubr.bf16.mxu1 %v7307_v1 }
  0xd7   : > { %1643 = vmatpush1.bf16.msra.mxu1 %v6076_v15  ;;  %v1049_v15 = vld [vmem:[%s7579_s17 + $0xe0] sm:$0xff] }
  0xd8   : > { %1644 = vmatprep.subr.bf16.mxu1 %v6081_v17 }
  0xd9   : > { %5374 = vmatmul.mubr.msk.bf16.vlgmr.msra.gmra.mrb[0].mxu0 %vm1087_vm4, %v1053_v9  ;;  %v1045_v9 = vld [vmem:[%s7579_s17 + $0xc0] sm:$0xff] }
  0xda   : > { %1185 = vmatprep.mubr.bf16.mxu0 %v7307_v1  ;;  %v1065_v11 = vpack.c.bf16 %v1046_v10, %v1045_v9 }
  0xdb   : > { %1645 = vmatpush1.bf16.msra.mxu1 %v6079_v18  ;;  %v1051_v18 = vld [vmem:[%s7579_s17 + $0xf0] sm:$0xff] }
  0xdc   : > { %1646 = vmatprep.subr.bf16.mxu1 %v6084_v34  ;;  %v1068_v20 = vpack.c.bf16 %v1052_v19, %v1051_v18 }
  0xdd   : > { %5368 = vmatmul.mubr.msk.bf16.gmra.mrb[20].mxu1 %vm779_vm3, %v728_v47  ;;  %v6093_v47 = vld [vmem:[%s9698_s5 + $0x84] ss:$8 sps:$4 sm:$0xff]  }
  0xde   : > { %1000 = vmatprep.mubr.bf16.mxu1 %v7307_v1 }
  0xdf   : > { %1647 = vmatpush1.bf16.msra.mxu1 %v6082_v35 }
  0xe0   : > { %1648 = vmatprep.subr.bf16.mxu1 %v6087_v38  ;;  %v7786_v38 = vsub.s32 0, %v1073_v36 }
  0xe1   : > { %5375 = vmatmul.mubr.msk.bf16.gmra.mrb[4].mxu0 %vm1087_vm4, %v1054_v16  ;;  %v1050_v16 = vld [vmem:[%s7579_s17 + $0xe8] sm:$0xff] }
  0xe2   : > { %1195 = vmatprep.mubr.bf16.mxu0 %v7307_v1  ;;  %v1067_v17 = vpack.c.bf16 %v1050_v16, %v1049_v15  ;;  %v6121_v15 = vld [vmem:[%s9700_s7 + $0x20] ss:$8 sps:$4 sm:$0xff]  }
  0xe3   : > { %1649 = vmatpush1.bf16.msra.mxu1 %v6085_v39 }
  0xe4   : > { %1650 = vmatprep.subr.bf16.mxu1 %v6090_v41  ;;  %v1070_v41 = vld [vmem:[%s9697_s4] sm:$0x3] }
  0xe5   : > { %5369 = vmatmul.mubr.msk.bf16.gmra.mrb[24].mxu1 %vm779_vm3, %v729_v56  ;;  %v6097_v56 = vld [vmem:[%s9698_s5 + $0xa0] ss:$8 sps:$4 sm:$0xff]  }
  0xe6   : > { %1010 = vmatprep.mubr.bf16.mxu1 %v7307_v1 }
  0xe7   : > { %1651 = vmatpush1.bf16.msra.mxu1 %v6088_v42 }
  0xe8   : > { %1652 = vmatprep.subr.bf16.mxu1 %v6093_v47  ;;  %v7803_v47 = vrot.slane %v1070_v41, %v7786_v38 }
  0xe9   : > { %5376 = vmatmul.mubr.msk.bf16.gmra.mrb[8].mxu0 %vm1087_vm4, %v1055_v21 }
  0xea   : > { %1205 = vmatprep.mubr.bf16.mxu0 %v7307_v1 }
  0xeb   : > { %1653 = vmatpush1.bf16.msra.mxu1 %v6091_v48 }
  0xec   : > { %1654 = vmatprep.subr.bf16.mxu1 %v6096_v50 }
  0xed   : > { %5370 = vmatmul.mubr.msk.bf16.gmra.mrb[28].mxu1 %vm779_vm3, %v730_v0  ;;  %v1063_v0 = vpack.c.bf16 %v1042_v61, %v1041_v60 }
  0xef   : > { %1655 = vmatpush1.bf16.msra.mxu1 %v6094_v52 }
  0xf0   : > { %1656 = vmatprep.subr.bf16.mxu1 %v6099_v55 }
  0xf1   : > { %5377 = vmatmul.mubr.msk.bf16.gmra.mrb[12].mxu0 %vm1087_vm4, %v1056_v24 }
  0xf2   : > { %1215 = vmatprep.mubr.bf16.mxu0 %v7307_v1 }
  0xf3   : > { %1657 = vmatpush1.bf16.msra.mxu1 %v6097_v56 }
  0xf4   : > { %1658 = vmatprep.subr.bf16.mxu1 %v6102_v58 }
  0xf7   : > { %1659 = vmatpush1.bf16.msra.mxu1 %v6100_v59 }
  0xf8   : > { %1660 = vmatprep.subr.bf16.mxu1 %v6105_v62  ;;  %v6115_v62 = vld [vmem:[%s9700_s7] ss:$8 sps:$4 sm:$0xff]  }
  0xf9   : > { %5378 = vmatmul.mubr.msk.bf16.gmra.mrb[16].mxu0 %vm1087_vm4, %v1057_v27 }
  0xfa   : > { %1225 = vmatprep.mubr.bf16.mxu0 %v7307_v1 }
  0xfb   : > { %1661 = vmatpush1.bf16.msra.mxu1 %v6103_v63 }
  0xfc   : > { %1662 = vmatprep.subr.bf16.mxu1 %v6108_v2 }
  0xff   : > { %1663 = vmatpush1.bf16.msra.mxu1 %v6106_v46 }
 0x100   : > { %1664 = vmatprep.subr.bf16.mxu1 %v6111_v5 }
 0x101   : > { %5379 = vmatmul.mubr.msk.bf16.gmra.mrb[20].mxu0 %vm1087_vm4, %v1058_v30 }
 0x102   : > { %1235 = vmatprep.mubr.bf16.mxu0 %v7307_v1 }
 0x103   : > { %1665 = vmatpush1.bf16.msra.mxu1 %v6109_v6 }
 0x104   : > { %1666 = vmatprep.subr.bf16.mxu1 %v6114_v8  ;;  %v6123_v8 = vld [vmem:[%s9700_s7 + $0x24] ss:$8 sps:$4 sm:$0xff]  }
 0x107   : > { %1667 = vmatpush1.bf16.msra.mxu1 %v6112_v51 }
 0x108   : > { %2513 = vmatprep.subr.bf16.mxu1 %v6117_v45 }
 0x109   : > { %5380 = vmatmul.mubr.msk.bf16.gmra.mrb[24].mxu0 %vm1087_vm4, %v1059_v33 }
 0x10a   : > { %1245 = vmatprep.mubr.bf16.mxu0 %v7307_v1 }
 0x111   : > { %5381 = vmatmul.mubr.msk.bf16.gmra.mrb[28].mxu0 %vm1087_vm4, %v1060_v40  ;;  %v7790_v40 = vsub.s32 1, %v1073_v36  ;;  %v6124_v36 = vld [vmem:[%s9700_s7 + $0x30] ss:$8 sps:$4 sm:$0xff]  }
 0x112   : > { %1255 = vmatprep.mubr.bf16.mxu0 %v7307_v1 }
 0x119   : > { %5382 = vmatmul.mubr.msk.bf16.gmra.mrb[32].mxu0 %vm1087_vm4, %v1061_v49  ;;  %v7806_v49 = vrot.slane %v1070_v41, %v7790_v40 }
 0x11a   : > { %1265 = vmatprep.mubr.bf16.mxu0 %v7307_v1 }
 0x121   : > { %5383 = vmatmul.mubr.msk.bf16.gmra.mrb[36].mxu0 %vm1087_vm4, %v1062_v57 }
 0x122   : > { %1275 = vmatprep.mubr.bf16.mxu0 %v7307_v1 }
 0x129   : > { %5384 = vmatmul.mubr.msk.bf16.gmra.mrb[40].mxu0 %vm1087_vm4, %v1063_v0  ;;  %v6120_v0 = vld [vmem:[%s9700_s7 + $0x14] ss:$8 sps:$4 sm:$0xff]  }
 0x12a   : > { %1285 = vmatprep.mubr.bf16.mxu0 %v7307_v1 }
 0x131   : > { %5385 = vmatmul.mubr.msk.bf16.gmra.mrb[44].mxu0 %vm1087_vm4, %v1064_v7 }
 0x132   : > { %1295 = vmatprep.mubr.bf16.mxu0 %v7307_v1 }
 0x139   : > { %5386 = vmatmul.mubr.msk.bf16.gmra.mrb[48].mxu0 %vm1087_vm4, %v1065_v11 }
 0x13a   : > { %1305 = vmatprep.mubr.bf16.mxu0 %v7307_v1 }
 0x141   : > { %5387 = vmatmul.mubr.msk.bf16.gmra.mrb[52].mxu0 %vm1087_vm4, %v1066_v14 }
 0x142   : > { %1315 = vmatprep.mubr.bf16.mxu0 %v7307_v1 }
 0x149   : > { %5388 = vmatmul.mubr.msk.bf16.gmra.mrb[56].mxu0 %vm1087_vm4, %v1067_v17  ;;  %v6126_v17 = vld [vmem:[%s9700_s7 + $0x34] ss:$8 sps:$4 sm:$0xff]  }
 0x14a   : > { %1325 = vmatprep.mubr.bf16.mxu0 %v7307_v1 }
 0x151   : > { %5389 = vmatmul.mubr.msk.bf16.gmra.mrb[60].mxu0 %vm1087_vm4, %v1068_v20 }
 0x188   : > { %v7751_v21 = vpop.f32.mrb[0].mxu1 }
 0x189   : > { %v7753_v22 = vpop.f32.mrb[1].mxu1 }
 0x18a   : > { %v7755_v23 = vpop.f32.mrb[2].mxu1 }
 0x18b   : > { %v7757_v24 = vpop.f32.mrb[3].mxu1 }
 0x190   : > { %v7759_v25 = vpop.f32.mrb[4].mxu1 }
 0x191   : > { %v7761_v26 = vpop.f32.mrb[5].mxu1 }
 0x192   : > { %v7763_v27 = vpop.f32.mrb[6].mxu1 }
 0x193   : > { %v7765_v1 = vpop.f32.mrb[7].mxu1 }
 0x198   : > { %v7767_v28 = vpop.f32.mrb[8].mxu1 }
 0x199   : > { %v7769_v29 = vpop.f32.mrb[9].mxu1 }
 0x19a   : > { %v7771_v30 = vpop.f32.mrb[10].mxu1 }
 0x19b   : > { %v7773_v31 = vpop.f32.mrb[11].mxu1 }
 0x1a0   : > { %v7775_v32 = vpop.f32.mrb[12].mxu1 }
 0x1a1   : > { %v7777_v33 = vpop.f32.mrb[13].mxu1 }
 0x1a2   : > { %v7779_v34 = vpop.f32.mrb[14].mxu1 }
 0x1a3   : > { %v7781_v35 = vpop.f32.mrb[15].mxu1 }
 0x1a8   : > { %v7784_v37 = vpop.f32.mrb[16].mxu1 }
 0x1a9   : > { %v7788_v39 = vpop.f32.mrb[17].mxu1 }
 0x1aa   : > { %v7795_v42 = vpop.f32.mrb[18].mxu1 }
 0x1ab   : > { %v7797_v43 = vpop.f32.mrb[19].mxu1 }
 0x1ac   : > { %v1177_v44 = vpop.f32.mrb[0].mxu0 }
 0x1ad   : > { %v1179_v48 = vpop.f32.mrb[1].mxu0  ;;  %v1178_v52 = vadd.f32 %v1177_v44, %v7803_v47 }
 0x1ae   : > { %v1181_v50 = vpop.f32.mrb[2].mxu0  ;;  %v1180_v55 = vadd.f32 %v1179_v48, %v7806_v49  ;;  %v6129_v48 = vld [vmem:[%s9700_s7 + $0x44] ss:$8 sps:$4 sm:$0xff]  }
 0x1af   : > { %v1182_v53 = vadd.f32 %v1181_v50, %v7803_v47  ;;  %v1183_v54 = vpop.f32.mrb[3].mxu0 }
 0x1b0   : > { %v1184_v56 = vadd.f32 %v1183_v54, %v7806_v49  ;;  %v7812_v57 = vpop.f32.mrb[20].mxu1 }
 0x1b1   : > { %v1400_v58 = vpack.c.bf16 %v1182_v53, %v1178_v52  ;;  %v7814_v59 = vpop.f32.mrb[21].mxu1 }
 0x1b2   : > { %v1401_v60 = vpack.c.bf16 %v1184_v56, %v1180_v55  ;;  %v7816_v61 = vpop.f32.mrb[22].mxu1 }
 0x1b3   : > { %v7821_v63 = vpop.f32.mrb[23].mxu1 }
 0x1b4   : > { %v1187_v2 = vpop.f32.mrb[4].mxu0  ;;  %1668 = vmatprep.mubr.bf16.mxu1 %v1401_v60  ;;  %v6127_v60 = vld [vmem:[%s9700_s7 + $0x40] ss:$8 sps:$4 sm:$0xff]  }
 0x1b5   : > { %v1189_v46 = vpop.f32.mrb[5].mxu0  ;;  %1669 = vmatmul.mubr.bf16.vlgmr.msra.gmra.mrb[32].mxu1 %v1400_v58  ;;  %v1188_v5 = vadd.f32 %v1187_v2, %v7803_v47 }
 0x1b6   : > { %v1191_v3 = vpop.f32.mrb[6].mxu0  ;;  %2514 = vmatpush1.bf16.msra.mxu1 %v6115_v62  ;;  %v1190_v51 = vadd.f32 %v1189_v46, %v7806_v49 }
 0x1b7   : > { %v1192_v6 = vadd.f32 %v1191_v3, %v7803_v47  ;;  %v1193_v7 = vpop.f32.mrb[7].mxu0  ;;  %2515 = vmatprep.subr.bf16.mxu1 %v6120_v0  ;;  %v6132_v0 = vld [vmem:[%s9700_s7 + $0x54] ss:$8 sps:$4 sm:$0xff]  }
 0x1b8   : > { %v1194_v9 = vadd.f32 %v1193_v7, %v7806_v49  ;;  %v7836_v10 = vpop.f32.mrb[24].mxu1 }
 0x1b9   : > { %v1402_v11 = vpack.c.bf16 %v1192_v6, %v1188_v5  ;;  %v7838_v12 = vpop.f32.mrb[25].mxu1 }
 0x1ba   : > { %v1403_v13 = vpack.c.bf16 %v1194_v9, %v1190_v51  ;;  %v7840_v14 = vpop.f32.mrb[26].mxu1  ;;  %2516 = vmatpush1.bf16.msra.mxu1 %v6118_v4  ;;  %v6130_v4 = vld [vmem:[%s9700_s7 + $0x50] ss:$8 sps:$4 sm:$0xff]  }
 0x1bb   : > { %v7845_v16 = vpop.f32.mrb[27].mxu1  ;;  %2517 = vmatprep.subr.bf16.mxu1 %v6123_v8  ;;  %v6135_v8 = vld [vmem:[%s9700_s7 + $0x64] ss:$8 sps:$4 sm:$0xff]  }
 0x1bc   : > { %v1197_v18 = vpop.f32.mrb[8].mxu0  ;;  %1678 = vmatprep.mubr.bf16.mxu1 %v1403_v13 }
 0x1bd   : > { %v1199_v19 = vpop.f32.mrb[9].mxu0  ;;  %1679 = vmatmul.mubr.bf16.gmra.mrb[36].mxu1 %v1402_v11  ;;  %v1198_v41 = vadd.f32 %v1197_v18, %v7803_v47 }
 0x1be   : > { %v1201_v20 = vpop.f32.mrb[10].mxu0  ;;  %2518 = vmatpush1.bf16.msra.mxu1 %v6121_v15  ;;  %v1200_v50 = vadd.f32 %v1199_v19, %v7806_v49  ;;  %v6133_v15 = vld [vmem:[%s9700_s7 + $0x60] ss:$8 sps:$4 sm:$0xff]  }
 0x1bf   : > { %v1202_v44 = vadd.f32 %v1201_v20, %v7803_v47  ;;  %v1203_v45 = vpop.f32.mrb[11].mxu0  ;;  %2519 = vmatprep.subr.bf16.mxu1 %v6126_v17  ;;  %v6138_v17 = vld [vmem:[%s9700_s7 + $0x74] ss:$8 sps:$4 sm:$0xff]  }
 0x1c0   : > { %v1204_v52 = vadd.f32 %v1203_v45, %v7806_v49  ;;  %v7860_v53 = vpop.f32.mrb[28].mxu1 }
 0x1c1   : > { %v1404_v54 = vpack.c.bf16 %v1202_v44, %v1198_v41  ;;  %v7862_v55 = vpop.f32.mrb[29].mxu1 }
 0x1c2   : > { %v1405_v56 = vpack.c.bf16 %v1204_v52, %v1200_v50  ;;  %v7864_v58 = vpop.f32.mrb[30].mxu1  ;;  %2520 = vmatpush1.bf16.msra.mxu1 %v6124_v36  ;;  %v6136_v36 = vld [vmem:[%s9700_s7 + $0x70] ss:$8 sps:$4 sm:$0xff]  }
 0x1c3   : > { %v7869_v62 = vpop.f32.mrb[31].mxu1  ;;  %2521 = vmatprep.subr.bf16.mxu1 %v6129_v48  ;;  %v6141_v48 = vld [vmem:[%s9700_s7 + $0x84] ss:$8 sps:$4 sm:$0xff]  }
 0x1c4   : > { %v1207_v2 = vpop.f32.mrb[12].mxu0  ;;  %1688 = vmatprep.mubr.bf16.mxu1 %v1405_v56 }
 0x1c5   : > { %v1209_v46 = vpop.f32.mrb[13].mxu0  ;;  %1689 = vmatmul.mubr.bf16.gmra.mrb[40].mxu1 %v1404_v54  ;;  %v1208_v5 = vadd.f32 %v1207_v2, %v7803_v47 }
 0x1c6   : > { %v1211_v3 = vpop.f32.mrb[14].mxu0  ;;  %2522 = vmatpush1.bf16.msra.mxu1 %v6127_v60  ;;  %v1210_v51 = vadd.f32 %v1209_v46, %v7806_v49  ;;  %v6139_v60 = vld [vmem:[%s9700_s7 + $0x80] ss:$8 sps:$4 sm:$0xff]  }
 0x1c7   : > { %v1212_v6 = vadd.f32 %v1211_v3, %v7803_v47  ;;  %v1213_v7 = vpop.f32.mrb[15].mxu0  ;;  %2523 = vmatprep.subr.bf16.mxu1 %v6132_v0  ;;  %v6144_v0 = vld [vmem:[%s9700_s7 + $0x94] ss:$8 sps:$4 sm:$0xff]  }
 0x1c8   : > { %v1214_v9 = vadd.f32 %v1213_v7, %v7806_v49 }
 0x1c9   : > { %v1406_v11 = vpack.c.bf16 %v1212_v6, %v1208_v5 }
 0x1ca   : > { %v1407_v13 = vpack.c.bf16 %v1214_v9, %v1210_v51  ;;  %2524 = vmatpush1.bf16.msra.mxu1 %v6130_v4  ;;  %v6142_v4 = vld [vmem:[%s9700_s7 + $0x90] ss:$8 sps:$4 sm:$0xff]  }
 0x1cb   : > { %2525 = vmatprep.subr.bf16.mxu1 %v6135_v8  ;;  %v6147_v8 = vld [vmem:[%s9700_s7 + $0xa4] ss:$8 sps:$4 sm:$0xff]  }
 0x1cc   : > { %v1217_v18 = vpop.f32.mrb[16].mxu0  ;;  %1698 = vmatprep.mubr.bf16.mxu1 %v1407_v13 }
 0x1cd   : > { %v1219_v19 = vpop.f32.mrb[17].mxu0  ;;  %1699 = vmatmul.mubr.bf16.gmra.mrb[44].mxu1 %v1406_v11  ;;  %v1218_v41 = vadd.f32 %v1217_v18, %v7803_v47 }
 0x1ce   : > { %v1221_v20 = vpop.f32.mrb[18].mxu0  ;;  %2526 = vmatpush1.bf16.msra.mxu1 %v6133_v15  ;;  %v1220_v50 = vadd.f32 %v1219_v19, %v7806_v49  ;;  %v6145_v15 = vld [vmem:[%s9700_s7 + $0xa0] ss:$8 sps:$4 sm:$0xff]  }
 0x1cf   : > { %v1222_v44 = vadd.f32 %v1221_v20, %v7803_v47  ;;  %v1223_v45 = vpop.f32.mrb[19].mxu0  ;;  %2527 = vmatprep.subr.bf16.mxu1 %v6138_v17  ;;  %v6150_v17 = vld [vmem:[%s9700_s7 + $0xb4] ss:$8 sps:$4 sm:$0xff]  }
 0x1d0   : > { %v1224_v52 = vadd.f32 %v1223_v45, %v7806_v49 }
 0x1d1   : > { %v1408_v54 = vpack.c.bf16 %v1222_v44, %v1218_v41 }
 0x1d2   : > { %v1409_v56 = vpack.c.bf16 %v1224_v52, %v1220_v50  ;;  %2528 = vmatpush1.bf16.msra.mxu1 %v6136_v36  ;;  %v6148_v36 = vld [vmem:[%s9700_s7 + $0xb0] ss:$8 sps:$4 sm:$0xff]  }
 0x1d3   : > { %2529 = vmatprep.subr.bf16.mxu1 %v6141_v48 }
 0x1d4   : > { %v1227_v2 = vpop.f32.mrb[20].mxu0  ;;  %1708 = vmatprep.mubr.bf16.mxu1 %v1409_v56 }
 0x1d5   : > { %v1229_v46 = vpop.f32.mrb[21].mxu0  ;;  %1709 = vmatmul.mubr.bf16.gmra.mrb[48].mxu1 %v1408_v54  ;;  %v1228_v5 = vadd.f32 %v1227_v2, %v7803_v47 }
 0x1d6   : > { %v1231_v3 = vpop.f32.mrb[22].mxu0  ;;  %2530 = vmatpush1.bf16.msra.mxu1 %v6139_v60  ;;  %v1230_v51 = vadd.f32 %v1229_v46, %v7806_v49 }
 0x1d7   : > { %v1232_v6 = vadd.f32 %v1231_v3, %v7803_v47  ;;  %v1233_v7 = vpop.f32.mrb[23].mxu0  ;;  %2531 = vmatprep.subr.bf16.mxu1 %v6144_v0 }
 0x1d8   : > { %v1234_v9 = vadd.f32 %v1233_v7, %v7806_v49 }
 0x1d9   : > { %v1410_v11 = vpack.c.bf16 %v1232_v6, %v1228_v5 }
 0x1da   : > { %v1411_v13 = vpack.c.bf16 %v1234_v9, %v1230_v51  ;;  %2532 = vmatpush1.bf16.msra.mxu1 %v6142_v4  ;;  %v5947_v51 = vadd.f32 %v7806_v49, %v7753_v22  ;;  %v5953_v22 = vadd.f32 %v7803_v47, %v7759_v25 }
 0x1db   : > { %2533 = vmatprep.subr.bf16.mxu1 %v6147_v8  ;;  %v5945_v8 = vadd.f32 %v7803_v47, %v7751_v21 }
 0x1dc   : > { %v1237_v18 = vpop.f32.mrb[24].mxu0  ;;  %1718 = vmatprep.mubr.bf16.mxu1 %v1411_v13 }
 0x1dd   : > { %v1239_v19 = vpop.f32.mrb[25].mxu0  ;;  %1719 = vmatmul.mubr.bf16.gmra.mrb[52].mxu1 %v1410_v11  ;;  %v1238_v41 = vadd.f32 %v1237_v18, %v7803_v47  ;;  %v5949_v11 = vadd.f32 %v7803_v47, %v7755_v23 }
 0x1de   : > { %v1241_v20 = vpop.f32.mrb[26].mxu0  ;;  %2534 = vmatpush1.bf16.msra.mxu1 %v6145_v15  ;;  %v1240_v48 = vadd.f32 %v1239_v19, %v7806_v49 }
 0x1df   : > { %v1242_v44 = vadd.f32 %v1241_v20, %v7803_v47  ;;  %v1243_v45 = vpop.f32.mrb[27].mxu0  ;;  %2535 = vmatprep.subr.bf16.mxu1 %v6150_v17  ;;  %v5951_v17 = vadd.f32 %v7806_v49, %v7757_v24 }
 0x1e0   : > { %v1244_v50 = vadd.f32 %v1243_v45, %v7806_v49  ;;  %v5955_v45 = vadd.f32 %v7806_v49, %v7761_v26  ;;  %v5961_v26 = vadd.f32 %v7803_v47, %v7767_v28 }
 0x1e1   : > { %v1412_v52 = vpack.c.bf16 %v1242_v44, %v1238_v41 }
 0x1e2   : > { %v1413_v54 = vpack.c.bf16 %v1244_v50, %v1240_v48  ;;  %2536 = vmatpush1.bf16.msra.mxu1 %v6148_v36  ;;  %v5957_v48 = vadd.f32 %v7803_v47, %v7763_v27 }
 0x1e4   : > { %v1247_v56 = vpop.f32.mrb[28].mxu0  ;;  %1728 = vmatprep.mubr.bf16.mxu1 %v1413_v54 }
 0x1e5   : > { %v1249_v60 = vpop.f32.mrb[29].mxu0  ;;  %1729 = vmatmul.mubr.bf16.gmra.mrb[56].mxu1 %v1412_v52  ;;  %v1248_v2 = vadd.f32 %v1247_v56, %v7803_v47  ;;  %v5959_v52 = vadd.f32 %v7806_v49, %v7765_v1 }
 0x1e6   : > { %v1251_v0 = vpop.f32.mrb[30].mxu0  ;;  %v1250_v4 = vadd.f32 %v1249_v60, %v7806_v49 }
 0x1e7   : > { %v1252_v46 = vadd.f32 %v1251_v0, %v7803_v47  ;;  %v1253_v3 = vpop.f32.mrb[31].mxu0 }
 0x1e8   : > { %v1254_v5 = vadd.f32 %v1253_v3, %v7806_v49  ;;  %v5963_v3 = vadd.f32 %v7806_v49, %v7769_v29  ;;  %v5969_v29 = vadd.f32 %v7803_v47, %v7775_v32 }
 0x1e9   : > { %v1414_v6 = vpack.c.bf16 %v1252_v46, %v1248_v2 }
 0x1ea   : > { %v1415_v7 = vpack.c.bf16 %v1254_v5, %v1250_v4  ;;  %v5965_v4 = vadd.f32 %v7803_v47, %v7771_v30 }
 0x1ec   : > { %v1257_v9 = vpop.f32.mrb[32].mxu0  ;;  %1738 = vmatprep.mubr.bf16.mxu1 %v1415_v7 }
 0x1ed   : > { %v5946_v13 = vadd.f32 %v5945_v8, %v1257_v9  ;;  %v1259_v15 = vpop.f32.mrb[33].mxu0  ;;  %1739 = vmatmul.mubr.bf16.gmra.mrb[60].mxu1 %v1414_v6  ;;  %v5967_v6 = vadd.f32 %v7806_v49, %v7773_v31 }
 0x1ee   : > { %v5948_v18 = vadd.f32 %v5947_v51, %v1259_v15  ;;  %v1261_v19 = vpop.f32.mrb[34].mxu0  ;;  %v5971_v15 = vadd.f32 %v7806_v49, %v7777_v33  ;;  %v5977_v33 = vadd.f32 %v7803_v47, %v7784_v37 }
 0x1ef   : > { %v5950_v20 = vadd.f32 %v5949_v11, %v1261_v19  ;;  %v1263_v36 = vpop.f32.mrb[35].mxu0  ;;  %v5975_v19 = vadd.f32 %v7806_v49, %v7781_v35 }
 0x1f0   : > { %v5952_v41 = vadd.f32 %v5951_v17, %v1263_v36  ;;  %v5973_v17 = vadd.f32 %v7803_v47, %v7779_v34 }
 0x1f1   : > { %v1416_v21 = vpack.c.bf16 %v5950_v20, %v5946_v13 }
 0x1f2   : > { %v1417_v44 = vpack.c.bf16 %v5952_v41, %v5948_v18 }
 0x1f4   : > { %v1267_v23 = vpop.f32.mrb[36].mxu0  ;;  %1748 = vmatprep.mubr.bf16.mxu1 %v1417_v44 }
 0x1f5   : > { %v5954_v50 = vadd.f32 %v5953_v22, %v1267_v23  ;;  %v1269_v24 = vpop.f32.mrb[37].mxu0  ;;  %1749 = vmatmul.mubr.bf16.gmra.mrb[64].mxu1 %v1416_v21  ;;  %v5981_v23 = vadd.f32 %v7803_v47, %v7795_v42 }
 0x1f6   : > { %v5956_v54 = vadd.f32 %v5955_v45, %v1269_v24  ;;  %v1271_v56 = vpop.f32.mrb[38].mxu0  ;;  %v5979_v45 = vadd.f32 %v7806_v49, %v7788_v39  ;;  %v5985_v39 = vadd.f32 %v7803_v47, %v7812_v57 }
 0x1f7   : > { %v5958_v60 = vadd.f32 %v5957_v48, %v1271_v56  ;;  %v1273_v0 = vpop.f32.mrb[39].mxu0 }
 0x1f8   : > { %v5960_v2 = vadd.f32 %v5959_v52, %v1273_v0 }
 0x1f9   : > { %v1418_v25 = vpack.c.bf16 %v5958_v60, %v5954_v50  ;;  %v5983_v50 = vadd.f32 %v7806_v49, %v7797_v43 }
 0x1fa   : > { %v1419_v46 = vpack.c.bf16 %v5960_v2, %v5956_v54  ;;  %v5987_v2 = vadd.f32 %v7806_v49, %v7814_v59  ;;  %v5993_v59 = vadd.f32 %v7803_v47, %v7836_v10  ;;  %v5999_v10 = vadd.f32 %v7806_v49, %v7845_v16 }
 0x1fb   : > { %v6001_v16 = vadd.f32 %v7803_v47, %v7860_v53  ;;  %v6007_v53 = vadd.f32 %v7806_v49, %v7869_v62 }
 0x1fc   : > { %v1277_v27 = vpop.f32.mrb[40].mxu0  ;;  %1758 = vmatprep.mubr.bf16.mxu1 %v1419_v46 }
 0x1fd   : > { %v5962_v5 = vadd.f32 %v5961_v26, %v1277_v27  ;;  %v1279_v1 = vpop.f32.mrb[41].mxu0  ;;  %1759 = vmatmul.mubr.bf16.gmra.mrb[68].mxu1 %v1418_v25  ;;  %v5989_v25 = vadd.f32 %v7803_v47, %v7816_v61  ;;  %v5991_v26 = vadd.f32 %v7806_v49, %v7821_v63  ;;  %v6153_v61 = vld [vmem:[%s9700_s7 + $0xc4] ss:$8 sps:$4 sm:$0xff]   ;;  %v6151_v63 = vld [vmem:[%s9700_s7 + $0xc0] ss:$8 sps:$4 sm:$0xff]  }
 0x1fe   : > { %v5964_v7 = vadd.f32 %v5963_v3, %v1279_v1  ;;  %v1281_v8 = vpop.f32.mrb[42].mxu0  ;;  %2537 = vmatprep.subr.bf16.mxu1 %v6153_v61 }
 0x1ff   : > { %v5966_v51 = vadd.f32 %v5965_v4, %v1281_v8  ;;  %v1283_v9 = vpop.f32.mrb[43].mxu0  ;;  %2538 = vmatpush1.bf16.msra.mxu1 %v6151_v63 }
 0x200   : > { %v5968_v11 = vadd.f32 %v5967_v6, %v1283_v9 }
 0x201   : > { %v1420_v28 = vpack.c.bf16 %v5966_v51, %v5962_v5  ;;  %v5997_v51 = vadd.f32 %v7803_v47, %v7840_v14  ;;  %v6154_v14 = vld [vmem:[%s9700_s7 + $0xd0] ss:$8 sps:$4 sm:$0xff]  }
 0x202   : > { %v1421_v13 = vpack.c.bf16 %v5968_v11, %v5964_v7  ;;  %v5995_v7 = vadd.f32 %v7806_v49, %v7838_v12 }
 0x204   : > { %v1287_v30 = vpop.f32.mrb[44].mxu0  ;;  %1768 = vmatprep.mubr.bf16.mxu1 %v1421_v13 }
 0x205   : > { %v5970_v18 = vadd.f32 %v5969_v29, %v1287_v30  ;;  %v1289_v31 = vpop.f32.mrb[45].mxu0  ;;  %1769 = vmatmul.mubr.bf16.gmra.mrb[72].mxu1 %v1420_v28 }
 0x206   : > { %v5972_v20 = vadd.f32 %v5971_v15, %v1289_v31  ;;  %v1291_v36 = vpop.f32.mrb[46].mxu0  ;;  %v6156_v15 = vld [vmem:[%s9700_s7 + $0xd4] ss:$8 sps:$4 sm:$0xff]   ;;  %v6003_v31 = vadd.f32 %v7806_v49, %v7862_v55  ;;  %v1464_v49 = vld [vmem:[%s9699_s6] sm:$0x3] }
 0x207   : > { %v5974_v41 = vadd.f32 %v5973_v17, %v1291_v36  ;;  %v1293_v21 = vpop.f32.mrb[47].mxu0  ;;  %2539 = vmatprep.subr.bf16.mxu1 %v6156_v15  ;;  %v6005_v36 = vadd.f32 %v7803_v47, %v7864_v58  ;;  %v6162_v47 = vld [vmem:[%s9700_s7 + $0xf4] ss:$8 sps:$4 sm:$0xff]   ;;  %v8025_v62 = vrot.slane %v1464_v49, %v7786_v38 }
 0x208   : > { %v5976_v44 = vadd.f32 %v5975_v19, %v1293_v21  ;;  %2540 = vmatpush1.bf16.msra.mxu1 %v6154_v14 }
 0x209   : > { %v1422_v32 = vpack.c.bf16 %v5974_v41, %v5970_v18 }
 0x20a   : > { %v1423_v22 = vpack.c.bf16 %v5976_v44, %v5972_v20  ;;  %v6159_v20 = vld [vmem:[%s9700_s7 + $0xe4] ss:$8 sps:$4 sm:$0xff]   ;;  %v6157_v44 = vld [vmem:[%s9700_s7 + $0xe0] ss:$8 sps:$4 sm:$0xff]  }
 0x20b   : > { %2541 = vmatprep.subr.bf16.mxu1 %v6159_v20 }
 0x20c   : > { %v1297_v34 = vpop.f32.mrb[48].mxu0  ;;  %1778 = vmatprep.mubr.bf16.mxu1 %v1423_v22  ;;  %2542 = vmatpush1.bf16.msra.mxu1 %v6157_v44 }
 0x20d   : > { %v5978_v48 = vadd.f32 %v5977_v33, %v1297_v34  ;;  %v1299_v35 = vpop.f32.mrb[49].mxu0  ;;  %1779 = vmatmul.mubr.bf16.gmra.mrb[76].mxu1 %v1422_v32  ;;  %v6160_v34 = vld [vmem:[%s9700_s7 + $0xf0] ss:$8 sps:$4 sm:$0xff]   ;;  %2543 = vmatprep.subr.bf16.mxu1 %v6162_v47 }
 0x20e   : > { %v5980_v24 = vadd.f32 %v5979_v45, %v1299_v35  ;;  %v1301_v52 = vpop.f32.mrb[50].mxu0 }
 0x20f   : > { %v5982_v54 = vadd.f32 %v5981_v23, %v1301_v52  ;;  %v1303_v56 = vpop.f32.mrb[51].mxu0 }
 0x210   : > { %v5984_v60 = vadd.f32 %v5983_v50, %v1303_v56  ;;  %2544 = vmatpush1.bf16.msra.mxu1 %v6160_v34 }
 0x211   : > { %v1424_v37 = vpack.c.bf16 %v5982_v54, %v5978_v48  ;;  %v8028_v48 = vrot.slane %v1464_v49, %v7790_v40 }
 0x212   : > { %v1425_v0 = vpack.c.bf16 %v5984_v60, %v5980_v24 }
 0x214   : > { %v1307_v42 = vpop.f32.mrb[52].mxu0  ;;  %1788 = vmatprep.mubr.bf16.mxu1 %v1425_v0 }
 0x215   : > { %v5986_v46 = vadd.f32 %v5985_v39, %v1307_v42  ;;  %v1309_v43 = vpop.f32.mrb[53].mxu0  ;;  %1789 = vmatmul.mubr.bf16.gmra.mrb[80].mxu1 %v1424_v37 }
 0x216   : > { %v5988_v3 = vadd.f32 %v5987_v2, %v1309_v43  ;;  %v1311_v27 = vpop.f32.mrb[54].mxu0 }
 0x217   : > { %v5990_v4 = vadd.f32 %v5989_v25, %v1311_v27  ;;  %v1313_v5 = vpop.f32.mrb[55].mxu0 }
 0x218   : > { %v5992_v1 = vadd.f32 %v5991_v26, %v1313_v5 }
 0x219   : > { %v1426_v57 = vpack.c.bf16 %v5990_v4, %v5986_v46 }
 0x21a   : > { %v1427_v6 = vpack.c.bf16 %v5992_v1, %v5988_v3 }
 0x21c   : > { %v1317_v8 = vpop.f32.mrb[56].mxu0  ;;  %1798 = vmatprep.mubr.bf16.mxu1 %v1427_v6 }
 0x21d   : > { %v5994_v9 = vadd.f32 %v5993_v59, %v1317_v8  ;;  %v1319_v11 = vpop.f32.mrb[57].mxu0  ;;  %1799 = vmatmul.mubr.bf16.gmra.mrb[84].mxu1 %v1426_v57 }
 0x21e   : > { %v5996_v28 = vadd.f32 %v5995_v7, %v1319_v11  ;;  %v1321_v13 = vpop.f32.mrb[58].mxu0 }
 0x21f   : > { %v5998_v12 = vadd.f32 %v5997_v51, %v1321_v13  ;;  %v1323_v29 = vpop.f32.mrb[59].mxu0 }
 0x220   : > { %v6000_v30 = vadd.f32 %v5999_v10, %v1323_v29 }
 0x221   : > { %v1428_v17 = vpack.c.bf16 %v5998_v12, %v5994_v9 }
 0x222   : > { %v1429_v18 = vpack.c.bf16 %v6000_v30, %v5996_v28 }
 0x224   : > { %v1327_v19 = vpop.f32.mrb[60].mxu0  ;;  %1808 = vmatprep.mubr.bf16.mxu1 %v1429_v18 }
 0x225   : > { %v6002_v41 = vadd.f32 %v6001_v16, %v1327_v19  ;;  %v1329_v21 = vpop.f32.mrb[61].mxu0  ;;  %1809 = vmatmul.mubr.bf16.gmra.mrb[88].mxu1 %v1428_v17 }
 0x226   : > { %v6004_v55 = vadd.f32 %v6003_v31, %v1329_v21  ;;  %v1331_v32 = vpop.f32.mrb[62].mxu0 }
 0x227   : > { %v6006_v22 = vadd.f32 %v6005_v36, %v1331_v32  ;;  %v1333_v33 = vpop.f32.mrb[63].mxu0 }
 0x228   : > { %v6008_v45 = vadd.f32 %v6007_v53, %v1333_v33 }
 0x229   : > { %v1430_v58 = vpack.c.bf16 %v6006_v22, %v6002_v41 }
 0x22a   : > { %v1431_v23 = vpack.c.bf16 %v6008_v45, %v6004_v55 }
 0x22c   : > { %1818 = vmatprep.mubr.bf16.mxu1 %v1431_v23 }
 0x22d   : > { %1819 = vmatmul.mubr.bf16.gmra.mrb[92].mxu1 %v1430_v58 }
 0x288   : > { %v1670_v35 = vpop.f32.mrb[32].mxu1 }
 0x289   : > { %v8031_v50 = vadd.f32 %v1670_v35, %v8025_v62  ;;  %v1672_v24 = vpop.f32.mrb[33].mxu1 }
 0x28a   : > { %v8034_v52 = vadd.f32 %v1672_v24, %v8028_v48  ;;  %v1674_v54 = vpop.f32.mrb[34].mxu1 }
 0x28b   : > { %v5422_v56 = vmul.f32 -1.442695, %v8031_v50  ;;  %v8038_v60 = vadd.f32 %v1674_v54, %v8025_v62  ;;  %v1676_v37 = vpop.f32.mrb[35].mxu1 }
 0x28c   : > { %v5423_v0 = vmul.f32 -1.442695, %v8034_v52  ;;  %v8042_v39 = vadd.f32 %v1676_v37, %v8028_v48 }
 0x28d   : > { %6275 = vpow2.f32 %v5422_v56  ;;  %v5424_v2 = vmul.f32 -1.442695, %v8038_v60 }
 0x28e   : > { %6277 = vpow2.f32 %v5423_v0  ;;  %v5425_v42 = vmul.f32 -1.442695, %v8042_v39 }
 0x28f   : > { %6279 = vpow2.f32 %v5424_v2 }
 0x290   : > { %6281 = vpow2.f32 %v5425_v42  ;;  %v1680_v25 = vpop.f32.mrb[36].mxu1 }
 0x291   : > { %v8047_v46 = vadd.f32 %v1680_v25, %v8025_v62  ;;  %v1682_v43 = vpop.f32.mrb[37].mxu1 }
 0x292   : > { %v8050_v26 = vadd.f32 %v1682_v43, %v8028_v48  ;;  %v1684_v3 = vpop.f32.mrb[38].mxu1 }
 0x293   : > { %v5426_v27 = vmul.f32 -1.442695, %v8047_v46  ;;  %v8054_v4 = vadd.f32 %v1684_v3, %v8025_v62  ;;  %v1686_v5 = vpop.f32.mrb[39].mxu1 }
 0x294   : > { %v5427_v1 = vmul.f32 -1.442695, %v8050_v26  ;;  %v8058_v57 = vadd.f32 %v1686_v5, %v8028_v48 }
 0x295   : > { %6283 = vpow2.f32 %v5426_v27  ;;  %v5428_v6 = vmul.f32 -1.442695, %v8054_v4 }
 0x296   : > { %6285 = vpow2.f32 %v5427_v1  ;;  %v5429_v59 = vmul.f32 -1.442695, %v8058_v57 }
 0x297   : > { %v6276_v61 = vpop.eup %6275  ;;  %6287 = vpow2.f32 %v5428_v6 }
 0x298   : > { %v6278_v7 = vpop.eup %6277  ;;  %v2021_v8 = vadd.f32 1.0, %v6276_v61  ;;  %6289 = vpow2.f32 %v5429_v59  ;;  %v1690_v63 = vpop.f32.mrb[40].mxu1 }
 0x299   : > { %v6280_v51 = vpop.eup %6279  ;;  %v2022_v9 = vadd.f32 1.0, %v6278_v7  ;;  %v8063_v11 = vadd.f32 %v1690_v63, %v8025_v62  ;;  %v1692_v10 = vpop.f32.mrb[41].mxu1 }
 0x29a   : > { %v6282_v28 = vpop.eup %6281  ;;  %6291 = vrcp.f32 %v2021_v8  ;;  %v2023_v13 = vadd.f32 1.0, %v6280_v51  ;;  %v8066_v12 = vadd.f32 %v1692_v10, %v8028_v48  ;;  %v1694_v29 = vpop.f32.mrb[42].mxu1 }
 0x29b   : > { %6293 = vrcp.f32 %v2022_v9  ;;  %v2024_v15 = vadd.f32 1.0, %v6282_v28  ;;  %v5430_v30 = vmul.f32 -1.442695, %v8063_v11  ;;  %v8070_v14 = vadd.f32 %v1694_v29, %v8025_v62  ;;  %v1696_v17 = vpop.f32.mrb[43].mxu1 }
 0x29c   : > { %6295 = vrcp.f32 %v2023_v13  ;;  %v5431_v18 = vmul.f32 -1.442695, %v8066_v12  ;;  %v8074_v16 = vadd.f32 %v1696_v17, %v8028_v48 }
 0x29d   : > { %6297 = vrcp.f32 %v2024_v15  ;;  %v5432_v31 = vmul.f32 -1.442695, %v8070_v14 }
 0x29e   : > { %6299 = vpow2.f32 %v5430_v30  ;;  %v5433_v19 = vmul.f32 -1.442695, %v8074_v16 }
 0x29f   : > { %v6284_v20 = vpop.eup %6283  ;;  %6301 = vpow2.f32 %v5431_v18 }
 0x2a0   : > { %v6286_v36 = vpop.eup %6285  ;;  %v2025_v41 = vadd.f32 1.0, %v6284_v20  ;;  %6303 = vpow2.f32 %v5432_v31  ;;  %v1700_v21 = vpop.f32.mrb[44].mxu1 }
 0x2a1   : > { %v6288_v44 = vpop.eup %6287  ;;  %v2026_v53 = vadd.f32 1.0, %v6286_v36  ;;  %6305 = vpow2.f32 %v5433_v19  ;;  %v8079_v55 = vadd.f32 %v1700_v21, %v8025_v62  ;;  %v1702_v32 = vpop.f32.mrb[45].mxu1  ;;  %v6168_v19 = vld [vmem:[%s9702_s9 + $0x14] ss:$8 sps:$4 sm:$0xff]  }
 0x2a2   : > { %v6290_v22 = vpop.eup %6289  ;;  %6307 = vrcp.f32 %v2025_v41  ;;  %v2027_v33 = vadd.f32 1.0, %v6288_v44  ;;  %v8082_v45 = vadd.f32 %v1702_v32, %v8028_v48  ;;  %v1704_v47 = vpop.f32.mrb[46].mxu1  ;;  %v6166_v41 = vld [vmem:[%s9702_s9 + $0x10] ss:$8 sps:$4 sm:$0xff]  }
 0x2a3   : > { %6309 = vrcp.f32 %v2026_v53  ;;  %v2028_v58 = vadd.f32 1.0, %v6290_v22  ;;  %v5434_v34 = vmul.f32 -1.442695, %v8079_v55  ;;  %v8086_v23 = vadd.f32 %v1704_v47, %v8025_v62  ;;  %v1706_v49 = vpop.f32.mrb[47].mxu1  ;;  %v6171_v53 = vld [vmem:[%s9702_s9 + $0x24] ss:$8 sps:$4 sm:$0xff]  }
 0x2a4   : > { %v6292_v35 = vpop.eup %6291  ;;  %6311 = vrcp.f32 %v2027_v33  ;;  %v5435_v24 = vmul.f32 -1.442695, %v8082_v45  ;;  %v8090_v54 = vadd.f32 %v1706_v49, %v8028_v48 }
 0x2a5   : > { %v6294_v56 = vpop.eup %6293  ;;  %6313 = vrcp.f32 %v2028_v58  ;;  %v5436_v37 = vmul.f32 -1.442695, %v8086_v23  ;;  %v2213_v25 = vmul.f32 %v6292_v35, %v8031_v50 }
 0x2a6   : > { %v6296_v0 = vpop.eup %6295  ;;  %6315 = vpow2.f32 %v5434_v34  ;;  %v5437_v2 = vmul.f32 -1.442695, %v8090_v54  ;;  %v2214_v27 = vmul.f32 %v6294_v56, %v8034_v52  ;;  %v6163_v52 = vld [vmem:[%s9702_s9] ss:$8 sps:$4 sm:$0xff]  }
 0x2a7   : > { %v6298_v42 = vpop.eup %6297  ;;  %v2215_v43 = vmul.f32 %v6296_v0, %v8038_v60  ;;  %6317 = vpow2.f32 %v5435_v24 }
 0x2a8   : > { %v6300_v3 = vpop.eup %6299  ;;  %v2216_v5 = vmul.f32 %v6298_v42, %v8042_v39  ;;  %6319 = vpow2.f32 %v5436_v37  ;;  %v1710_v1 = vpop.f32.mrb[48].mxu1  ;;  %v6165_v39 = vld [vmem:[%s9702_s9 + $0x4] ss:$8 sps:$4 sm:$0xff]  }
 0x2a9   : > { %v6302_v6 = vpop.eup %6301  ;;  %v2277_v59 = vpack.c.bf16 %v2215_v43, %v2213_v25  ;;  %v2029_v61 = vadd.f32 1.0, %v6300_v3  ;;  %6321 = vpow2.f32 %v5437_v2  ;;  %v8099_v7 = vadd.f32 %v1710_v1, %v8025_v62  ;;  %v1712_v8 = vpop.f32.mrb[49].mxu1  ;;  %3390 = vmatprep.subr.bf16.mxu0 %v6165_v39  ;;  %v6174_v25 = vld [vmem:[%s9702_s9 + $0x34] ss:$8 sps:$4 sm:$0xff]  }
 0x2aa   : > { %v6304_v63 = vpop.eup %6303  ;;  %v2030_v50 = vadd.f32 1.0, %v6302_v6  ;;  %v8102_v60 = vadd.f32 %v1712_v8, %v8028_v48  ;;  %v1714_v51 = vpop.f32.mrb[50].mxu1  ;;  %v2278_v9 = vpack.c.bf16 %v2216_v5, %v2214_v27  ;;  %3391 = vmatpush1.bf16.msra.mxu0 %v6163_v52  ;;  %v6177_v52 = vld [vmem:[%s9702_s9 + $0x44] ss:$8 sps:$4 sm:$0xff]  }
 0x2ab   : > { %v6306_v10 = vpop.eup %6305  ;;  %6323 = vrcp.f32 %v2029_v61  ;;  %v2031_v28 = vadd.f32 1.0, %v6304_v63  ;;  %v5438_v13 = vmul.f32 -1.442695, %v8099_v7  ;;  %v8112_v29 = vadd.f32 %v1714_v51, %v8025_v62  ;;  %v1716_v15 = vpop.f32.mrb[51].mxu1  ;;  %3392 = vmatprep.subr.bf16.mxu0 %v6168_v19 }
 0x2ac   : > { %v6308_v30 = vpop.eup %6307  ;;  %6325 = vrcp.f32 %v2030_v50  ;;  %v2032_v17 = vadd.f32 1.0, %v6306_v10  ;;  %v5439_v18 = vmul.f32 -1.442695, %v8102_v60  ;;  %v8116_v31 = vadd.f32 %v1716_v15, %v8028_v48  ;;  %2545 = vmatprep.mubr.bf16.mxu1 %v2278_v9  ;;  %v6172_v50 = vld [vmem:[%s9702_s9 + $0x30] ss:$8 sps:$4 sm:$0xff]  }
 0x2ad   : > { %v6310_v20 = vpop.eup %6309  ;;  %6327 = vrcp.f32 %v2031_v28  ;;  %v5440_v36 = vmul.f32 -1.442695, %v8112_v29  ;;  %2546 = vmatmul.mubr.bf16.vlgmr.msra.gmra.mrb[96].mxu1 %v2277_v59  ;;  %v2217_v22 = vmul.f32 %v6308_v30, %v8047_v46  ;;  %v6169_v46 = vld [vmem:[%s9702_s9 + $0x20] ss:$8 sps:$4 sm:$0xff]  }
 0x2ae   : > { %v6312_v21 = vpop.eup %6311  ;;  %6329 = vrcp.f32 %v2032_v17  ;;  %v5441_v44 = vmul.f32 -1.442695, %v8116_v31  ;;  %v2218_v58 = vmul.f32 %v6310_v20, %v8050_v26  ;;  %3393 = vmatpush1.bf16.msra.mxu0 %v6166_v41 }
 0x2af   : > { %v6314_v32 = vpop.eup %6313  ;;  %v2219_v33 = vmul.f32 %v6312_v21, %v8054_v4  ;;  %6331 = vpow2.f32 %v5438_v13  ;;  %3394 = vmatprep.subr.bf16.mxu0 %v6171_v53 }
 0x2b0   : > { %v6316_v47 = vpop.eup %6315  ;;  %v2220_v34 = vmul.f32 %v6314_v32, %v8058_v57  ;;  %6333 = vpow2.f32 %v5439_v18  ;;  %v1720_v49 = vpop.f32.mrb[52].mxu1 }
 0x2b1   : > { %v6318_v35 = vpop.eup %6317  ;;  %v2033_v24 = vadd.f32 1.0, %v6316_v47  ;;  %6335 = vpow2.f32 %v5440_v36  ;;  %v8134_v56 = vadd.f32 %v1720_v49, %v8025_v62  ;;  %v1722_v37 = vpop.f32.mrb[53].mxu1  ;;  %v2279_v0 = vpack.c.bf16 %v2219_v33, %v2217_v22  ;;  %v6175_v36 = vld [vmem:[%s9702_s9 + $0x40] ss:$8 sps:$4 sm:$0xff]  }
 0x2b2   : > { %v6320_v4 = vpop.eup %6319  ;;  %v2034_v2 = vadd.f32 1.0, %v6318_v35  ;;  %6337 = vpow2.f32 %v5441_v44  ;;  %v8140_v26 = vadd.f32 %v1722_v37, %v8028_v48  ;;  %v1724_v57 = vpop.f32.mrb[54].mxu1  ;;  %v2280_v42 = vpack.c.bf16 %v2220_v34, %v2218_v58  ;;  %3395 = vmatpush1.bf16.msra.mxu0 %v6169_v46 }
 0x2b3   : > { %v6322_v43 = vpop.eup %6321  ;;  %6339 = vrcp.f32 %v2033_v24  ;;  %v2035_v3 = vadd.f32 1.0, %v6320_v4  ;;  %v5442_v27 = vmul.f32 -1.442695, %v8134_v56  ;;  %v8147_v5 = vadd.f32 %v1724_v57, %v8025_v62  ;;  %v1726_v1 = vpop.f32.mrb[55].mxu1  ;;  %3396 = vmatprep.subr.bf16.mxu0 %v6174_v25 }
 0x2b4   : > { %6341 = vrcp.f32 %v2034_v2  ;;  %v2036_v6 = vadd.f32 1.0, %v6322_v43  ;;  %v5443_v59 = vmul.f32 -1.442695, %v8140_v26  ;;  %v8151_v61 = vadd.f32 %v1726_v1, %v8028_v48  ;;  %2555 = vmatprep.mubr.bf16.mxu1 %v2280_v42  ;;  %v6183_v2 = vld [vmem:[%s9702_s9 + $0x64] ss:$8 sps:$4 sm:$0xff]  }
 0x2b5   : > { %v6324_v8 = vpop.eup %6323  ;;  %6343 = vrcp.f32 %v2035_v3  ;;  %v5444_v63 = vmul.f32 -1.442695, %v8147_v5  ;;  %2556 = vmatmul.mubr.bf16.gmra.mrb[100].mxu1 %v2279_v0  ;;  %v6178_v0 = vld [vmem:[%s9702_s9 + $0x50] ss:$8 sps:$4 sm:$0xff]  }
 0x2b6   : > { %v6326_v51 = vpop.eup %6325  ;;  %6345 = vrcp.f32 %v2036_v6  ;;  %v5445_v9 = vmul.f32 -1.442695, %v8151_v61  ;;  %v2221_v28 = vmul.f32 %v6324_v8, %v8063_v11  ;;  %3397 = vmatpush1.bf16.msra.mxu0 %v6172_v50 }
 0x2b7   : > { %v6328_v39 = vpop.eup %6327  ;;  %6347 = vpow2.f32 %v5442_v27  ;;  %v2222_v17 = vmul.f32 %v6326_v51, %v8066_v12  ;;  %3398 = vmatprep.subr.bf16.mxu0 %v6177_v52 }
 0x2b8   : > { %v6330_v10 = vpop.eup %6329  ;;  %v2223_v13 = vmul.f32 %v6328_v39, %v8070_v14  ;;  %6349 = vpow2.f32 %v5443_v59  ;;  %v1730_v15 = vpop.f32.mrb[56].mxu1 }
 0x2b9   : > { %v6332_v30 = vpop.eup %6331  ;;  %v2224_v18 = vmul.f32 %v6330_v10, %v8074_v16  ;;  %6351 = vpow2.f32 %v5444_v63  ;;  %v8166_v19 = vadd.f32 %v1730_v15, %v8025_v62  ;;  %v1732_v20 = vpop.f32.mrb[57].mxu1  ;;  %v6180_v16 = vld [vmem:[%s9702_s9 + $0x54] ss:$8 sps:$4 sm:$0xff]   ;;  %v6181_v63 = vld [vmem:[%s9702_s9 + $0x60] ss:$8 sps:$4 sm:$0xff]  }
 0x2ba   : > { %v6334_v11 = vpop.eup %6333  ;;  %v2037_v41 = vadd.f32 1.0, %v6332_v30  ;;  %6353 = vpow2.f32 %v5445_v9  ;;  %v8172_v14 = vadd.f32 %v1732_v20, %v8028_v48  ;;  %v1734_v21 = vpop.f32.mrb[58].mxu1  ;;  %v2281_v12 = vpack.c.bf16 %v2223_v13, %v2221_v28  ;;  %3399 = vmatpush1.bf16.msra.mxu0 %v6175_v36 }
 0x2bb   : > { %v6336_v44 = vpop.eup %6335  ;;  %v2038_v53 = vadd.f32 1.0, %v6334_v11  ;;  %v8178_v32 = vadd.f32 %v1734_v21, %v8025_v62  ;;  %v1736_v22 = vpop.f32.mrb[59].mxu1  ;;  %v2282_v33 = vpack.c.bf16 %v2224_v18, %v2222_v17  ;;  %v5446_v34 = vmul.f32 -1.442695, %v8166_v19  ;;  %3400 = vmatprep.subr.bf16.mxu0 %v6180_v16 }
 0x2bc   : > { %v6338_v47 = vpop.eup %6337  ;;  %6355 = vrcp.f32 %v2037_v41  ;;  %v2039_v58 = vadd.f32 1.0, %v6336_v44  ;;  %v8182_v49 = vadd.f32 %v1736_v22, %v8028_v48  ;;  %v5447_v37 = vmul.f32 -1.442695, %v8172_v14 }
 0x2bd   : > { %v6340_v35 = vpop.eup %6339  ;;  %6357 = vrcp.f32 %v2038_v53  ;;  %v2040_v24 = vadd.f32 1.0, %v6338_v47  ;;  %2565 = vmatprep.mubr.bf16.mxu1 %v2282_v33  ;;  %v5448_v4 = vmul.f32 -1.442695, %v8178_v32 }
 0x2be   : > { %v6342_v46 = vpop.eup %6341  ;;  %6359 = vrcp.f32 %v2039_v58  ;;  %2566 = vmatmul.mubr.bf16.gmra.mrb[104].mxu1 %v2281_v12  ;;  %v5449_v42 = vmul.f32 -1.442695, %v8182_v49  ;;  %v2225_v43 = vmul.f32 %v6340_v35, %v8079_v55  ;;  %3401 = vmatpush1.bf16.msra.mxu0 %v6178_v0  ;;  %v6189_v12 = vld [vmem:[%s9702_s9 + $0x84] ss:$8 sps:$4 sm:$0xff]   ;;  %v6187_v35 = vld [vmem:[%s9702_s9 + $0x80] ss:$8 sps:$4 sm:$0xff]  }
 0x2bf   : > { %v6344_v57 = vpop.eup %6343  ;;  %6361 = vrcp.f32 %v2040_v24  ;;  %3402 = vmatprep.subr.bf16.mxu0 %v6183_v2  ;;  %v2226_v39 = vmul.f32 %v6342_v46, %v8082_v45  ;;  %v6184_v45 = vld [vmem:[%s9702_s9 + $0x70] ss:$8 sps:$4 sm:$0xff]  }
 0x2c0   : > { %v6346_v25 = vpop.eup %6345  ;;  %v2227_v3 = vmul.f32 %v6344_v57, %v8086_v23  ;;  %6363 = vpow2.f32 %v5446_v34  ;;  %v1740_v27 = vpop.f32.mrb[60].mxu1 }
 0x2c1   : > { %v6348_v1 = vpop.eup %6347  ;;  %v2228_v6 = vmul.f32 %v6346_v25, %v8090_v54  ;;  %6365 = vpow2.f32 %v5447_v37  ;;  %v8197_v59 = vadd.f32 %v1740_v27, %v8025_v62  ;;  %v1742_v8 = vpop.f32.mrb[61].mxu1  ;;  %v6186_v54 = vld [vmem:[%s9702_s9 + $0x74] ss:$8 sps:$4 sm:$0xff]  }
 0x2c2   : > { %v6350_v50 = vpop.eup %6349  ;;  %v2041_v51 = vadd.f32 1.0, %v6348_v1  ;;  %6367 = vpow2.f32 %v5448_v4  ;;  %v8203_v55 = vadd.f32 %v1742_v8, %v8028_v48  ;;  %v1744_v23 = vpop.f32.mrb[62].mxu1  ;;  %v2283_v9 = vpack.c.bf16 %v2227_v3, %v2225_v43  ;;  %3403 = vmatpush1.bf16.msra.mxu0 %v6181_v63  ;;  %v6192_v4 = vld [vmem:[%s9702_s9 + $0x94] ss:$8 sps:$4 sm:$0xff]  }
 0x2c3   : > { %v6352_v52 = vpop.eup %6351  ;;  %v2042_v10 = vadd.f32 1.0, %v6350_v50  ;;  %6369 = vpow2.f32 %v5449_v42  ;;  %v8210_v28 = vadd.f32 %v1744_v23, %v8025_v62  ;;  %v1746_v13 = vpop.f32.mrb[63].mxu1  ;;  %v5450_v17 = vmul.f32 -1.442695, %v8197_v59  ;;  %3404 = vmatprep.subr.bf16.mxu0 %v6186_v54 }
 0x2c4   : > { %v6354_v15 = vpop.eup %6353  ;;  %6371 = vrcp.f32 %v2041_v51  ;;  %v2043_v30 = vadd.f32 1.0, %v6352_v52  ;;  %v8214_v18 = vadd.f32 %v1746_v13, %v8028_v48  ;;  %v5451_v36 = vmul.f32 -1.442695, %v8203_v55 }
 0x2c5   : > { %6373 = vrcp.f32 %v2042_v10  ;;  %v2044_v20 = vadd.f32 1.0, %v6354_v15  ;;  %v2284_v11 = vpack.c.bf16 %v2228_v6, %v2226_v39  ;;  %v5452_v21 = vmul.f32 -1.442695, %v8210_v28 }
 0x2c6   : > { %v6356_v41 = vpop.eup %6355  ;;  %6375 = vrcp.f32 %v2043_v30  ;;  %v5453_v44 = vmul.f32 -1.442695, %v8214_v18  ;;  %3405 = vmatpush1.bf16.msra.mxu0 %v6184_v45 }
 0x2c7   : > { %v6358_v16 = vpop.eup %6357  ;;  %6377 = vrcp.f32 %v2044_v20  ;;  %2575 = vmatprep.mubr.bf16.mxu1 %v2284_v11  ;;  %3406 = vmatprep.subr.bf16.mxu0 %v6189_v12  ;;  %v2229_v57 = vmul.f32 %v6356_v41, %v8099_v7  ;;  %v6190_v7 = vld [vmem:[%s9702_s9 + $0x90] ss:$8 sps:$4 sm:$0xff]   ;;  %v6193_v20 = vld [vmem:[%s9702_s9 + $0xa0] ss:$8 sps:$4 sm:$0xff]   ;;  %v6198_v12 = vld [vmem:[%s9702_s9 + $0xb4] ss:$8 sps:$4 sm:$0xff]  }
 0x2c8   : > { %v6360_v53 = vpop.eup %6359  ;;  %6379 = vpow2.f32 %v5450_v17  ;;  %2576 = vmatmul.mubr.bf16.gmra.mrb[108].mxu1 %v2283_v9  ;;  %v1750_v22 = vpop.f32.mrb[64].mxu1  ;;  %v2230_v37 = vmul.f32 %v6358_v16, %v8102_v60  ;;  %v6195_v9 = vld [vmem:[%s9702_s9 + $0xa4] ss:$8 sps:$4 sm:$0xff]  }
 0x2c9   : > { %v6362_v33 = vpop.eup %6361  ;;  %v2231_v47 = vmul.f32 %v6360_v53, %v8112_v29  ;;  %6381 = vpow2.f32 %v5451_v36  ;;  %v8227_v58 = vadd.f32 %v1750_v22, %v8025_v62  ;;  %v1752_v34 = vpop.f32.mrb[65].mxu1 }
 0x2ca   : > { %v6364_v24 = vpop.eup %6363  ;;  %v2232_v0 = vmul.f32 %v6362_v33, %v8116_v31  ;;  %6383 = vpow2.f32 %v5452_v21  ;;  %v8235_v46 = vadd.f32 %v1752_v34, %v8028_v48  ;;  %v1754_v29 = vpop.f32.mrb[66].mxu1  ;;  %3407 = vmatpush1.bf16.msra.mxu0 %v6187_v35 }
 0x2cb   : > { %v6366_v2 = vpop.eup %6365  ;;  %v2045_v42 = vadd.f32 1.0, %v6364_v24  ;;  %6385 = vpow2.f32 %v5453_v44  ;;  %v8242_v25 = vadd.f32 %v1754_v29, %v8025_v62  ;;  %v1756_v60 = vpop.f32.mrb[67].mxu1  ;;  %v5454_v8 = vmul.f32 -1.442695, %v8227_v58  ;;  %3408 = vmatprep.subr.bf16.mxu0 %v6192_v4 }
 0x2cc   : > { %v6368_v31 = vpop.eup %6367  ;;  %v2046_v43 = vadd.f32 1.0, %v6366_v2  ;;  %v8245_v3 = vadd.f32 %v1756_v60, %v8028_v48  ;;  %v2286_v27 = vpack.c.bf16 %v2232_v0, %v2230_v37  ;;  %v2285_v63 = vpack.c.bf16 %v2231_v47, %v2229_v57  ;;  %v6196_v0 = vld [vmem:[%s9702_s9 + $0xb0] ss:$8 sps:$4 sm:$0xff]  }
 0x2cd   : > { %v6370_v1 = vpop.eup %6369  ;;  %6387 = vrcp.f32 %v2045_v42  ;;  %v2047_v6 = vadd.f32 1.0, %v6368_v31  ;;  %v5455_v23 = vmul.f32 -1.442695, %v8235_v46  ;;  %v5456_v52 = vmul.f32 -1.442695, %v8242_v25 }
 0x2ce   : > { %v6372_v50 = vpop.eup %6371  ;;  %6389 = vrcp.f32 %v2046_v43  ;;  %v2048_v51 = vadd.f32 1.0, %v6370_v1  ;;  %2585 = vmatprep.mubr.bf16.mxu1 %v2286_v27  ;;  %v5457_v10 = vmul.f32 -1.442695, %v8245_v3  ;;  %3409 = vmatpush1.bf16.msra.mxu0 %v6190_v7 }
 0x2cf   : > { %v6374_v54 = vpop.eup %6373  ;;  %6391 = vrcp.f32 %v2047_v6  ;;  %3410 = vmatprep.subr.bf16.mxu0 %v6195_v9  ;;  %v2233_v33 = vmul.f32 %v6372_v50, %v8134_v56 }
 0x2d0   : > { %v6376_v39 = vpop.eup %6375  ;;  %6393 = vrcp.f32 %v2048_v51  ;;  %2586 = vmatmul.mubr.bf16.gmra.mrb[112].mxu1 %v2285_v63  ;;  %v1760_v13 = vpop.f32.mrb[68].mxu1  ;;  %v2234_v44 = vmul.f32 %v6374_v54, %v8140_v26 }
 0x2d1   : > { %v6378_v15 = vpop.eup %6377  ;;  %6395 = vpow2.f32 %v5454_v8  ;;  %v8258_v30 = vadd.f32 %v1760_v13, %v8025_v62  ;;  %v1762_v17 = vpop.f32.mrb[69].mxu1  ;;  %v2235_v11 = vmul.f32 %v6376_v39, %v8147_v5 }
 0x2d2   : > { %v6380_v36 = vpop.eup %6379  ;;  %v2236_v45 = vmul.f32 %v6378_v15, %v8151_v61  ;;  %6397 = vpow2.f32 %v5455_v23  ;;  %v8266_v41 = vadd.f32 %v1762_v17, %v8028_v48  ;;  %v1764_v21 = vpop.f32.mrb[70].mxu1  ;;  %3411 = vmatpush1.bf16.msra.mxu0 %v6193_v20 }
 0x2d3   : > { %v6382_v16 = vpop.eup %6381  ;;  %v2049_v53 = vadd.f32 1.0, %v6380_v36  ;;  %6399 = vpow2.f32 %v5456_v52  ;;  %v8273_v22 = vadd.f32 %v1764_v21, %v8025_v62  ;;  %v1766_v5 = vpop.f32.mrb[71].mxu1  ;;  %v5458_v37 = vmul.f32 -1.442695, %v8258_v30  ;;  %3412 = vmatprep.subr.bf16.mxu0 %v6198_v12 }
 0x2d4   : > { %v6384_v61 = vpop.eup %6383  ;;  %v2050_v47 = vadd.f32 1.0, %v6382_v16  ;;  %6401 = vpow2.f32 %v5457_v10  ;;  %v8277_v34 = vadd.f32 %v1766_v5, %v8028_v48  ;;  %v2288_v26 = vpack.c.bf16 %v2236_v45, %v2234_v44 }
 0x2d5   : > { %v6386_v35 = vpop.eup %6385  ;;  %6403 = vrcp.f32 %v2049_v53  ;;  %v2051_v24 = vadd.f32 1.0, %v6384_v61  ;;  %v5459_v56 = vmul.f32 -1.442695, %v8266_v41  ;;  %v2287_v4 = vpack.c.bf16 %v2235_v11, %v2233_v33 }
 0x2d6   : > { %6405 = vrcp.f32 %v2050_v47  ;;  %v2052_v29 = vadd.f32 1.0, %v6386_v35  ;;  %v5460_v57 = vmul.f32 -1.442695, %v8273_v22  ;;  %2595 = vmatprep.mubr.bf16.mxu1 %v2288_v26  ;;  %v5461_v60 = vmul.f32 -1.442695, %v8277_v34  ;;  %3413 = vmatpush1.bf16.msra.mxu0 %v6196_v0 }
 0x2d7   : > { %v6388_v2 = vpop.eup %6387  ;;  %6407 = vrcp.f32 %v2051_v24 }
 0x2d8   : > { %v6390_v42 = vpop.eup %6389  ;;  %6409 = vrcp.f32 %v2052_v29  ;;  %2596 = vmatmul.mubr.bf16.gmra.mrb[116].mxu1 %v2287_v4  ;;  %v1770_v31 = vpop.f32.mrb[72].mxu1 }
 0x2d9   : > { %v6392_v43 = vpop.eup %6391  ;;  %6411 = vpow2.f32 %v5458_v37  ;;  %v8287_v27 = vadd.f32 %v1770_v31, %v8025_v62  ;;  %v1772_v1 = vpop.f32.mrb[73].mxu1  ;;  %v2238_v8 = vmul.f32 %v6390_v42, %v8172_v14  ;;  %v2237_v14 = vmul.f32 %v6388_v2, %v8166_v19 }
 0x2da   : > { %v6394_v6 = vpop.eup %6393  ;;  %v2239_v63 = vmul.f32 %v6392_v43, %v8178_v32  ;;  %6413 = vpow2.f32 %v5459_v56  ;;  %v8292_v7 = vadd.f32 %v1772_v1, %v8028_v48  ;;  %v1774_v50 = vpop.f32.mrb[74].mxu1 }
 0x2db   : > { %v6396_v51 = vpop.eup %6395  ;;  %v2240_v23 = vmul.f32 %v6394_v6, %v8182_v49  ;;  %6415 = vpow2.f32 %v5460_v57  ;;  %v5462_v9 = vmul.f32 -1.442695, %v8287_v27  ;;  %v8297_v54 = vadd.f32 %v1774_v50, %v8025_v62  ;;  %v1776_v52 = vpop.f32.mrb[75].mxu1 }
 0x2dc   : > { %v6398_v39 = vpop.eup %6397  ;;  %v2053_v10 = vadd.f32 1.0, %v6396_v51  ;;  %6417 = vpow2.f32 %v5461_v60  ;;  %v8301_v32 = vadd.f32 %v1776_v52, %v8028_v48  ;;  %v5463_v36 = vmul.f32 -1.442695, %v8292_v7 }
 0x2dd   : > { %v6400_v13 = vpop.eup %6399  ;;  %v2054_v15 = vadd.f32 1.0, %v6398_v39  ;;  %6419 = vpow2.f32 %v5462_v9  ;;  %v2290_v17 = vpack.c.bf16 %v2240_v23, %v2238_v8  ;;  %v2289_v11 = vpack.c.bf16 %v2239_v63, %v2237_v14 }
 0x2de   : > { %v6402_v49 = vpop.eup %6401  ;;  %6421 = vrcp.f32 %v2053_v10  ;;  %v2055_v20 = vadd.f32 1.0, %v6400_v13  ;;  %v5464_v19 = vmul.f32 -1.442695, %v8297_v54  ;;  %v5465_v16 = vmul.f32 -1.442695, %v8301_v32 }
 0x2df   : > { %v6404_v45 = vpop.eup %6403  ;;  %6423 = vrcp.f32 %v2054_v15  ;;  %v2056_v21 = vadd.f32 1.0, %v6402_v49  ;;  %2605 = vmatprep.mubr.bf16.mxu1 %v2290_v17 }
 0x2e0   : > { %v6406_v12 = vpop.eup %6405  ;;  %6425 = vrcp.f32 %v2055_v20  ;;  %2606 = vmatmul.mubr.bf16.gmra.mrb[120].mxu1 %v2289_v11  ;;  %v1780_v44 = vpop.f32.mrb[76].mxu1  ;;  %v2241_v2 = vmul.f32 %v6404_v45, %v8197_v59 }
 0x2e1   : > { %v6408_v53 = vpop.eup %6407  ;;  %6427 = vrcp.f32 %v2056_v21  ;;  %v8307_v5 = vadd.f32 %v1780_v44, %v8025_v62  ;;  %v1782_v61 = vpop.f32.mrb[77].mxu1  ;;  %v2242_v47 = vmul.f32 %v6406_v12, %v8203_v55 }
 0x2e2   : > { %v6410_v33 = vpop.eup %6409  ;;  %v2243_v35 = vmul.f32 %v6408_v53, %v8210_v28  ;;  %6429 = vpow2.f32 %v5463_v36  ;;  %v1784_v24 = vpop.f32.mrb[78].mxu1  ;;  %v8314_v29 = vadd.f32 %v1782_v61, %v8028_v48 }
 0x2e3   : > { %v6412_v37 = vpop.eup %6411  ;;  %v2244_v26 = vmul.f32 %v6410_v33, %v8214_v18  ;;  %6431 = vpow2.f32 %v5464_v19  ;;  %v5466_v0 = vmul.f32 -1.442695, %v8307_v5  ;;  %v1786_v56 = vpop.f32.mrb[79].mxu1  ;;  %v8318_v55 = vadd.f32 %v1784_v24, %v8025_v62 }
 0x2e4   : > { %v6414_v4 = vpop.eup %6413  ;;  %v2057_v57 = vadd.f32 1.0, %v6412_v37  ;;  %6433 = vpow2.f32 %v5465_v16  ;;  %v8321_v18 = vadd.f32 %v1786_v56, %v8028_v48  ;;  %v2291_v1 = vpack.c.bf16 %v2243_v35, %v2241_v2 }
 0x2e5   : > { %v6416_v28 = vpop.eup %6415  ;;  %v2058_v42 = vadd.f32 1.0, %v6414_v4  ;;  %6435 = vpow2.f32 %v5466_v0  ;;  %v2292_v60 = vpack.c.bf16 %v2244_v26, %v2242_v47  ;;  %v5467_v59 = vmul.f32 -1.442695, %v8314_v29 }
 0x2e6   : > { %v6418_v31 = vpop.eup %6417  ;;  %6437 = vrcp.f32 %v2057_v57  ;;  %v2059_v43 = vadd.f32 1.0, %v6416_v28  ;;  %v5468_v51 = vmul.f32 -1.442695, %v8318_v55  ;;  %v5469_v52 = vmul.f32 -1.442695, %v8321_v18 }
 0x2e7   : > { %v6420_v6 = vpop.eup %6419  ;;  %6439 = vrcp.f32 %v2058_v42  ;;  %v2060_v8 = vadd.f32 1.0, %v6418_v31  ;;  %2615 = vmatprep.mubr.bf16.mxu1 %v2292_v60 }
 0x2e8   : > { %v6422_v63 = vpop.eup %6421  ;;  %6441 = vrcp.f32 %v2059_v43  ;;  %v2061_v50 = vadd.f32 1.0, %v6420_v6  ;;  %2616 = vmatmul.mubr.bf16.gmra.mrb[124].mxu1 %v2291_v1  ;;  %v1790_v23 = vpop.f32.mrb[80].mxu1 }
 0x2e9   : > { %v6424_v9 = vpop.eup %6423  ;;  %6443 = vrcp.f32 %v2060_v8  ;;  %v8327_v39 = vadd.f32 %v1790_v23, %v8025_v62  ;;  %v1792_v14 = vpop.f32.mrb[81].mxu1  ;;  %v2245_v13 = vmul.f32 %v6422_v63, %v8227_v58 }
 0x2ea   : > { %v6426_v10 = vpop.eup %6425  ;;  %6445 = vrcp.f32 %v2061_v50  ;;  %v1794_v15 = vpop.f32.mrb[82].mxu1  ;;  %v8333_v36 = vadd.f32 %v1792_v14, %v8028_v48  ;;  %v2246_v21 = vmul.f32 %v6424_v9, %v8235_v46 }
 0x2eb   : > { %v6428_v17 = vpop.eup %6427  ;;  %v2247_v49 = vmul.f32 %v6426_v10, %v8242_v25  ;;  %6447 = vpow2.f32 %v5467_v59  ;;  %v5470_v20 = vmul.f32 -1.442695, %v8327_v39  ;;  %v1796_v11 = vpop.f32.mrb[83].mxu1  ;;  %v8338_v58 = vadd.f32 %v1794_v15, %v8025_v62 }
 0x2ec   : > { %v6430_v45 = vpop.eup %6429  ;;  %v2248_v19 = vmul.f32 %v6428_v17, %v8245_v3  ;;  %6449 = vpow2.f32 %v5468_v51  ;;  %v8341_v25 = vadd.f32 %v1796_v11, %v8028_v48  ;;  %v5471_v3 = vmul.f32 -1.442695, %v8333_v36 }
 0x2ed   : > { %v6432_v12 = vpop.eup %6431  ;;  %v2062_v16 = vadd.f32 1.0, %v6430_v45  ;;  %6451 = vpow2.f32 %v5469_v52  ;;  %v2293_v44 = vpack.c.bf16 %v2247_v49, %v2245_v13  ;;  %v5472_v37 = vmul.f32 -1.442695, %v8338_v58 }
 0x2ee   : > { %v6434_v53 = vpop.eup %6433  ;;  %v2063_v61 = vadd.f32 1.0, %v6432_v12  ;;  %6453 = vpow2.f32 %v5470_v20  ;;  %v2294_v33 = vpack.c.bf16 %v2248_v19, %v2246_v21  ;;  %v5473_v56 = vmul.f32 -1.442695, %v8341_v25 }
 0x2ef   : > { %v6436_v47 = vpop.eup %6435  ;;  %6455 = vrcp.f32 %v2062_v16  ;;  %v2064_v46 = vadd.f32 1.0, %v6434_v53 }
 0x2f0   : > { %v6438_v35 = vpop.eup %6437  ;;  %6457 = vrcp.f32 %v2063_v61  ;;  %v2065_v24 = vadd.f32 1.0, %v6436_v47  ;;  %2625 = vmatprep.mubr.bf16.mxu1 %v2294_v33  ;;  %v1800_v26 = vpop.f32.mrb[84].mxu1 }
 0x2f1   : > { %v6440_v0 = vpop.eup %6439  ;;  %6459 = vrcp.f32 %v2064_v46  ;;  %2626 = vmatmul.mubr.bf16.gmra.mrb[128].mxu1 %v2293_v44  ;;  %v8347_v4 = vadd.f32 %v1800_v26, %v8025_v62  ;;  %v1802_v2 = vpop.f32.mrb[85].mxu1  ;;  %v2249_v28 = vmul.f32 %v6438_v35, %v8258_v30 }
 0x2f2   : > { %v6442_v57 = vpop.eup %6441  ;;  %6461 = vrcp.f32 %v2065_v24  ;;  %v8351_v42 = vadd.f32 %v1802_v2, %v8028_v48  ;;  %v1804_v60 = vpop.f32.mrb[86].mxu1  ;;  %v2250_v43 = vmul.f32 %v6440_v0, %v8266_v41 }
 0x2f3   : > { %v6444_v31 = vpop.eup %6443  ;;  %v2251_v1 = vmul.f32 %v6442_v57, %v8273_v22  ;;  %6463 = vpow2.f32 %v5471_v3  ;;  %v5474_v6 = vmul.f32 -1.442695, %v8347_v4  ;;  %v1806_v8 = vpop.f32.mrb[87].mxu1  ;;  %v8359_v50 = vadd.f32 %v1804_v60, %v8025_v62 }
 0x2f4   : > { %v6446_v59 = vpop.eup %6445  ;;  %v2252_v63 = vmul.f32 %v6444_v31, %v8277_v34  ;;  %6465 = vpow2.f32 %v5472_v37  ;;  %v5475_v30 = vmul.f32 -1.442695, %v8351_v42  ;;  %v8362_v23 = vadd.f32 %v1806_v8, %v8028_v48 }
 0x2f5   : > { %v6448_v51 = vpop.eup %6447  ;;  %6467 = vpow2.f32 %v5473_v56  ;;  %v2295_v41 = vpack.c.bf16 %v2251_v1, %v2249_v28  ;;  %v5476_v15 = vmul.f32 -1.442695, %v8359_v50  ;;  %v2253_v53 = vmul.f32 %v6446_v59, %v8287_v27 }
 0x2f6   : > { %v6450_v22 = vpop.eup %6449  ;;  %v2066_v9 = vadd.f32 1.0, %v6448_v51  ;;  %6469 = vpow2.f32 %v5474_v6  ;;  %v2296_v52 = vpack.c.bf16 %v2252_v63, %v2250_v43  ;;  %v5477_v11 = vmul.f32 -1.442695, %v8362_v23 }
 0x2f7   : > { %v6452_v14 = vpop.eup %6451  ;;  %v2067_v10 = vadd.f32 1.0, %v6450_v22  ;;  %6471 = vpow2.f32 %v5475_v30 }
 0x2f8   : > { %v6454_v34 = vpop.eup %6453  ;;  %6473 = vrcp.f32 %v2066_v9  ;;  %v2068_v13 = vadd.f32 1.0, %v6452_v14  ;;  %2635 = vmatprep.mubr.bf16.mxu1 %v2296_v52  ;;  %v1810_v17 = vpop.f32.mrb[88].mxu1 }
 0x2f9   : > { %v6456_v49 = vpop.eup %6455  ;;  %6475 = vrcp.f32 %v2067_v10  ;;  %v2069_v20 = vadd.f32 1.0, %v6454_v34  ;;  %2636 = vmatmul.mubr.bf16.gmra.mrb[132].mxu1 %v2295_v41  ;;  %v8367_v45 = vadd.f32 %v1810_v17, %v8025_v62  ;;  %v1812_v21 = vpop.f32.mrb[89].mxu1 }
 0x2fa   : > { %v6458_v19 = vpop.eup %6457  ;;  %6477 = vrcp.f32 %v2068_v13  ;;  %v8370_v12 = vadd.f32 %v1812_v21, %v8028_v48  ;;  %v1814_v16 = vpop.f32.mrb[90].mxu1  ;;  %v2254_v3 = vmul.f32 %v6456_v49, %v8292_v7 }
 0x2fb   : > { %v6460_v44 = vpop.eup %6459  ;;  %v2255_v61 = vmul.f32 %v6458_v19, %v8297_v54  ;;  %6479 = vrcp.f32 %v2069_v20  ;;  %v5478_v33 = vmul.f32 -1.442695, %v8367_v45  ;;  %v1816_v47 = vpop.f32.mrb[91].mxu1  ;;  %v8379_v26 = vadd.f32 %v1814_v16, %v8025_v62 }
 0x2fc   : > { %v6462_v46 = vpop.eup %6461  ;;  %v2256_v35 = vmul.f32 %v6460_v44, %v8301_v32  ;;  %6481 = vpow2.f32 %v5476_v15  ;;  %v5479_v24 = vmul.f32 -1.442695, %v8370_v12  ;;  %v8382_v56 = vadd.f32 %v1816_v47, %v8028_v48 }
 0x2fd   : > { %v6464_v37 = vpop.eup %6463  ;;  %6483 = vpow2.f32 %v5477_v11  ;;  %v2297_v27 = vpack.c.bf16 %v2255_v61, %v2253_v53  ;;  %v5480_v1 = vmul.f32 -1.442695, %v8379_v26  ;;  %v2257_v10 = vmul.f32 %v6462_v46, %v8307_v5 }
 0x2fe   : > { %v6466_v0 = vpop.eup %6465  ;;  %v2070_v54 = vadd.f32 1.0, %v6464_v37  ;;  %6485 = vpow2.f32 %v5478_v33  ;;  %v2298_v2 = vpack.c.bf16 %v2256_v35, %v2254_v3  ;;  %v5481_v30 = vmul.f32 -1.442695, %v8382_v56 }
 0x2ff   : > { %v6468_v57 = vpop.eup %6467  ;;  %v2071_v7 = vadd.f32 1.0, %v6466_v0  ;;  %6487 = vpow2.f32 %v5479_v24 }
 0x300   : > { %v6470_v32 = vpop.eup %6469  ;;  %6489 = vrcp.f32 %v2070_v54  ;;  %v2072_v28 = vadd.f32 1.0, %v6468_v57  ;;  %2645 = vmatprep.mubr.bf16.mxu1 %v2298_v2  ;;  %v1820_v60 = vpop.f32.mrb[92].mxu1 }
 0x301   : > { %v6472_v31 = vpop.eup %6471  ;;  %6491 = vrcp.f32 %v2071_v7  ;;  %v2073_v43 = vadd.f32 1.0, %v6470_v32  ;;  %2646 = vmatmul.mubr.bf16.gmra.mrb[136].mxu1 %v2297_v27  ;;  %v8386_v6 = vadd.f32 %v1820_v60, %v8025_v62  ;;  %v1822_v8 = vpop.f32.mrb[93].mxu1 }
 0x302   : > { %v6474_v59 = vpop.eup %6473  ;;  %6493 = vrcp.f32 %v2072_v28  ;;  %v2074_v63 = vadd.f32 1.0, %v6472_v31  ;;  %v8390_v51 = vadd.f32 %v1822_v8, %v8028_v48  ;;  %v1824_v41 = vpop.f32.mrb[94].mxu1 }
 0x303   : > { %v6476_v22 = vpop.eup %6475  ;;  %6495 = vrcp.f32 %v2073_v43  ;;  %v5482_v9 = vmul.f32 -1.442695, %v8386_v6  ;;  %v1826_v52 = vpop.f32.mrb[95].mxu1  ;;  %v2258_v17 = vmul.f32 %v6474_v59, %v8314_v29  ;;  %v8399_v20 = vadd.f32 %v1824_v41, %v8025_v62 }
 0x304   : > { %v6478_v14 = vpop.eup %6477  ;;  %v2259_v34 = vmul.f32 %v6476_v22, %v8318_v55  ;;  %6497 = vrcp.f32 %v2074_v63  ;;  %v5483_v13 = vmul.f32 -1.442695, %v8390_v51  ;;  %v8402_v21 = vadd.f32 %v1826_v52, %v8028_v48 }
 0x305   : > { %v6480_v15 = vpop.eup %6479  ;;  %v2260_v49 = vmul.f32 %v6478_v14, %v8321_v18  ;;  %6499 = vpow2.f32 %v5480_v1  ;;  %v5484_v18 = vmul.f32 -1.442695, %v8399_v20 }
 0x306   : > { %v6482_v11 = vpop.eup %6481  ;;  %6501 = vpow2.f32 %v5481_v30  ;;  %v2299_v5 = vpack.c.bf16 %v2259_v34, %v2257_v10  ;;  %v5485_v61 = vmul.f32 -1.442695, %v8402_v21  ;;  %v2261_v47 = vmul.f32 %v6480_v15, %v8327_v39  ;;  %v6204_v15 = vld [vmem:[%s9702_s9 + $0xd4] ss:$8 sps:$4 sm:$0xff]  }
 0x307   : > { %v6484_v19 = vpop.eup %6483  ;;  %v2075_v55 = vadd.f32 1.0, %v6482_v11  ;;  %6503 = vpow2.f32 %v5482_v9  ;;  %v2300_v16 = vpack.c.bf16 %v2260_v49, %v2258_v17  ;;  %v6202_v11 = vld [vmem:[%s9702_s9 + $0xd0] ss:$8 sps:$4 sm:$0xff]  }
 0x308   : > { %v6486_v44 = vpop.eup %6485  ;;  %v2076_v53 = vadd.f32 1.0, %v6484_v19  ;;  %6505 = vpow2.f32 %v5483_v13 }
 0x309   : > { %v6488_v29 = vpop.eup %6487  ;;  %6507 = vrcp.f32 %v2075_v55  ;;  %2655 = vmatprep.mubr.bf16.mxu1 %v2300_v16  ;;  %v2077_v3 = vadd.f32 1.0, %v6486_v44 }
 0x30a   : > { %v6490_v62 = vpop.eup %6489  ;;  %6509 = vrcp.f32 %v2076_v53  ;;  %2656 = vmatmul.mubr.bf16.gmra.mrb[140].mxu1 %v2299_v5  ;;  %v2078_v27 = vadd.f32 1.0, %v6488_v29 }
 0x30b   : > { %v6492_v48 = vpop.eup %6491  ;;  %v2262_v24 = vmul.f32 %v6490_v62, %v8333_v36  ;;  %6511 = vpow2.f32 %v5484_v18  ;;  %v6210_v62 = vld [vmem:[%s9702_s9 + $0xf4] ss:$8 sps:$4 sm:$0xff]  }
 0x30c   : > { %v6494_v33 = vpop.eup %6493  ;;  %v2263_v46 = vmul.f32 %v6492_v48, %v8338_v58  ;;  %6513 = vpow2.f32 %v5485_v61  ;;  %v6208_v48 = vld [vmem:[%s9702_s9 + $0xf0] ss:$8 sps:$4 sm:$0xff]  }
 0x30d   : > { %v6496_v35 = vpop.eup %6495  ;;  %v2264_v37 = vmul.f32 %v6494_v33, %v8341_v25  ;;  %6515 = vrcp.f32 %v2077_v3 }
 0x30e   : > { %v6498_v0 = vpop.eup %6497  ;;  %v2301_v54 = vpack.c.bf16 %v2263_v46, %v2261_v47  ;;  %6517 = vrcp.f32 %v2078_v27  ;;  %v2265_v60 = vmul.f32 %v6496_v35, %v8347_v4  ;;  %v6201_v4 = vld [vmem:[%s9702_s9 + $0xc4] ss:$8 sps:$4 sm:$0xff]  }
 0x30f   : > { %v6500_v2 = vpop.eup %6499  ;;  %v2302_v57 = vpack.c.bf16 %v2264_v37, %v2262_v24  ;;  %v2266_v1 = vmul.f32 %v6498_v0, %v8351_v42  ;;  %v6199_v42 = vld [vmem:[%s9702_s9 + $0xc0] ss:$8 sps:$4 sm:$0xff]   ;;  %3414 = vmatprep.subr.bf16.mxu0 %v6201_v4 }
 0x310   : > { %v6502_v7 = vpop.eup %6501  ;;  %v2079_v32 = vadd.f32 1.0, %v6500_v2  ;;  %3415 = vmatpush1.bf16.msra.mxu0 %v6199_v42 }
 0x311   : > { %v6504_v28 = vpop.eup %6503  ;;  %v2080_v39 = vadd.f32 1.0, %v6502_v7  ;;  %2665 = vmatprep.mubr.bf16.mxu1 %v2302_v57  ;;  %3416 = vmatprep.subr.bf16.mxu0 %v6204_v15 }
 0x312   : > { %v6506_v58 = vpop.eup %6505  ;;  %6519 = vrcp.f32 %v2079_v32  ;;  %2666 = vmatmul.mubr.bf16.gmra.mrb[144].mxu1 %v2301_v54  ;;  %v2081_v43 = vadd.f32 1.0, %v6504_v28 }
 0x313   : > { %v6508_v36 = vpop.eup %6507  ;;  %6521 = vrcp.f32 %v2080_v39  ;;  %v2082_v59 = vadd.f32 1.0, %v6506_v58 }
 0x314   : > { %v6510_v25 = vpop.eup %6509  ;;  %v2267_v31 = vmul.f32 %v6508_v36, %v8359_v50  ;;  %6523 = vrcp.f32 %v2081_v43  ;;  %3417 = vmatpush1.bf16.msra.mxu0 %v6202_v11 }
 0x315   : > { %v2268_v8 = vmul.f32 %v6510_v25, %v8362_v23  ;;  %v6512_v30 = vpop.eup %6511  ;;  %6525 = vrcp.f32 %v2082_v59 }
 0x316   : > { %v2303_v63 = vpack.c.bf16 %v2267_v31, %v2265_v60  ;;  %v6514_v22 = vpop.eup %6513  ;;  %v2083_v9 = vadd.f32 1.0, %v6512_v30 }
 0x317   : > { %v2304_v41 = vpack.c.bf16 %v2268_v8, %v2266_v1  ;;  %v2084_v52 = vadd.f32 1.0, %v6514_v22  ;;  %v6516_v50 = vpop.eup %6515 }
 0x318   : > { %6527 = vrcp.f32 %v2083_v9  ;;  %v6518_v23 = vpop.eup %6517  ;;  %v2269_v34 = vmul.f32 %v6516_v50, %v8367_v45  ;;  %v6207_v45 = vld [vmem:[%s9702_s9 + $0xe4] ss:$8 sps:$4 sm:$0xff]  }
 0x319   : > { %2675 = vmatprep.mubr.bf16.mxu1 %v2304_v41  ;;  %6529 = vrcp.f32 %v2084_v52  ;;  %v2270_v17 = vmul.f32 %v6518_v23, %v8370_v12  ;;  %v6205_v12 = vld [vmem:[%s9702_s9 + $0xe0] ss:$8 sps:$4 sm:$0xff]   ;;  %3418 = vmatprep.subr.bf16.mxu0 %v6207_v45 }
 0x31a   : > { %2676 = vmatmul.mubr.bf16.gmra.mrb[148].mxu1 %v2303_v63  ;;  %3419 = vmatpush1.bf16.msra.mxu0 %v6205_v12 }
 0x31b   : > { %3420 = vmatprep.subr.bf16.mxu0 %v6210_v62 }
 0x31c   : > { %v6520_v14 = vpop.eup %6519 }
 0x31d   : > { %v6522_v10 = vpop.eup %6521  ;;  %v2271_v13 = vmul.f32 %v6520_v14, %v8379_v26 }
 0x31e   : > { %v2272_v49 = vmul.f32 %v6522_v10, %v8382_v56  ;;  %v6524_v26 = vpop.eup %6523  ;;  %3421 = vmatpush1.bf16.msra.mxu0 %v6208_v48 }
 0x31f   : > { %v2305_v5 = vpack.c.bf16 %v2271_v13, %v2269_v34  ;;  %v6526_v55 = vpop.eup %6525  ;;  %v2273_v44 = vmul.f32 %v6524_v26, %v8386_v6  ;;  %v2341_v6 = vld [vmem:[%s9701_s8] sm:$0x3] }
 0x320   : > { %v2306_v19 = vpack.c.bf16 %v2272_v49, %v2270_v17  ;;  %v2274_v29 = vmul.f32 %v6526_v55, %v8390_v51  ;;  %v8450_v51 = vrot.slane %v2341_v6, %v7786_v38 }
 0x322   : > { %2685 = vmatprep.mubr.bf16.mxu1 %v2306_v19  ;;  %v6528_v56 = vpop.eup %6527 }
 0x323   : > { %2686 = vmatmul.mubr.bf16.gmra.mrb[152].mxu1 %v2305_v5  ;;  %v6530_v16 = vpop.eup %6529  ;;  %v2275_v53 = vmul.f32 %v6528_v56, %v8399_v20  ;;  %v8453_v20 = vrot.slane %v2341_v6, %v7790_v40 }
 0x324   : > { %v2276_v18 = vmul.f32 %v6530_v16, %v8402_v21 }
 0x325   : > { %v2307_v61 = vpack.c.bf16 %v2275_v53, %v2273_v44 }
 0x326   : > { %v2308_v33 = vpack.c.bf16 %v2276_v18, %v2274_v29 }
 0x328   : > { %2695 = vmatprep.mubr.bf16.mxu1 %v2308_v33 }
 0x32b   : > { %2696 = vmatmul.mubr.bf16.gmra.mrb[156].mxu1 %v2307_v61 }
 0x380   : > { %v2547_v21 = vpop.f32.mrb[96].mxu1 }
 0x381   : > { %v8456_v47 = vadd.f32 %v2547_v21, %v8450_v51  ;;  %v2549_v46 = vpop.f32.mrb[97].mxu1 }
 0x382   : > { %v8459_v3 = vadd.f32 %v2549_v46, %v8453_v20  ;;  %v2551_v35 = vpop.f32.mrb[98].mxu1 }
 0x383   : > { %v5518_v24 = vmul.f32 -1.442695, %v8456_v47  ;;  %v8463_v37 = vadd.f32 %v2551_v35, %v8450_v51  ;;  %v2553_v27 = vpop.f32.mrb[99].mxu1 }
 0x384   : > { %v5519_v0 = vmul.f32 -1.442695, %v8459_v3  ;;  %v8467_v54 = vadd.f32 %v2553_v27, %v8453_v20 }
 0x385   : > { %6531 = vpow2.f32 %v5518_v24  ;;  %v5520_v2 = vmul.f32 -1.442695, %v8463_v37 }
 0x386   : > { %6533 = vpow2.f32 %v5519_v0  ;;  %v5521_v57 = vmul.f32 -1.442695, %v8467_v54 }
 0x387   : > { %6535 = vpow2.f32 %v5520_v2 }
 0x388   : > { %6537 = vpow2.f32 %v5521_v57  ;;  %v2557_v7 = vpop.f32.mrb[100].mxu1 }
 0x389   : > { %v8472_v32 = vadd.f32 %v2557_v7, %v8450_v51  ;;  %v2559_v28 = vpop.f32.mrb[101].mxu1 }
 0x38a   : > { %v8475_v39 = vadd.f32 %v2559_v28, %v8453_v20  ;;  %v2561_v58 = vpop.f32.mrb[102].mxu1 }
 0x38b   : > { %v5522_v36 = vmul.f32 -1.442695, %v8472_v32  ;;  %v8479_v25 = vadd.f32 %v2561_v58, %v8450_v51  ;;  %v2563_v60 = vpop.f32.mrb[103].mxu1 }
 0x38c   : > { %v5523_v31 = vmul.f32 -1.442695, %v8475_v39  ;;  %v8483_v43 = vadd.f32 %v2563_v60, %v8453_v20 }
 0x38d   : > { %6539 = vpow2.f32 %v5522_v36  ;;  %v5524_v1 = vmul.f32 -1.442695, %v8479_v25 }
 0x38e   : > { %6541 = vpow2.f32 %v5523_v31  ;;  %v5525_v8 = vmul.f32 -1.442695, %v8483_v43 }
 0x38f   : > { %v6532_v59 = vpop.eup %6531  ;;  %6543 = vpow2.f32 %v5524_v1 }
 0x390   : > { %v6534_v63 = vpop.eup %6533  ;;  %v2898_v30 = vadd.f32 1.0, %v6532_v59  ;;  %6545 = vpow2.f32 %v5525_v8 }
 0x391   : > { %v6536_v41 = vpop.eup %6535  ;;  %v2899_v22 = vadd.f32 1.0, %v6534_v63  ;;  %v2567_v9 = vpop.f32.mrb[104].mxu1 }
 0x392   : > { %v6538_v52 = vpop.eup %6537  ;;  %6547 = vrcp.f32 %v2898_v30  ;;  %v2900_v4 = vadd.f32 1.0, %v6536_v41  ;;  %v8488_v50 = vadd.f32 %v2567_v9, %v8450_v51  ;;  %v2569_v42 = vpop.f32.mrb[105].mxu1 }
 0x393   : > { %6549 = vrcp.f32 %v2899_v22  ;;  %v2901_v23 = vadd.f32 1.0, %v6538_v52  ;;  %v8491_v14 = vadd.f32 %v2569_v42, %v8453_v20  ;;  %v2571_v10 = vpop.f32.mrb[106].mxu1  ;;  %v6211_v52 = vld [vmem:[%s9704_s11] ss:$8 sps:$4 sm:$0xff]  }
 0x394   : > { %6551 = vrcp.f32 %v2900_v4  ;;  %v5526_v34 = vmul.f32 -1.442695, %v8488_v50  ;;  %v8495_v13 = vadd.f32 %v2571_v10, %v8450_v51  ;;  %v2573_v15 = vpop.f32.mrb[107].mxu1  ;;  %v6213_v4 = vld [vmem:[%s9704_s11 + $0x4] ss:$8 sps:$4 sm:$0xff]  }
 0x395   : > { %6553 = vrcp.f32 %v2901_v23  ;;  %v5527_v17 = vmul.f32 -1.442695, %v8491_v14  ;;  %v8499_v49 = vadd.f32 %v2573_v15, %v8453_v20  ;;  %4267 = vmatprep.subr.bf16.mxu1 %v6213_v4 }
 0x396   : > { %6555 = vpow2.f32 %v5526_v34  ;;  %v5528_v11 = vmul.f32 -1.442695, %v8495_v13  ;;  %v6216_v34 = vld [vmem:[%s9704_s11 + $0x14] ss:$8 sps:$4 sm:$0xff]   ;;  %4268 = vmatpush1.bf16.msra.mxu1 %v6211_v52 }
 0x397   : > { %v6540_v5 = vpop.eup %6539  ;;  %6557 = vpow2.f32 %v5527_v17  ;;  %v5529_v19 = vmul.f32 -1.442695, %v8499_v49  ;;  %4269 = vmatprep.subr.bf16.mxu1 %v6216_v34 }
 0x398   : > { %v6542_v45 = vpop.eup %6541  ;;  %v2902_v26 = vadd.f32 1.0, %v6540_v5  ;;  %6559 = vpow2.f32 %v5528_v11 }
 0x399   : > { %v6544_v12 = vpop.eup %6543  ;;  %v2903_v55 = vadd.f32 1.0, %v6542_v45  ;;  %6561 = vpow2.f32 %v5529_v19 }
 0x39a   : > { %v6546_v56 = vpop.eup %6545  ;;  %6563 = vrcp.f32 %v2902_v26  ;;  %v2904_v16 = vadd.f32 1.0, %v6544_v12 }
 0x39b   : > { %6565 = vrcp.f32 %v2903_v55  ;;  %v2905_v44 = vadd.f32 1.0, %v6546_v56  ;;  %v2577_v53 = vpop.f32.mrb[108].mxu1 }
 0x39c   : > { %v6548_v29 = vpop.eup %6547  ;;  %6567 = vrcp.f32 %v2904_v16  ;;  %v8504_v18 = vadd.f32 %v2577_v53, %v8450_v51  ;;  %v2579_v62 = vpop.f32.mrb[109].mxu1 }
 0x39d   : > { %v6550_v61 = vpop.eup %6549  ;;  %6569 = vrcp.f32 %v2905_v44  ;;  %v8507_v48 = vadd.f32 %v2579_v62, %v8453_v20  ;;  %v2581_v33 = vpop.f32.mrb[110].mxu1  ;;  %v3090_v27 = vmul.f32 %v6548_v29, %v8456_v47 }
 0x39e   : > { %v6552_v6 = vpop.eup %6551  ;;  %v5530_v21 = vmul.f32 -1.442695, %v8504_v18  ;;  %v8511_v46 = vadd.f32 %v2581_v33, %v8450_v51  ;;  %v2583_v35 = vpop.f32.mrb[111].mxu1  ;;  %v3091_v28 = vmul.f32 %v6550_v61, %v8459_v3 }
 0x39f   : > { %v6554_v24 = vpop.eup %6553  ;;  %v3092_v0 = vmul.f32 %v6552_v6, %v8463_v37  ;;  %v5531_v2 = vmul.f32 -1.442695, %v8507_v48  ;;  %v8517_v57 = vadd.f32 %v2583_v35, %v8453_v20 }
 0x3a0   : > { %v6556_v7 = vpop.eup %6555  ;;  %v3093_v58 = vmul.f32 %v6554_v24, %v8467_v54  ;;  %6571 = vpow2.f32 %v5530_v21  ;;  %v5532_v36 = vmul.f32 -1.442695, %v8511_v46 }
 0x3a1   : > { %v6558_v60 = vpop.eup %6557  ;;  %v3154_v31 = vpack.c.bf16 %v3092_v0, %v3090_v27  ;;  %v2906_v1 = vadd.f32 1.0, %v6556_v7  ;;  %6573 = vpow2.f32 %v5531_v2  ;;  %v5533_v30 = vmul.f32 -1.442695, %v8517_v57  ;;  %v6222_v0 = vld [vmem:[%s9704_s11 + $0x34] ss:$8 sps:$4 sm:$0xff]  }
 0x3a2   : > { %v6560_v47 = vpop.eup %6559  ;;  %v2907_v8 = vadd.f32 1.0, %v6558_v60  ;;  %6575 = vpow2.f32 %v5532_v36  ;;  %v3155_v37 = vpack.c.bf16 %v3093_v58, %v3091_v28 }
 0x3a3   : > { %v6562_v59 = vpop.eup %6561  ;;  %6577 = vrcp.f32 %v2906_v1  ;;  %v2908_v63 = vadd.f32 1.0, %v6560_v47  ;;  %v2587_v41 = vpop.f32.mrb[112].mxu1 }
 0x3a4   : > { %v6564_v3 = vpop.eup %6563  ;;  %6579 = vrcp.f32 %v2907_v8  ;;  %v2909_v54 = vadd.f32 1.0, %v6562_v59  ;;  %v8524_v22 = vadd.f32 %v2587_v41, %v8450_v51  ;;  %v2589_v9 = vpop.f32.mrb[113].mxu1  ;;  %3422 = vmatprep.mubr.bf16.mxu0 %v3155_v37  ;;  %v6220_v59 = vld [vmem:[%s9704_s11 + $0x30] ss:$8 sps:$4 sm:$0xff]  }
 0x3a5   : > { %v6566_v42 = vpop.eup %6565  ;;  %6581 = vrcp.f32 %v2908_v63  ;;  %v8533_v23 = vadd.f32 %v2589_v9, %v8453_v20  ;;  %v2591_v10 = vpop.f32.mrb[114].mxu1  ;;  %3423 = vmatmul.mubr.bf16.vlgmr.msra.gmra.mrb[64].mxu0 %v3154_v31  ;;  %v3094_v17 = vmul.f32 %v6564_v3, %v8472_v32  ;;  %v6214_v32 = vld [vmem:[%s9704_s11 + $0x10] ss:$8 sps:$4 sm:$0xff]  }
 0x3a6   : > { %v6568_v15 = vpop.eup %6567  ;;  %6583 = vrcp.f32 %v2909_v54  ;;  %v5534_v11 = vmul.f32 -1.442695, %v8524_v22  ;;  %v8541_v5 = vadd.f32 %v2591_v10, %v8450_v51  ;;  %v2593_v19 = vpop.f32.mrb[115].mxu1  ;;  %v3095_v56 = vmul.f32 %v6566_v42, %v8475_v39  ;;  %4270 = vmatpush1.bf16.msra.mxu1 %v6214_v32  ;;  %v6225_v54 = vld [vmem:[%s9704_s11 + $0x44] ss:$8 sps:$4 sm:$0xff]  }
 0x3a7   : > { %v6570_v45 = vpop.eup %6569  ;;  %v3096_v26 = vmul.f32 %v6568_v15, %v8479_v25  ;;  %6585 = vpow2.f32 %v5533_v30  ;;  %v5535_v12 = vmul.f32 -1.442695, %v8533_v23  ;;  %v8546_v55 = vadd.f32 %v2593_v19, %v8453_v20  ;;  %v6219_v25 = vld [vmem:[%s9704_s11 + $0x24] ss:$8 sps:$4 sm:$0xff]   ;;  %v6223_v19 = vld [vmem:[%s9704_s11 + $0x40] ss:$8 sps:$4 sm:$0xff]  }
 0x3a8   : > { %v3097_v16 = vmul.f32 %v6570_v45, %v8483_v43  ;;  %6587 = vpow2.f32 %v5534_v11  ;;  %v5536_v44 = vmul.f32 -1.442695, %v8541_v5  ;;  %v6217_v43 = vld [vmem:[%s9704_s11 + $0x20] ss:$8 sps:$4 sm:$0xff]   ;;  %4271 = vmatprep.subr.bf16.mxu1 %v6219_v25 }
 0x3a9   : > { %6589 = vpow2.f32 %v5535_v12  ;;  %v5537_v53 = vmul.f32 -1.442695, %v8546_v55  ;;  %v3156_v29 = vpack.c.bf16 %v3096_v26, %v3094_v17  ;;  %v6228_v12 = vld [vmem:[%s9704_s11 + $0x54] ss:$8 sps:$4 sm:$0xff]  }
 0x3aa   : > { %v6572_v62 = vpop.eup %6571  ;;  %6591 = vpow2.f32 %v5536_v44  ;;  %v3157_v61 = vpack.c.bf16 %v3097_v16, %v3095_v56  ;;  %4272 = vmatpush1.bf16.msra.mxu1 %v6217_v43 }
 0x3ab   : > { %v6574_v33 = vpop.eup %6573  ;;  %v2910_v6 = vadd.f32 1.0, %v6572_v62  ;;  %6593 = vpow2.f32 %v5537_v53  ;;  %v2597_v39 = vpop.f32.mrb[116].mxu1  ;;  %4273 = vmatprep.subr.bf16.mxu1 %v6222_v0 }
 0x3ac   : > { %v6576_v21 = vpop.eup %6575  ;;  %v2911_v35 = vadd.f32 1.0, %v6574_v33  ;;  %v8562_v24 = vadd.f32 %v2597_v39, %v8450_v51  ;;  %v2599_v27 = vpop.f32.mrb[117].mxu1  ;;  %3432 = vmatprep.mubr.bf16.mxu0 %v3157_v61  ;;  %v6226_v39 = vld [vmem:[%s9704_s11 + $0x50] ss:$8 sps:$4 sm:$0xff]  }
 0x3ad   : > { %v6578_v2 = vpop.eup %6577  ;;  %6595 = vrcp.f32 %v2910_v6  ;;  %v2912_v7 = vadd.f32 1.0, %v6576_v21  ;;  %v8568_v28 = vadd.f32 %v2599_v27, %v8453_v20  ;;  %v2601_v58 = vpop.f32.mrb[118].mxu1  ;;  %3433 = vmatmul.mubr.bf16.gmra.mrb[68].mxu0 %v3156_v29 }
 0x3ae   : > { %v6580_v36 = vpop.eup %6579  ;;  %6597 = vrcp.f32 %v2911_v35  ;;  %v5538_v60 = vmul.f32 -1.442695, %v8562_v24  ;;  %v8572_v31 = vadd.f32 %v2601_v58, %v8450_v51  ;;  %v2603_v1 = vpop.f32.mrb[119].mxu1  ;;  %v3098_v30 = vmul.f32 %v6578_v2, %v8488_v50  ;;  %4274 = vmatpush1.bf16.msra.mxu1 %v6220_v59  ;;  %v6231_v35 = vld [vmem:[%s9704_s11 + $0x64] ss:$8 sps:$4 sm:$0xff]  }
 0x3af   : > { %v6582_v47 = vpop.eup %6581  ;;  %6599 = vrcp.f32 %v2912_v7  ;;  %v5539_v8 = vmul.f32 -1.442695, %v8568_v28  ;;  %v8576_v37 = vadd.f32 %v2603_v1, %v8453_v20  ;;  %v3099_v52 = vmul.f32 %v6580_v36, %v8491_v14  ;;  %4275 = vmatprep.subr.bf16.mxu1 %v6225_v54 }
 0x3b0   : > { %v6584_v63 = vpop.eup %6583  ;;  %v3100_v41 = vmul.f32 %v6582_v47, %v8495_v13  ;;  %6601 = vpow2.f32 %v5538_v60  ;;  %v5540_v3 = vmul.f32 -1.442695, %v8572_v31  ;;  %v6229_v47 = vld [vmem:[%s9704_s11 + $0x60] ss:$8 sps:$4 sm:$0xff]  }
 0x3b1   : > { %v6586_v9 = vpop.eup %6585  ;;  %v3101_v4 = vmul.f32 %v6584_v63, %v8499_v49  ;;  %6603 = vpow2.f32 %v5539_v8  ;;  %v5541_v42 = vmul.f32 -1.442695, %v8576_v37 }
 0x3b2   : > { %v6588_v10 = vpop.eup %6587  ;;  %v2913_v50 = vadd.f32 1.0, %v6586_v9  ;;  %6605 = vpow2.f32 %v5540_v3  ;;  %v3158_v13 = vpack.c.bf16 %v3100_v41, %v3098_v30  ;;  %4276 = vmatpush1.bf16.msra.mxu1 %v6223_v19 }
 0x3b3   : > { %v6590_v34 = vpop.eup %6589  ;;  %v2914_v15 = vadd.f32 1.0, %v6588_v10  ;;  %6607 = vpow2.f32 %v5541_v42  ;;  %v2607_v17 = vpop.f32.mrb[120].mxu1  ;;  %v3159_v11 = vpack.c.bf16 %v3101_v4, %v3099_v52  ;;  %4277 = vmatprep.subr.bf16.mxu1 %v6228_v12 }
 0x3b4   : > { %v6592_v14 = vpop.eup %6591  ;;  %6609 = vrcp.f32 %v2913_v50  ;;  %v2915_v49 = vadd.f32 1.0, %v6590_v34  ;;  %v8594_v45 = vadd.f32 %v2607_v17, %v8450_v51  ;;  %v2609_v26 = vpop.f32.mrb[121].mxu1 }
 0x3b5   : > { %v6594_v32 = vpop.eup %6593  ;;  %6611 = vrcp.f32 %v2914_v15  ;;  %v2916_v56 = vadd.f32 1.0, %v6592_v14  ;;  %v8600_v16 = vadd.f32 %v2609_v26, %v8453_v20  ;;  %v2611_v44 = vpop.f32.mrb[122].mxu1  ;;  %3442 = vmatprep.mubr.bf16.mxu0 %v3159_v11  ;;  %v6232_v11 = vld [vmem:[%s9704_s11 + $0x70] ss:$8 sps:$4 sm:$0xff]  }
 0x3b6   : > { %6613 = vrcp.f32 %v2915_v49  ;;  %v2917_v25 = vadd.f32 1.0, %v6594_v32  ;;  %v5542_v53 = vmul.f32 -1.442695, %v8594_v45  ;;  %v8604_v29 = vadd.f32 %v2611_v44, %v8450_v51  ;;  %v2613_v62 = vpop.f32.mrb[123].mxu1  ;;  %3443 = vmatmul.mubr.bf16.gmra.mrb[72].mxu0 %v3158_v13  ;;  %4278 = vmatpush1.bf16.msra.mxu1 %v6226_v39 }
 0x3b7   : > { %v6596_v61 = vpop.eup %6595  ;;  %6615 = vrcp.f32 %v2916_v56  ;;  %v5543_v33 = vmul.f32 -1.442695, %v8600_v16  ;;  %v8608_v6 = vadd.f32 %v2613_v62, %v8453_v20  ;;  %4279 = vmatprep.subr.bf16.mxu1 %v6231_v35 }
 0x3b8   : > { %v6598_v43 = vpop.eup %6597  ;;  %6617 = vrcp.f32 %v2917_v25  ;;  %v5544_v21 = vmul.f32 -1.442695, %v8604_v29  ;;  %v3102_v7 = vmul.f32 %v6596_v61, %v8504_v18  ;;  %v6235_v61 = vld [vmem:[%s9704_s11 + $0x80] ss:$8 sps:$4 sm:$0xff]  }
 0x3b9   : > { %v6600_v27 = vpop.eup %6599  ;;  %6619 = vpow2.f32 %v5542_v53  ;;  %v5545_v0 = vmul.f32 -1.442695, %v8608_v6  ;;  %v3103_v3 = vmul.f32 %v6598_v43, %v8507_v48 }
 0x3ba   : > { %v6602_v2 = vpop.eup %6601  ;;  %v3104_v58 = vmul.f32 %v6600_v27, %v8511_v46  ;;  %6621 = vpow2.f32 %v5543_v33  ;;  %v6234_v46 = vld [vmem:[%s9704_s11 + $0x74] ss:$8 sps:$4 sm:$0xff]   ;;  %4280 = vmatpush1.bf16.msra.mxu1 %v6229_v47 }
 0x3bb   : > { %v6604_v36 = vpop.eup %6603  ;;  %v2918_v60 = vadd.f32 1.0, %v6602_v2  ;;  %6623 = vpow2.f32 %v5544_v21  ;;  %v2617_v1 = vpop.f32.mrb[124].mxu1  ;;  %4281 = vmatprep.subr.bf16.mxu1 %v6234_v46 }
 0x3bc   : > { %v6606_v8 = vpop.eup %6605  ;;  %v2919_v59 = vadd.f32 1.0, %v6604_v36  ;;  %6625 = vpow2.f32 %v5545_v0  ;;  %v8624_v63 = vadd.f32 %v2617_v1, %v8450_v51  ;;  %v2619_v30 = vpop.f32.mrb[125].mxu1  ;;  %v3160_v18 = vpack.c.bf16 %v3104_v58, %v3102_v7 }
 0x3bd   : > { %v6608_v41 = vpop.eup %6607  ;;  %6627 = vrcp.f32 %v2918_v60  ;;  %v2920_v54 = vadd.f32 1.0, %v6606_v8  ;;  %v8631_v9 = vadd.f32 %v2619_v30, %v8453_v20  ;;  %v2621_v52 = vpop.f32.mrb[126].mxu1 }
 0x3be   : > { %v6610_v4 = vpop.eup %6609  ;;  %6629 = vrcp.f32 %v2919_v59  ;;  %v2921_v42 = vadd.f32 1.0, %v6608_v41  ;;  %v5546_v10 = vmul.f32 -1.442695, %v8624_v63  ;;  %v8635_v50 = vadd.f32 %v2621_v52, %v8450_v51  ;;  %v2623_v13 = vpop.f32.mrb[127].mxu1  ;;  %4282 = vmatpush1.bf16.msra.mxu1 %v6232_v11  ;;  %v6238_v59 = vld [vmem:[%s9704_s11 + $0x90] ss:$8 sps:$4 sm:$0xff]  }
 0x3bf   : > { %v6612_v34 = vpop.eup %6611  ;;  %v3105_v15 = vmul.f32 %v6610_v4, %v8517_v57  ;;  %6631 = vrcp.f32 %v2920_v54  ;;  %v5547_v48 = vmul.f32 -1.442695, %v8631_v9  ;;  %v8640_v17 = vadd.f32 %v2623_v13, %v8453_v20  ;;  %v6237_v57 = vld [vmem:[%s9704_s11 + $0x84] ss:$8 sps:$4 sm:$0xff]  }
 0x3c0   : > { %v6614_v19 = vpop.eup %6613  ;;  %6633 = vrcp.f32 %v2921_v42  ;;  %v5548_v14 = vmul.f32 -1.442695, %v8635_v50  ;;  %v3106_v56 = vmul.f32 %v6612_v34, %v8524_v22  ;;  %4283 = vmatprep.subr.bf16.mxu1 %v6237_v57  ;;  %v6243_v41 = vld [vmem:[%s9704_s11 + $0xa4] ss:$8 sps:$4 sm:$0xff]  }
 0x3c1   : > { %v6616_v49 = vpop.eup %6615  ;;  %6635 = vpow2.f32 %v5546_v10  ;;  %v5549_v26 = vmul.f32 -1.442695, %v8640_v17  ;;  %v3161_v12 = vpack.c.bf16 %v3105_v15, %v3103_v3  ;;  %v3107_v53 = vmul.f32 %v6614_v19, %v8533_v23  ;;  %v6240_v23 = vld [vmem:[%s9704_s11 + $0x94] ss:$8 sps:$4 sm:$0xff]  }
 0x3c2   : > { %v6618_v32 = vpop.eup %6617  ;;  %v3108_v44 = vmul.f32 %v6616_v49, %v8541_v5  ;;  %6637 = vpow2.f32 %v5547_v48  ;;  %4284 = vmatpush1.bf16.msra.mxu1 %v6235_v61  ;;  %v6241_v48 = vld [vmem:[%s9704_s11 + $0xa0] ss:$8 sps:$4 sm:$0xff]  }
 0x3c3   : > { %v6620_v25 = vpop.eup %6619  ;;  %v3109_v62 = vmul.f32 %v6618_v32, %v8546_v55  ;;  %6639 = vpow2.f32 %v5548_v14  ;;  %3452 = vmatprep.mubr.bf16.mxu0 %v3161_v12  ;;  %4285 = vmatprep.subr.bf16.mxu1 %v6240_v23  ;;  %v6246_v14 = vld [vmem:[%s9704_s11 + $0xb4] ss:$8 sps:$4 sm:$0xff]  }
 0x3c4   : > { %v6622_v33 = vpop.eup %6621  ;;  %v2922_v39 = vadd.f32 1.0, %v6620_v25  ;;  %6641 = vpow2.f32 %v5549_v26  ;;  %3453 = vmatmul.mubr.bf16.gmra.mrb[76].mxu0 %v3160_v18  ;;  %v2627_v22 = vpop.f32.mrb[128].mxu1  ;;  %v3162_v43 = vpack.c.bf16 %v3108_v44, %v3106_v56 }
 0x3c5   : > { %v6624_v5 = vpop.eup %6623  ;;  %v2923_v55 = vadd.f32 1.0, %v6622_v33  ;;  %v8661_v21 = vadd.f32 %v2627_v22, %v8450_v51  ;;  %v2629_v35 = vpop.f32.mrb[129].mxu1  ;;  %v3163_v27 = vpack.c.bf16 %v3109_v62, %v3107_v53  ;;  %v6244_v33 = vld [vmem:[%s9704_s11 + $0xb0] ss:$8 sps:$4 sm:$0xff]  }
 0x3c6   : > { %v6626_v0 = vpop.eup %6625  ;;  %6643 = vrcp.f32 %v2922_v39  ;;  %v2924_v2 = vadd.f32 1.0, %v6624_v5  ;;  %v8664_v7 = vadd.f32 %v2629_v35, %v8453_v20  ;;  %v2631_v58 = vpop.f32.mrb[130].mxu1  ;;  %4286 = vmatpush1.bf16.msra.mxu1 %v6238_v59 }
 0x3c7   : > { %v6628_v36 = vpop.eup %6627  ;;  %6645 = vrcp.f32 %v2923_v55  ;;  %v2925_v60 = vadd.f32 1.0, %v6626_v0  ;;  %v5550_v1 = vmul.f32 -1.442695, %v8661_v21  ;;  %v8668_v47 = vadd.f32 %v2631_v58, %v8450_v51  ;;  %v2633_v8 = vpop.f32.mrb[131].mxu1  ;;  %3462 = vmatprep.mubr.bf16.mxu0 %v3163_v27  ;;  %4287 = vmatprep.subr.bf16.mxu1 %v6243_v41 }
 0x3c8   : > { %v6630_v30 = vpop.eup %6629  ;;  %6647 = vrcp.f32 %v2924_v2  ;;  %v5551_v18 = vmul.f32 -1.442695, %v8664_v7  ;;  %v8675_v46 = vadd.f32 %v2633_v8, %v8453_v20  ;;  %v3110_v4 = vmul.f32 %v6628_v36, %v8562_v24 }
 0x3c9   : > { %v6632_v3 = vpop.eup %6631  ;;  %6649 = vrcp.f32 %v2925_v60  ;;  %v5552_v54 = vmul.f32 -1.442695, %v8668_v47  ;;  %v3111_v34 = vmul.f32 %v6630_v30, %v8568_v28 }
 0x3ca   : > { %v6634_v52 = vpop.eup %6633  ;;  %v3112_v42 = vmul.f32 %v6632_v3, %v8572_v31  ;;  %6651 = vpow2.f32 %v5550_v1  ;;  %v5553_v10 = vmul.f32 -1.442695, %v8675_v46  ;;  %4288 = vmatpush1.bf16.msra.mxu1 %v6241_v48 }
 0x3cb   : > { %v6636_v13 = vpop.eup %6635  ;;  %v3113_v15 = vmul.f32 %v6634_v52, %v8576_v37  ;;  %6653 = vpow2.f32 %v5551_v18  ;;  %4289 = vmatprep.subr.bf16.mxu1 %v6246_v14 }
 0x3cc   : > { %v6638_v11 = vpop.eup %6637  ;;  %v2926_v19 = vadd.f32 1.0, %v6636_v13  ;;  %6655 = vpow2.f32 %v5552_v54  ;;  %3463 = vmatmul.mubr.bf16.gmra.mrb[80].mxu0 %v3162_v43  ;;  %v2637_v24 = vpop.f32.mrb[132].mxu1  ;;  %v3164_v31 = vpack.c.bf16 %v3112_v42, %v3110_v4 }
 0x3cd   : > { %v6640_v28 = vpop.eup %6639  ;;  %v2927_v57 = vadd.f32 1.0, %v6638_v11  ;;  %6657 = vpow2.f32 %v5553_v10  ;;  %v8693_v37 = vadd.f32 %v2637_v24, %v8450_v51  ;;  %v2639_v49 = vpop.f32.mrb[133].mxu1  ;;  %v3165_v26 = vpack.c.bf16 %v3113_v15, %v3111_v34 }
 0x3ce   : > { %v6642_v12 = vpop.eup %6641  ;;  %6659 = vrcp.f32 %v2926_v19  ;;  %v2928_v32 = vadd.f32 1.0, %v6640_v28  ;;  %v8696_v56 = vadd.f32 %v2639_v49, %v8453_v20  ;;  %v2641_v44 = vpop.f32.mrb[134].mxu1  ;;  %4290 = vmatpush1.bf16.msra.mxu1 %v6244_v33 }
 0x3cf   : > { %6661 = vrcp.f32 %v2927_v57  ;;  %v2929_v25 = vadd.f32 1.0, %v6642_v12  ;;  %v5554_v53 = vmul.f32 -1.442695, %v8693_v37  ;;  %v8700_v62 = vadd.f32 %v2641_v44, %v8450_v51  ;;  %v2643_v61 = vpop.f32.mrb[135].mxu1  ;;  %3472 = vmatprep.mubr.bf16.mxu0 %v3165_v26 }
 0x3d0   : > { %v6644_v39 = vpop.eup %6643  ;;  %6663 = vrcp.f32 %v2928_v32  ;;  %v5555_v22 = vmul.f32 -1.442695, %v8696_v56  ;;  %v8707_v43 = vadd.f32 %v2643_v61, %v8453_v20 }
 0x3d1   : > { %v6646_v23 = vpop.eup %6645  ;;  %6665 = vrcp.f32 %v2929_v25  ;;  %v5556_v5 = vmul.f32 -1.442695, %v8700_v62  ;;  %v3114_v0 = vmul.f32 %v6644_v39, %v8594_v45 }
 0x3d2   : > { %v6648_v55 = vpop.eup %6647  ;;  %6667 = vpow2.f32 %v5554_v53  ;;  %v5557_v35 = vmul.f32 -1.442695, %v8707_v43  ;;  %v3115_v36 = vmul.f32 %v6646_v23, %v8600_v16 }
 0x3d3   : > { %v6650_v27 = vpop.eup %6649  ;;  %v3116_v2 = vmul.f32 %v6648_v55, %v8604_v29  ;;  %6669 = vpow2.f32 %v5555_v22 }
 0x3d4   : > { %v6652_v58 = vpop.eup %6651  ;;  %v3117_v60 = vmul.f32 %v6650_v27, %v8608_v6  ;;  %6671 = vpow2.f32 %v5556_v5  ;;  %3473 = vmatmul.mubr.bf16.gmra.mrb[84].mxu0 %v3164_v31  ;;  %v2647_v1 = vpop.f32.mrb[136].mxu1 }
 0x3d5   : > { %v6654_v8 = vpop.eup %6653  ;;  %v2930_v59 = vadd.f32 1.0, %v6652_v58  ;;  %6673 = vpow2.f32 %v5557_v35  ;;  %v8716_v30 = vadd.f32 %v2647_v1, %v8450_v51  ;;  %v2649_v18 = vpop.f32.mrb[137].mxu1  ;;  %v3166_v45 = vpack.c.bf16 %v3116_v2, %v3114_v0 }
 0x3d6   : > { %v6656_v41 = vpop.eup %6655  ;;  %v2931_v29 = vadd.f32 1.0, %v6654_v8  ;;  %v8719_v3 = vadd.f32 %v2649_v18, %v8453_v20  ;;  %v2651_v54 = vpop.f32.mrb[138].mxu1  ;;  %v3167_v16 = vpack.c.bf16 %v3117_v60, %v3115_v36 }
 0x3d7   : > { %v6658_v52 = vpop.eup %6657  ;;  %6675 = vrcp.f32 %v2930_v59  ;;  %v2932_v6 = vadd.f32 1.0, %v6656_v41  ;;  %v5558_v4 = vmul.f32 -1.442695, %v8716_v30  ;;  %v8723_v42 = vadd.f32 %v2651_v54, %v8450_v51  ;;  %v2653_v10 = vpop.f32.mrb[139].mxu1 }
 0x3d8   : > { %v6660_v13 = vpop.eup %6659  ;;  %6677 = vrcp.f32 %v2931_v29  ;;  %v2933_v34 = vadd.f32 1.0, %v6658_v52  ;;  %v5559_v15 = vmul.f32 -1.442695, %v8719_v3  ;;  %v8727_v48 = vadd.f32 %v2653_v10, %v8453_v20  ;;  %3482 = vmatprep.mubr.bf16.mxu0 %v3167_v16 }
 0x3d9   : > { %v6662_v11 = vpop.eup %6661  ;;  %6679 = vrcp.f32 %v2932_v6  ;;  %v5560_v19 = vmul.f32 -1.442695, %v8723_v42  ;;  %v3118_v28 = vmul.f32 %v6660_v13, %v8624_v63 }
 0x3da   : > { %v6664_v24 = vpop.eup %6663  ;;  %6681 = vrcp.f32 %v2933_v34  ;;  %v5561_v31 = vmul.f32 -1.442695, %v8727_v48  ;;  %v3119_v26 = vmul.f32 %v6662_v11, %v8631_v9 }
 0x3db   : > { %v6666_v14 = vpop.eup %6665  ;;  %v3120_v57 = vmul.f32 %v6664_v24, %v8635_v50  ;;  %6683 = vpow2.f32 %v5558_v4 }
 0x3dc   : > { %v6668_v49 = vpop.eup %6667  ;;  %v3121_v12 = vmul.f32 %v6666_v14, %v8640_v17  ;;  %6685 = vpow2.f32 %v5559_v15  ;;  %3483 = vmatmul.mubr.bf16.gmra.mrb[88].mxu0 %v3166_v45 }
 0x3dd   : > { %v6670_v32 = vpop.eup %6669  ;;  %v2934_v44 = vadd.f32 1.0, %v6668_v49  ;;  %6687 = vpow2.f32 %v5560_v19  ;;  %v2657_v25 = vpop.f32.mrb[140].mxu1  ;;  %v3168_v53 = vpack.c.bf16 %v3120_v57, %v3118_v28 }
 0x3de   : > { %v6672_v61 = vpop.eup %6671  ;;  %v2935_v33 = vadd.f32 1.0, %v6670_v32  ;;  %6689 = vpow2.f32 %v5561_v31  ;;  %v8736_v63 = vadd.f32 %v2657_v25, %v8450_v51  ;;  %v2659_v50 = vpop.f32.mrb[141].mxu1  ;;  %v3169_v39 = vpack.c.bf16 %v3121_v12, %v3119_v26 }
 0x3df   : > { %v6674_v22 = vpop.eup %6673  ;;  %6691 = vrcp.f32 %v2934_v44  ;;  %v2936_v9 = vadd.f32 1.0, %v6672_v61  ;;  %v8739_v17 = vadd.f32 %v2659_v50, %v8453_v20  ;;  %v2661_v23 = vpop.f32.mrb[142].mxu1 }
 0x3e0   : > { %6693 = vrcp.f32 %v2935_v33  ;;  %v2937_v5 = vadd.f32 1.0, %v6674_v22  ;;  %v5562_v55 = vmul.f32 -1.442695, %v8736_v63  ;;  %v8743_v35 = vadd.f32 %v2661_v23, %v8450_v51  ;;  %v2663_v27 = vpop.f32.mrb[143].mxu1  ;;  %3492 = vmatprep.mubr.bf16.mxu0 %v3169_v39 }
 0x3e1   : > { %v6676_v0 = vpop.eup %6675  ;;  %6695 = vrcp.f32 %v2936_v9  ;;  %v5563_v2 = vmul.f32 -1.442695, %v8739_v17  ;;  %v8747_v58 = vadd.f32 %v2663_v27, %v8453_v20 }
 0x3e2   : > { %v6678_v36 = vpop.eup %6677  ;;  %6697 = vrcp.f32 %v2937_v5  ;;  %v5564_v60 = vmul.f32 -1.442695, %v8743_v35  ;;  %v3122_v18 = vmul.f32 %v6676_v0, %v8661_v21 }
 0x3e3   : > { %v6680_v1 = vpop.eup %6679  ;;  %6699 = vpow2.f32 %v5562_v55  ;;  %v5565_v8 = vmul.f32 -1.442695, %v8747_v58  ;;  %v3123_v29 = vmul.f32 %v6678_v36, %v8664_v7 }
 0x3e4   : > { %v6682_v59 = vpop.eup %6681  ;;  %v3124_v45 = vmul.f32 %v6680_v1, %v8668_v47  ;;  %6701 = vpow2.f32 %v5563_v2  ;;  %3493 = vmatmul.mubr.bf16.gmra.mrb[92].mxu0 %v3168_v53 }
 0x3e5   : > { %v6684_v41 = vpop.eup %6683  ;;  %v3125_v54 = vmul.f32 %v6682_v59, %v8675_v46  ;;  %6703 = vpow2.f32 %v5564_v60  ;;  %v2667_v16 = vpop.f32.mrb[144].mxu1 }
 0x3e6   : > { %v6686_v52 = vpop.eup %6685  ;;  %v2938_v6 = vadd.f32 1.0, %v6684_v41  ;;  %6705 = vpow2.f32 %v5565_v8  ;;  %v8756_v4 = vadd.f32 %v2667_v16, %v8450_v51  ;;  %v2669_v10 = vpop.f32.mrb[145].mxu1  ;;  %v3170_v13 = vpack.c.bf16 %v3124_v45, %v3122_v18 }
 0x3e7   : > { %v6688_v21 = vpop.eup %6687  ;;  %v2939_v34 = vadd.f32 1.0, %v6686_v52  ;;  %v8759_v47 = vadd.f32 %v2669_v10, %v8453_v20  ;;  %v2671_v15 = vpop.f32.mrb[146].mxu1  ;;  %v3171_v11 = vpack.c.bf16 %v3125_v54, %v3123_v29 }
 0x3e8   : > { %v6690_v7 = vpop.eup %6689  ;;  %6707 = vrcp.f32 %v2938_v6  ;;  %v2940_v46 = vadd.f32 1.0, %v6688_v21  ;;  %v5566_v19 = vmul.f32 -1.442695, %v8756_v4  ;;  %v8763_v24 = vadd.f32 %v2671_v15, %v8450_v51  ;;  %v2673_v31 = vpop.f32.mrb[147].mxu1 }
 0x3e9   : > { %v6692_v14 = vpop.eup %6691  ;;  %6709 = vrcp.f32 %v2939_v34  ;;  %v2941_v28 = vadd.f32 1.0, %v6690_v7  ;;  %v5567_v57 = vmul.f32 -1.442695, %v8759_v47  ;;  %v8767_v49 = vadd.f32 %v2673_v31, %v8453_v20  ;;  %3502 = vmatprep.mubr.bf16.mxu0 %v3171_v11 }
 0x3ea   : > { %v6694_v26 = vpop.eup %6693  ;;  %6711 = vrcp.f32 %v2940_v46  ;;  %v5568_v12 = vmul.f32 -1.442695, %v8763_v24  ;;  %v3126_v53 = vmul.f32 %v6692_v14, %v8693_v37 }
 0x3eb   : > { %v6696_v32 = vpop.eup %6695  ;;  %6713 = vrcp.f32 %v2941_v28  ;;  %v5569_v44 = vmul.f32 -1.442695, %v8767_v49  ;;  %v3127_v50 = vmul.f32 %v6694_v26, %v8696_v56 }
 0x3ec   : > { %v6698_v25 = vpop.eup %6697  ;;  %v3128_v61 = vmul.f32 %v6696_v32, %v8700_v62  ;;  %6715 = vpow2.f32 %v5566_v19  ;;  %3503 = vmatmul.mubr.bf16.gmra.mrb[96].mxu0 %v3170_v13 }
 0x3ed   : > { %v6700_v33 = vpop.eup %6699  ;;  %v3129_v39 = vmul.f32 %v6698_v25, %v8707_v43  ;;  %6717 = vpow2.f32 %v5567_v57  ;;  %v2677_v22 = vpop.f32.mrb[148].mxu1 }
 0x3ee   : > { %v6702_v9 = vpop.eup %6701  ;;  %v2942_v23 = vadd.f32 1.0, %v6700_v33  ;;  %6719 = vpow2.f32 %v5568_v12  ;;  %v8776_v5 = vadd.f32 %v2677_v22, %v8450_v51  ;;  %v2679_v55 = vpop.f32.mrb[149].mxu1  ;;  %v3172_v27 = vpack.c.bf16 %v3128_v61, %v3126_v53 }
 0x3ef   : > { %v6704_v37 = vpop.eup %6703  ;;  %v2943_v0 = vadd.f32 1.0, %v6702_v9  ;;  %6721 = vpow2.f32 %v5569_v44  ;;  %v8779_v62 = vadd.f32 %v2679_v55, %v8453_v20  ;;  %v2681_v2 = vpop.f32.mrb[150].mxu1  ;;  %v3173_v56 = vpack.c.bf16 %v3129_v39, %v3127_v50 }
 0x3f0   : > { %v6706_v36 = vpop.eup %6705  ;;  %6723 = vrcp.f32 %v2942_v23  ;;  %v2944_v43 = vadd.f32 1.0, %v6704_v37  ;;  %v5570_v60 = vmul.f32 -1.442695, %v8776_v5  ;;  %v8783_v1 = vadd.f32 %v2681_v2, %v8450_v51  ;;  %v2683_v8 = vpop.f32.mrb[151].mxu1 }
 0x3f1   : > { %6725 = vrcp.f32 %v2943_v0  ;;  %v2945_v59 = vadd.f32 1.0, %v6706_v36  ;;  %v5571_v18 = vmul.f32 -1.442695, %v8779_v62  ;;  %v8787_v45 = vadd.f32 %v2683_v8, %v8453_v20  ;;  %3512 = vmatprep.mubr.bf16.mxu0 %v3173_v56 }
 0x3f2   : > { %v6708_v41 = vpop.eup %6707  ;;  %6727 = vrcp.f32 %v2944_v43  ;;  %v5572_v29 = vmul.f32 -1.442695, %v8783_v1 }
 0x3f3   : > { %v6710_v54 = vpop.eup %6709  ;;  %6729 = vrcp.f32 %v2945_v59  ;;  %v5573_v16 = vmul.f32 -1.442695, %v8787_v45  ;;  %v3130_v10 = vmul.f32 %v6708_v41, %v8716_v30 }
 0x3f4   : > { %v6712_v52 = vpop.eup %6711  ;;  %6731 = vpow2.f32 %v5570_v60  ;;  %3513 = vmatmul.mubr.bf16.gmra.mrb[100].mxu0 %v3172_v27  ;;  %v3131_v34 = vmul.f32 %v6710_v54, %v8719_v3 }
 0x3f5   : > { %v6714_v6 = vpop.eup %6713  ;;  %v3132_v13 = vmul.f32 %v6712_v52, %v8723_v42  ;;  %6733 = vpow2.f32 %v5571_v18 }
 0x3f6   : > { %v6716_v21 = vpop.eup %6715  ;;  %v3133_v15 = vmul.f32 %v6714_v6, %v8727_v48  ;;  %6735 = vpow2.f32 %v5572_v29  ;;  %v2687_v11 = vpop.f32.mrb[152].mxu1 }
 0x3f7   : > { %v6718_v7 = vpop.eup %6717  ;;  %v2946_v46 = vadd.f32 1.0, %v6716_v21  ;;  %6737 = vpow2.f32 %v5573_v16  ;;  %v8796_v19 = vadd.f32 %v2687_v11, %v8450_v51  ;;  %v2689_v31 = vpop.f32.mrb[153].mxu1  ;;  %v3174_v14 = vpack.c.bf16 %v3132_v13, %v3130_v10 }
 0x3f8   : > { %v6720_v28 = vpop.eup %6719  ;;  %v2947_v30 = vadd.f32 1.0, %v6718_v7  ;;  %v8799_v42 = vadd.f32 %v2689_v31, %v8453_v20  ;;  %v2691_v57 = vpop.f32.mrb[154].mxu1  ;;  %v3175_v26 = vpack.c.bf16 %v3133_v15, %v3131_v34 }
 0x3f9   : > { %v6722_v3 = vpop.eup %6721  ;;  %6739 = vrcp.f32 %v2946_v46  ;;  %v2948_v48 = vadd.f32 1.0, %v6720_v28  ;;  %v5574_v12 = vmul.f32 -1.442695, %v8796_v19  ;;  %v8803_v32 = vadd.f32 %v2691_v57, %v8450_v51  ;;  %v2693_v44 = vpop.f32.mrb[155].mxu1 }
 0x3fa   : > { %v6724_v25 = vpop.eup %6723  ;;  %6741 = vrcp.f32 %v2947_v30  ;;  %v2949_v53 = vadd.f32 1.0, %v6722_v3  ;;  %v5575_v61 = vmul.f32 -1.442695, %v8799_v42  ;;  %v8807_v33 = vadd.f32 %v2693_v44, %v8453_v20  ;;  %3522 = vmatprep.mubr.bf16.mxu0 %v3175_v26 }
 0x3fb   : > { %v6726_v50 = vpop.eup %6725  ;;  %6743 = vrcp.f32 %v2948_v48  ;;  %v5576_v39 = vmul.f32 -1.442695, %v8803_v32  ;;  %v3134_v55 = vmul.f32 %v6724_v25, %v8736_v63 }
 0x3fc   : > { %v6728_v22 = vpop.eup %6727  ;;  %6745 = vrcp.f32 %v2949_v53  ;;  %v5577_v9 = vmul.f32 -1.442695, %v8807_v33  ;;  %3523 = vmatmul.mubr.bf16.gmra.mrb[104].mxu0 %v3174_v14  ;;  %v3135_v0 = vmul.f32 %v6726_v50, %v8739_v17 }
 0x3fd   : > { %v6730_v23 = vpop.eup %6729  ;;  %v3136_v27 = vmul.f32 %v6728_v22, %v8743_v35  ;;  %6747 = vpow2.f32 %v5574_v12 }
 0x3fe   : > { %v6732_v37 = vpop.eup %6731  ;;  %v3137_v2 = vmul.f32 %v6730_v23, %v8747_v58  ;;  %6749 = vpow2.f32 %v5575_v61  ;;  %v2697_v56 = vpop.f32.mrb[156].mxu1 }
 0x3ff   : > { %v6734_v36 = vpop.eup %6733  ;;  %v2950_v43 = vadd.f32 1.0, %v6732_v37  ;;  %6751 = vpow2.f32 %v5576_v39  ;;  %v8816_v60 = vadd.f32 %v2697_v56, %v8450_v51  ;;  %v2699_v8 = vpop.f32.mrb[157].mxu1  ;;  %v3176_v59 = vpack.c.bf16 %v3136_v27, %v3134_v55 }
 0x400   : > { %v6736_v18 = vpop.eup %6735  ;;  %v2951_v63 = vadd.f32 1.0, %v6734_v36  ;;  %6753 = vpow2.f32 %v5577_v9  ;;  %v8819_v35 = vadd.f32 %v2699_v8, %v8453_v20  ;;  %v2701_v41 = vpop.f32.mrb[158].mxu1  ;;  %v3177_v17 = vpack.c.bf16 %v3137_v2, %v3135_v0 }
 0x401   : > { %v6738_v29 = vpop.eup %6737  ;;  %6755 = vrcp.f32 %v2950_v43  ;;  %v2952_v58 = vadd.f32 1.0, %v6736_v18  ;;  %v5578_v54 = vmul.f32 -1.442695, %v8816_v60  ;;  %v8823_v16 = vadd.f32 %v2701_v41, %v8450_v51  ;;  %v2703_v52 = vpop.f32.mrb[159].mxu1  ;;  %v6252_v41 = vld [vmem:[%s9704_s11 + $0xd4] ss:$8 sps:$4 sm:$0xff]  }
 0x402   : > { %6757 = vrcp.f32 %v2951_v63  ;;  %v2953_v6 = vadd.f32 1.0, %v6738_v29  ;;  %v5579_v10 = vmul.f32 -1.442695, %v8819_v35  ;;  %v8827_v13 = vadd.f32 %v2703_v52, %v8453_v20  ;;  %3532 = vmatprep.mubr.bf16.mxu0 %v3177_v17 }
 0x403   : > { %v6740_v21 = vpop.eup %6739  ;;  %6759 = vrcp.f32 %v2952_v58  ;;  %v5580_v34 = vmul.f32 -1.442695, %v8823_v16  ;;  %v6250_v58 = vld [vmem:[%s9704_s11 + $0xd0] ss:$8 sps:$4 sm:$0xff]  }
 0x404   : > { %v6742_v15 = vpop.eup %6741  ;;  %6761 = vrcp.f32 %v2953_v6  ;;  %v5581_v11 = vmul.f32 -1.442695, %v8827_v13  ;;  %3533 = vmatmul.mubr.bf16.gmra.mrb[108].mxu0 %v3176_v59  ;;  %v3138_v46 = vmul.f32 %v6740_v21, %v8756_v4 }
 0x405   : > { %v6744_v51 = vpop.eup %6743  ;;  %6763 = vpow2.f32 %v5578_v54  ;;  %v3139_v14 = vmul.f32 %v6742_v15, %v8759_v47 }
 0x406   : > { %v6746_v7 = vpop.eup %6745  ;;  %v3140_v31 = vmul.f32 %v6744_v51, %v8763_v24  ;;  %6765 = vpow2.f32 %v5579_v10 }
 0x407   : > { %v6748_v20 = vpop.eup %6747  ;;  %v3141_v28 = vmul.f32 %v6746_v7, %v8767_v49  ;;  %6767 = vpow2.f32 %v5580_v34  ;;  %v6258_v7 = vld [vmem:[%s9704_s11 + $0xf4] ss:$8 sps:$4 sm:$0xff]  }
 0x408   : > { %v6750_v30 = vpop.eup %6749  ;;  %v2954_v57 = vadd.f32 1.0, %v6748_v20  ;;  %6769 = vpow2.f32 %v5581_v11  ;;  %v3178_v26 = vpack.c.bf16 %v3140_v31, %v3138_v46  ;;  %v6256_v31 = vld [vmem:[%s9704_s11 + $0xf0] ss:$8 sps:$4 sm:$0xff]  }
 0x409   : > { %v6752_v3 = vpop.eup %6751  ;;  %v2955_v48 = vadd.f32 1.0, %v6750_v30  ;;  %v3179_v12 = vpack.c.bf16 %v3141_v28, %v3139_v14 }
 0x40a   : > { %v6754_v44 = vpop.eup %6753  ;;  %6771 = vrcp.f32 %v2954_v57  ;;  %v2956_v25 = vadd.f32 1.0, %v6752_v3 }
 0x40b   : > { %v6756_v4 = vpop.eup %6755  ;;  %6773 = vrcp.f32 %v2955_v48  ;;  %v2957_v24 = vadd.f32 1.0, %v6754_v44  ;;  %3542 = vmatprep.mubr.bf16.mxu0 %v3179_v12 }
 0x40c   : > { %v6758_v53 = vpop.eup %6757  ;;  %6775 = vrcp.f32 %v2956_v25  ;;  %3543 = vmatmul.mubr.bf16.gmra.mrb[112].mxu0 %v3178_v26  ;;  %v3142_v61 = vmul.f32 %v6756_v4, %v8776_v5  ;;  %v6249_v5 = vld [vmem:[%s9704_s11 + $0xc4] ss:$8 sps:$4 sm:$0xff]  }
 0x40d   : > { %v6760_v47 = vpop.eup %6759  ;;  %6777 = vrcp.f32 %v2957_v24  ;;  %v3143_v22 = vmul.f32 %v6758_v53, %v8779_v62  ;;  %v6247_v62 = vld [vmem:[%s9704_s11 + $0xc0] ss:$8 sps:$4 sm:$0xff]   ;;  %4291 = vmatprep.subr.bf16.mxu1 %v6249_v5 }
 0x40e   : > { %v6762_v49 = vpop.eup %6761  ;;  %v3144_v50 = vmul.f32 %v6760_v47, %v8783_v1  ;;  %4292 = vmatpush1.bf16.msra.mxu1 %v6247_v62 }
 0x40f   : > { %v6764_v39 = vpop.eup %6763  ;;  %v3145_v9 = vmul.f32 %v6762_v49, %v8787_v45  ;;  %4293 = vmatprep.subr.bf16.mxu1 %v6252_v41 }
 0x410   : > { %v6766_v23 = vpop.eup %6765  ;;  %v2958_v55 = vadd.f32 1.0, %v6764_v39  ;;  %v3180_v27 = vpack.c.bf16 %v3144_v50, %v3142_v61 }
 0x411   : > { %v6768_v37 = vpop.eup %6767  ;;  %v2959_v0 = vadd.f32 1.0, %v6766_v23  ;;  %v3181_v2 = vpack.c.bf16 %v3145_v9, %v3143_v22 }
 0x412   : > { %v6770_v56 = vpop.eup %6769  ;;  %6779 = vrcp.f32 %v2958_v55  ;;  %v2960_v36 = vadd.f32 1.0, %v6768_v37  ;;  %4294 = vmatpush1.bf16.msra.mxu1 %v6250_v58 }
 0x413   : > { %6781 = vrcp.f32 %v2959_v0  ;;  %v2961_v43 = vadd.f32 1.0, %v6770_v56  ;;  %3552 = vmatprep.mubr.bf16.mxu0 %v3181_v2 }
 0x414   : > { %v6772_v1 = vpop.eup %6771  ;;  %6783 = vrcp.f32 %v2960_v36  ;;  %3553 = vmatmul.mubr.bf16.gmra.mrb[116].mxu0 %v3180_v27 }
 0x415   : > { %v6774_v45 = vpop.eup %6773  ;;  %6785 = vrcp.f32 %v2961_v43  ;;  %v3146_v18 = vmul.f32 %v6772_v1, %v8796_v19  ;;  %v6255_v19 = vld [vmem:[%s9704_s11 + $0xe4] ss:$8 sps:$4 sm:$0xff]  }
 0x416   : > { %v6776_v8 = vpop.eup %6775  ;;  %v3147_v17 = vmul.f32 %v6774_v45, %v8799_v42  ;;  %v6253_v42 = vld [vmem:[%s9704_s11 + $0xe0] ss:$8 sps:$4 sm:$0xff]   ;;  %4295 = vmatprep.subr.bf16.mxu1 %v6255_v19 }
 0x417   : > { %v6778_v59 = vpop.eup %6777  ;;  %v3148_v63 = vmul.f32 %v6776_v8, %v8803_v32  ;;  %4296 = vmatpush1.bf16.msra.mxu1 %v6253_v42 }
 0x418   : > { %v3149_v29 = vmul.f32 %v6778_v59, %v8807_v33  ;;  %4297 = vmatprep.subr.bf16.mxu1 %v6258_v7 }
 0x419   : > { %v3182_v54 = vpack.c.bf16 %v3148_v63, %v3146_v18 }
 0x41a   : > { %v3183_v52 = vpack.c.bf16 %v3149_v29, %v3147_v17 }
 0x41b   : > { %4298 = vmatpush1.bf16.msra.mxu1 %v6256_v31 }
 0x41c   : > { %v6780_v32 = vpop.eup %6779  ;;  %3562 = vmatprep.mubr.bf16.mxu0 %v3183_v52 }
 0x41d   : > { %v6782_v6 = vpop.eup %6781  ;;  %3563 = vmatmul.mubr.bf16.gmra.mrb[120].mxu0 %v3182_v54  ;;  %v3150_v21 = vmul.f32 %v6780_v32, %v8816_v60  ;;  %v3218_v60 = vld [vmem:[%s9703_s10] sm:$0x3] }
 0x41e   : > { %v6784_v33 = vpop.eup %6783  ;;  %v3151_v15 = vmul.f32 %v6782_v6, %v8819_v35  ;;  %v8875_v35 = vrot.slane %v3218_v60, %v7786_v38 }
 0x41f   : > { %v6786_v10 = vpop.eup %6785  ;;  %v3152_v34 = vmul.f32 %v6784_v33, %v8823_v16  ;;  %v8878_v16 = vrot.slane %v3218_v60, %v7790_v40 }
 0x420   : > { %v3153_v11 = vmul.f32 %v6786_v10, %v8827_v13 }
 0x421   : > { %v3184_v51 = vpack.c.bf16 %v3152_v34, %v3150_v21 }
 0x422   : > { %v3185_v46 = vpack.c.bf16 %v3153_v11, %v3151_v15 }
 0x424   : > { %3572 = vmatprep.mubr.bf16.mxu0 %v3185_v46 }
 0x425   : > { %3573 = vmatmul.mubr.bf16.gmra.mrb[124].mxu0 %v3184_v51 }
 0x478   : > { %v3424_v13 = vpop.f32.mrb[64].mxu0 }
 0x479   : > { %v8881_v20 = vadd.f32 %v3424_v13, %v8875_v35  ;;  %v3426_v14 = vpop.f32.mrb[65].mxu0 }
 0x47a   : > { %v8884_v28 = vadd.f32 %v3426_v14, %v8878_v16  ;;  %v3428_v30 = vpop.f32.mrb[66].mxu0 }
 0x47b   : > { %v5614_v57 = vmul.f32 -1.442695, %v8881_v20  ;;  %v8888_v26 = vadd.f32 %v3428_v30, %v8875_v35  ;;  %v3430_v3 = vpop.f32.mrb[67].mxu0 }
 0x47c   : > { %v5615_v48 = vmul.f32 -1.442695, %v8884_v28  ;;  %v8892_v12 = vadd.f32 %v3430_v3, %v8878_v16 }
 0x47d   : > { %6787 = vpow2.f32 %v5614_v57  ;;  %v5616_v44 = vmul.f32 -1.442695, %v8888_v26 }
 0x47e   : > { %6789 = vpow2.f32 %v5615_v48  ;;  %v5617_v25 = vmul.f32 -1.442695, %v8892_v12 }
 0x47f   : > { %6791 = vpow2.f32 %v5616_v44 }
 0x480   : > { %6793 = vpow2.f32 %v5617_v25  ;;  %v3434_v4 = vpop.f32.mrb[68].mxu0 }
 0x481   : > { %v8897_v24 = vadd.f32 %v3434_v4, %v8875_v35  ;;  %v3436_v53 = vpop.f32.mrb[69].mxu0 }
 0x482   : > { %v8900_v47 = vadd.f32 %v3436_v53, %v8878_v16  ;;  %v3438_v49 = vpop.f32.mrb[70].mxu0 }
 0x483   : > { %v5618_v61 = vmul.f32 -1.442695, %v8897_v24  ;;  %v8904_v50 = vadd.f32 %v3438_v49, %v8875_v35  ;;  %v3440_v39 = vpop.f32.mrb[71].mxu0 }
 0x484   : > { %v5619_v22 = vmul.f32 -1.442695, %v8900_v47  ;;  %v8908_v9 = vadd.f32 %v3440_v39, %v8878_v16 }
 0x485   : > { %6795 = vpow2.f32 %v5618_v61  ;;  %v5620_v23 = vmul.f32 -1.442695, %v8904_v50 }
 0x486   : > { %6797 = vpow2.f32 %v5619_v22  ;;  %v5621_v55 = vmul.f32 -1.442695, %v8908_v9 }
 0x487   : > { %v6788_v27 = vpop.eup %6787  ;;  %6799 = vpow2.f32 %v5620_v23 }
 0x488   : > { %v6790_v37 = vpop.eup %6789  ;;  %v3775_v0 = vadd.f32 1.0, %v6788_v27  ;;  %6801 = vpow2.f32 %v5621_v55 }
 0x489   : > { %v6792_v2 = vpop.eup %6791  ;;  %v3776_v56 = vadd.f32 1.0, %v6790_v37  ;;  %v3444_v36 = vpop.f32.mrb[72].mxu0 }
 0x48a   : > { %v6794_v43 = vpop.eup %6793  ;;  %6803 = vrcp.f32 %v3775_v0  ;;  %v3777_v5 = vadd.f32 1.0, %v6792_v2  ;;  %v8913_v1 = vadd.f32 %v3444_v36, %v8875_v35  ;;  %v3446_v62 = vpop.f32.mrb[73].mxu0 }
 0x48b   : > { %6805 = vrcp.f32 %v3776_v56  ;;  %v3778_v45 = vadd.f32 1.0, %v6794_v43  ;;  %v8916_v8 = vadd.f32 %v3446_v62, %v8878_v16  ;;  %v3448_v59 = vpop.f32.mrb[74].mxu0 }
 0x48c   : > { %6807 = vrcp.f32 %v3777_v5  ;;  %v5622_v18 = vmul.f32 -1.442695, %v8913_v1  ;;  %v8920_v63 = vadd.f32 %v3448_v59, %v8875_v35  ;;  %v3450_v41 = vpop.f32.mrb[75].mxu0 }
 0x48d   : > { %6809 = vrcp.f32 %v3778_v45  ;;  %v5623_v17 = vmul.f32 -1.442695, %v8916_v8  ;;  %v8924_v29 = vadd.f32 %v3450_v41, %v8878_v16 }
 0x48e   : > { %6811 = vpow2.f32 %v5622_v18  ;;  %v5624_v58 = vmul.f32 -1.442695, %v8920_v63 }
 0x48f   : > { %v6796_v54 = vpop.eup %6795  ;;  %6813 = vpow2.f32 %v5623_v17  ;;  %v5625_v52 = vmul.f32 -1.442695, %v8924_v29 }
 0x490   : > { %v6798_v19 = vpop.eup %6797  ;;  %v3779_v32 = vadd.f32 1.0, %v6796_v54  ;;  %6815 = vpow2.f32 %v5624_v58 }
 0x491   : > { %v6800_v42 = vpop.eup %6799  ;;  %v3780_v6 = vadd.f32 1.0, %v6798_v19  ;;  %6817 = vpow2.f32 %v5625_v52 }
 0x492   : > { %v6802_v33 = vpop.eup %6801  ;;  %6819 = vrcp.f32 %v3779_v32  ;;  %v3781_v10 = vadd.f32 1.0, %v6800_v42 }
 0x493   : > { %6821 = vrcp.f32 %v3780_v6  ;;  %v3782_v21 = vadd.f32 1.0, %v6802_v33 }
 0x494   : > { %v6804_v34 = vpop.eup %6803  ;;  %6823 = vrcp.f32 %v3781_v10 }
 0x495   : > { %v6806_v15 = vpop.eup %6805  ;;  %6825 = vrcp.f32 %v3782_v21  ;;  %v3967_v7 = vmul.f32 %v6804_v34, %v8881_v20 }
 0x496   : > { %v6808_v11 = vpop.eup %6807  ;;  %v3968_v13 = vmul.f32 %v6806_v15, %v8884_v28  ;;  %v6260_v15 = vld [vmem:[%s9706_s13] sm:$0xff]  }
 0x497   : > { %v6810_v51 = vpop.eup %6809  ;;  %v3969_v46 = vmul.f32 %v6808_v11, %v8888_v26  ;;  %v3454_v31 = vpop.f32.mrb[76].mxu0  ;;  %v6261_v11 = vld [vmem:[%s9706_s13 + $0x48] sm:$0xff]  }
 0x498   : > { %v6812_v60 = vpop.eup %6811  ;;  %v3970_v14 = vmul.f32 %v6810_v51, %v8892_v12  ;;  %v8933_v30 = vadd.f32 %v3454_v31, %v8875_v35  ;;  %v3456_v57 = vpop.f32.mrb[77].mxu0 }
 0x499   : > { %v6814_v3 = vpop.eup %6813  ;;  %v4031_v48 = vpack.c.bf16 %v3969_v46, %v3967_v7  ;;  %v3783_v44 = vadd.f32 1.0, %v6812_v60  ;;  %v8936_v25 = vadd.f32 %v3456_v57, %v8878_v16  ;;  %v3458_v4 = vpop.f32.mrb[78].mxu0 }
 0x49a   : > { %v6816_v20 = vpop.eup %6815  ;;  %v3784_v53 = vadd.f32 1.0, %v6814_v3  ;;  %v8939_v26 = vadd.f32 %v3458_v4, %v8875_v35  ;;  %v3460_v49 = vpop.f32.mrb[79].mxu0  ;;  %v4032_v28 = vpack.c.bf16 %v3970_v14, %v3968_v13  ;;  %v5626_v39 = vmul.f32 -1.442695, %v8933_v30 }
 0x49b   : > { %v6818_v61 = vpop.eup %6817  ;;  %6827 = vrcp.f32 %v3783_v44  ;;  %v3785_v12 = vadd.f32 1.0, %v6816_v20  ;;  %v8943_v22 = vadd.f32 %v3460_v49, %v8878_v16  ;;  %v5627_v27 = vmul.f32 -1.442695, %v8936_v25 }
 0x49c   : > { %v6820_v23 = vpop.eup %6819  ;;  %6829 = vrcp.f32 %v3784_v53  ;;  %v3786_v55 = vadd.f32 1.0, %v6818_v61  ;;  %4299 = vmatprep.mubr.bf16.mxu1 %v4032_v28  ;;  %v5628_v0 = vmul.f32 -1.442695, %v8939_v26 }
 0x49d   : > { %v6822_v37 = vpop.eup %6821  ;;  %6831 = vrcp.f32 %v3785_v12  ;;  %4300 = vmatmul.mubr.bf16.vlgmr.msra.gmra.mrb[160].mxu1 %v4031_v48  ;;  %v5629_v56 = vmul.f32 -1.442695, %v8943_v22  ;;  %v3971_v43 = vmul.f32 %v6820_v23, %v8897_v24  ;;  %v6262_v48 = vld [vmem:[%s9706_s13 + $0x8] sm:$0xff]   ;;  %v6264_v23 = vld [vmem:[%s9706_s13 + $0x10] sm:$0xff]  }
 0x49e   : > { %v6824_v2 = vpop.eup %6823  ;;  %6833 = vrcp.f32 %v3786_v55  ;;  %v3972_v45 = vmul.f32 %v6822_v37, %v8900_v47  ;;  %v6265_v37 = vld [vmem:[%s9706_s13 + $0x58] sm:$0xff]  }
 0x49f   : > { %v6826_v36 = vpop.eup %6825  ;;  %v3973_v5 = vmul.f32 %v6824_v2, %v8904_v50  ;;  %6835 = vpow2.f32 %v5626_v39  ;;  %v3464_v62 = vpop.f32.mrb[80].mxu0 }
 0x4a0   : > { %v3974_v59 = vmul.f32 %v6826_v36, %v8908_v9  ;;  %6837 = vpow2.f32 %v5627_v27  ;;  %v8953_v18 = vadd.f32 %v3464_v62, %v8875_v35  ;;  %v3466_v41 = vpop.f32.mrb[81].mxu0  ;;  %v6259_v9 = vld [vmem:[%s9706_s13 + $0x40] sm:$0xff]  }
 0x4a1   : > { %6839 = vpow2.f32 %v5628_v0  ;;  %v8956_v17 = vadd.f32 %v3466_v41, %v8878_v16  ;;  %v3468_v58 = vpop.f32.mrb[82].mxu0  ;;  %v4033_v54 = vpack.c.bf16 %v3973_v5, %v3971_v43  ;;  %5793 = vmatprep.subr.bf16.mxu0 %v6259_v9 }
 0x4a2   : > { %6841 = vpow2.f32 %v5629_v56  ;;  %v5630_v24 = vmul.f32 -1.442695, %v8953_v18  ;;  %v8960_v50 = vadd.f32 %v3468_v58, %v8875_v35  ;;  %v3470_v47 = vpop.f32.mrb[83].mxu0  ;;  %v4034_v52 = vpack.c.bf16 %v3974_v59, %v3972_v45  ;;  %5794 = vmatpush3.bf16.msra.mxu0 %v6260_v15  ;;  %v6268_v15 = vld [vmem:[%s9706_s13 + $0x20] sm:$0xff]  }
 0x4a3   : > { %v5631_v19 = vmul.f32 -1.442695, %v8956_v17  ;;  %v8967_v32 = vadd.f32 %v3470_v47, %v8878_v16  ;;  %5795 = vmatprep.subr.bf16.mxu0 %v6261_v11  ;;  %v6266_v47 = vld [vmem:[%s9706_s13 + $0x18] sm:$0xff]  }
 0x4a4   : > { %6843 = vpow2.f32 %v5630_v24  ;;  %v5632_v42 = vmul.f32 -1.442695, %v8960_v50  ;;  %4309 = vmatprep.mubr.bf16.mxu1 %v4034_v52 }
 0x4a5   : > { %v6828_v6 = vpop.eup %6827  ;;  %6845 = vpow2.f32 %v5631_v19  ;;  %v5633_v33 = vmul.f32 -1.442695, %v8967_v32  ;;  %4310 = vmatmul.mubr.bf16.gmra.mrb[164].mxu1 %v4033_v54 }
 0x4a6   : > { %v6830_v10 = vpop.eup %6829  ;;  %6847 = vpow2.f32 %v5632_v42  ;;  %v3975_v7 = vmul.f32 %v6828_v6, %v8913_v1  ;;  %5796 = vmatpush3.bf16.msra.mxu0 %v6262_v48  ;;  %v6267_v6 = vld [vmem:[%s9706_s13 + $0x60] sm:$0xff]  }
 0x4a7   : > { %v6832_v21 = vpop.eup %6831  ;;  %6849 = vpow2.f32 %v5633_v33  ;;  %v3474_v34 = vpop.f32.mrb[84].mxu0  ;;  %v3976_v14 = vmul.f32 %v6830_v10, %v8916_v8 }
 0x4a8   : > { %v6834_v51 = vpop.eup %6833  ;;  %v3977_v46 = vmul.f32 %v6832_v21, %v8920_v63  ;;  %v8980_v31 = vadd.f32 %v3474_v34, %v8875_v35  ;;  %v3476_v60 = vpop.f32.mrb[85].mxu0  ;;  %v6263_v63 = vld [vmem:[%s9706_s13 + $0x50] sm:$0xff]  }
 0x4a9   : > { %v6836_v13 = vpop.eup %6835  ;;  %v3978_v57 = vmul.f32 %v6834_v51, %v8924_v29  ;;  %v3478_v3 = vpop.f32.mrb[86].mxu0  ;;  %v8992_v39 = vadd.f32 %v3476_v60, %v8878_v16  ;;  %5797 = vmatprep.subr.bf16.mxu0 %v6263_v63 }
 0x4aa   : > { %v6838_v44 = vpop.eup %6837  ;;  %v3787_v4 = vadd.f32 1.0, %v6836_v13  ;;  %v3480_v1 = vpop.f32.mrb[87].mxu0  ;;  %v4035_v20 = vpack.c.bf16 %v3977_v46, %v3975_v7  ;;  %v5634_v61 = vmul.f32 -1.442695, %v8980_v31  ;;  %v8998_v27 = vadd.f32 %v3478_v3, %v8875_v35  ;;  %5798 = vmatpush3.bf16.msra.mxu0 %v6264_v23  ;;  %v6269_v7 = vld [vmem:[%s9706_s13 + $0x68] sm:$0xff]  }
 0x4ab   : > { %v6840_v53 = vpop.eup %6839  ;;  %v3788_v49 = vadd.f32 1.0, %v6838_v44  ;;  %v4036_v8 = vpack.c.bf16 %v3978_v57, %v3976_v14  ;;  %v9004_v56 = vadd.f32 %v3480_v1, %v8878_v16  ;;  %v5635_v58 = vmul.f32 -1.442695, %v8992_v39  ;;  %5799 = vmatprep.subr.bf16.mxu0 %v6265_v37 }
 0x4ac   : > { %v6842_v28 = vpop.eup %6841  ;;  %6851 = vrcp.f32 %v3787_v4  ;;  %v3789_v29 = vadd.f32 1.0, %v6840_v53  ;;  %v5636_v9 = vmul.f32 -1.442695, %v8998_v27 }
 0x4ad   : > { %6853 = vrcp.f32 %v3788_v49  ;;  %v3790_v12 = vadd.f32 1.0, %v6842_v28  ;;  %4319 = vmatprep.mubr.bf16.mxu1 %v4036_v8  ;;  %v5637_v33 = vmul.f32 -1.442695, %v9004_v56 }
 0x4ae   : > { %v6844_v55 = vpop.eup %6843  ;;  %6855 = vrcp.f32 %v3789_v29  ;;  %4320 = vmatmul.mubr.bf16.gmra.mrb[168].mxu1 %v4035_v20  ;;  %5800 = vmatpush3.bf16.msra.mxu0 %v6266_v47 }
 0x4af   : > { %v6846_v0 = vpop.eup %6845  ;;  %6857 = vrcp.f32 %v3790_v12  ;;  %v3791_v2 = vadd.f32 1.0, %v6844_v55  ;;  %v3484_v36 = vpop.f32.mrb[88].mxu0  ;;  %5801 = vmatprep.subr.bf16.mxu0 %v6267_v6 }
 0x4b0   : > { %v6848_v43 = vpop.eup %6847  ;;  %v3792_v5 = vadd.f32 1.0, %v6846_v0  ;;  %6859 = vpow2.f32 %v5634_v61  ;;  %v9007_v62 = vadd.f32 %v3484_v36, %v8875_v35  ;;  %v3486_v45 = vpop.f32.mrb[89].mxu0 }
 0x4b1   : > { %v6850_v59 = vpop.eup %6849  ;;  %6861 = vrcp.f32 %v3791_v2  ;;  %v3793_v41 = vadd.f32 1.0, %v6848_v43  ;;  %v9011_v54 = vadd.f32 %v3486_v45, %v8878_v16  ;;  %v3488_v24 = vpop.f32.mrb[90].mxu0 }
 0x4b2   : > { %6863 = vrcp.f32 %v3792_v5  ;;  %v3794_v52 = vadd.f32 1.0, %v6850_v59  ;;  %v9018_v19 = vadd.f32 %v3488_v24, %v8875_v35  ;;  %v3490_v42 = vpop.f32.mrb[91].mxu0  ;;  %v5638_v21 = vmul.f32 -1.442695, %v9007_v62  ;;  %5802 = vmatpush3.bf16.msra.mxu0 %v6268_v15 }
 0x4b3   : > { %6865 = vrcp.f32 %v3793_v41  ;;  %v9025_v10 = vadd.f32 %v3490_v42, %v8878_v16  ;;  %v5639_v34 = vmul.f32 -1.442695, %v9011_v54  ;;  %5803 = vmatprep.subr.bf16.mxu0 %v6269_v7 }
 0x4b4   : > { %6867 = vrcp.f32 %v3794_v52  ;;  %v5640_v51 = vmul.f32 -1.442695, %v9018_v19 }
 0x4b5   : > { %6869 = vpow2.f32 %v5635_v58  ;;  %v5641_v60 = vmul.f32 -1.442695, %v9025_v10 }
 0x4b6   : > { %v6852_v11 = vpop.eup %6851  ;;  %6871 = vpow2.f32 %v5636_v9 }
 0x4b7   : > { %v6854_v46 = vpop.eup %6853  ;;  %6873 = vpow2.f32 %v5637_v33  ;;  %v3494_v13 = vpop.f32.mrb[92].mxu0  ;;  %v3979_v57 = vmul.f32 %v6852_v11, %v8933_v30  ;;  %v6270_v30 = vld [vmem:[%s9706_s13 + $0x28] sm:$0xff]  }
 0x4b8   : > { %v6856_v14 = vpop.eup %6855  ;;  %6875 = vpow2.f32 %v5638_v21  ;;  %v9039_v3 = vadd.f32 %v3494_v13, %v8875_v35  ;;  %v3496_v48 = vpop.f32.mrb[93].mxu0  ;;  %v3980_v4 = vmul.f32 %v6854_v46, %v8936_v25  ;;  %5804 = vmatpush3.bf16.msra.mxu0 %v6270_v30 }
 0x4b9   : > { %v6858_v44 = vpop.eup %6857  ;;  %v3981_v1 = vmul.f32 %v6856_v14, %v8939_v26  ;;  %6877 = vpow2.f32 %v5639_v34  ;;  %v9044_v20 = vadd.f32 %v3496_v48, %v8878_v16  ;;  %v3498_v63 = vpop.f32.mrb[94].mxu0 }
 0x4ba   : > { %v6860_v53 = vpop.eup %6859  ;;  %v3982_v49 = vmul.f32 %v6858_v44, %v8943_v22  ;;  %6879 = vpow2.f32 %v5640_v51  ;;  %v5642_v8 = vmul.f32 -1.442695, %v9039_v3  ;;  %v9052_v25 = vadd.f32 %v3498_v63, %v8875_v35  ;;  %v3500_v26 = vpop.f32.mrb[95].mxu0 }
 0x4bb   : > { %v6862_v28 = vpop.eup %6861  ;;  %v3795_v29 = vadd.f32 1.0, %v6860_v53  ;;  %6881 = vpow2.f32 %v5641_v60  ;;  %v5643_v61 = vmul.f32 -1.442695, %v9044_v20  ;;  %v9056_v12 = vadd.f32 %v3500_v26, %v8878_v16 }
 0x4bc   : > { %v6864_v23 = vpop.eup %6863  ;;  %6883 = vpow2.f32 %v5642_v8  ;;  %v5644_v22 = vmul.f32 -1.442695, %v9052_v25  ;;  %v4038_v55 = vpack.c.bf16 %v3982_v49, %v3980_v4  ;;  %v4037_v2 = vpack.c.bf16 %v3981_v1, %v3979_v57 }
 0x4bd   : > { %v6866_v37 = vpop.eup %6865  ;;  %6885 = vrcp.f32 %v3795_v29  ;;  %v5645_v0 = vmul.f32 -1.442695, %v9056_v12  ;;  %v3983_v43 = vmul.f32 %v6862_v28, %v8953_v18  ;;  %v3984_v59 = vmul.f32 %v6864_v23, %v8956_v17 }
 0x4be   : > { %v6868_v36 = vpop.eup %6867  ;;  %v3985_v5 = vmul.f32 %v6866_v37, %v8960_v50  ;;  %6887 = vpow2.f32 %v5643_v61  ;;  %4329 = vmatprep.mubr.bf16.mxu1 %v4038_v55 }
 0x4bf   : > { %v6870_v45 = vpop.eup %6869  ;;  %v3986_v41 = vmul.f32 %v6868_v36, %v8967_v32  ;;  %6889 = vpow2.f32 %v5644_v22  ;;  %4330 = vmatmul.mubr.bf16.gmra.mrb[172].mxu1 %v4037_v2  ;;  %v3504_v58 = vpop.f32.mrb[96].mxu0 }
 0x4c0   : > { %v6872_v24 = vpop.eup %6871  ;;  %v3796_v47 = vadd.f32 1.0, %v6870_v45  ;;  %6891 = vpow2.f32 %v5645_v0  ;;  %v3506_v52 = vpop.f32.mrb[97].mxu0  ;;  %v4039_v9 = vpack.c.bf16 %v3985_v5, %v3983_v43  ;;  %v9065_v34 = vadd.f32 %v3504_v58, %v8875_v35 }
 0x4c1   : > { %v6874_v42 = vpop.eup %6873  ;;  %v3797_v6 = vadd.f32 1.0, %v6872_v24  ;;  %v3508_v18 = vpop.f32.mrb[98].mxu0  ;;  %v4040_v33 = vpack.c.bf16 %v3986_v41, %v3984_v59  ;;  %v9068_v60 = vadd.f32 %v3506_v52, %v8878_v16 }
 0x4c2   : > { %v6876_v50 = vpop.eup %6875  ;;  %6893 = vrcp.f32 %v3796_v47  ;;  %v3798_v21 = vadd.f32 1.0, %v6874_v42  ;;  %v3510_v17 = vpop.f32.mrb[99].mxu0  ;;  %v5646_v57 = vmul.f32 -1.442695, %v9065_v34  ;;  %v9072_v4 = vadd.f32 %v3508_v18, %v8875_v35 }
 0x4c3   : > { %v6878_v32 = vpop.eup %6877  ;;  %6895 = vrcp.f32 %v3797_v6  ;;  %v3799_v15 = vadd.f32 1.0, %v6876_v50  ;;  %4339 = vmatprep.mubr.bf16.mxu1 %v4040_v33  ;;  %v9075_v30 = vadd.f32 %v3510_v17, %v8878_v16  ;;  %v5647_v26 = vmul.f32 -1.442695, %v9068_v60 }
 0x4c4   : > { %v6880_v11 = vpop.eup %6879  ;;  %6897 = vrcp.f32 %v3798_v21  ;;  %v3800_v51 = vadd.f32 1.0, %v6878_v32  ;;  %v5648_v2 = vmul.f32 -1.442695, %v9072_v4 }
 0x4c5   : > { %v6882_v7 = vpop.eup %6881  ;;  %6899 = vrcp.f32 %v3799_v15  ;;  %v3801_v46 = vadd.f32 1.0, %v6880_v11  ;;  %v5649_v5 = vmul.f32 -1.442695, %v9075_v30 }
 0x4c6   : > { %v6884_v13 = vpop.eup %6883  ;;  %6901 = vrcp.f32 %v3800_v51  ;;  %v3802_v14 = vadd.f32 1.0, %v6882_v7 }
 0x4c7   : > { %v6886_v48 = vpop.eup %6885  ;;  %6903 = vrcp.f32 %v3801_v46  ;;  %v3803_v44 = vadd.f32 1.0, %v6884_v13  ;;  %4340 = vmatmul.mubr.bf16.gmra.mrb[176].mxu1 %v4039_v9  ;;  %v3514_v1 = vpop.f32.mrb[100].mxu0 }
 0x4c8   : > { %v6888_v63 = vpop.eup %6887  ;;  %6905 = vrcp.f32 %v3802_v14  ;;  %v3516_v53 = vpop.f32.mrb[101].mxu0  ;;  %v9079_v28 = vadd.f32 %v3514_v1, %v8875_v35  ;;  %v3987_v59 = vmul.f32 %v6886_v48, %v8980_v31 }
 0x4c9   : > { %v6890_v49 = vpop.eup %6889  ;;  %6907 = vrcp.f32 %v3803_v44  ;;  %v3804_v8 = vadd.f32 1.0, %v6888_v63  ;;  %v3518_v29 = vpop.f32.mrb[102].mxu0  ;;  %v9082_v22 = vadd.f32 %v3516_v53, %v8878_v16 }
 0x4ca   : > { %v6892_v61 = vpop.eup %6891  ;;  %v3805_v23 = vadd.f32 1.0, %v6890_v49  ;;  %6909 = vpow2.f32 %v5646_v57  ;;  %v9085_v55 = vadd.f32 %v3518_v29, %v8875_v35  ;;  %v3520_v37 = vpop.f32.mrb[103].mxu0  ;;  %v5650_v41 = vmul.f32 -1.442695, %v9079_v28 }
 0x4cb   : > { %6911 = vrcp.f32 %v3804_v8  ;;  %v3806_v0 = vadd.f32 1.0, %v6892_v61  ;;  %v9089_v36 = vadd.f32 %v3520_v37, %v8878_v16  ;;  %v5651_v47 = vmul.f32 -1.442695, %v9082_v22 }
 0x4cc   : > { %v6894_v43 = vpop.eup %6893  ;;  %6913 = vrcp.f32 %v3805_v23  ;;  %v5652_v52 = vmul.f32 -1.442695, %v9085_v55 }
 0x4cd   : > { %v6896_v45 = vpop.eup %6895  ;;  %6915 = vrcp.f32 %v3806_v0  ;;  %v3988_v42 = vmul.f32 %v6894_v43, %v8992_v39  ;;  %v5653_v18 = vmul.f32 -1.442695, %v9089_v36 }
 0x4ce   : > { %v6898_v58 = vpop.eup %6897  ;;  %v3989_v24 = vmul.f32 %v6896_v45, %v8998_v27  ;;  %6917 = vpow2.f32 %v5647_v26 }
 0x4cf   : > { %v6900_v9 = vpop.eup %6899  ;;  %v3990_v6 = vmul.f32 %v6898_v58, %v9004_v56  ;;  %6919 = vpow2.f32 %v5648_v2  ;;  %v3524_v31 = vpop.f32.mrb[104].mxu0 }
 0x4d0   : > { %v6902_v33 = vpop.eup %6901  ;;  %v3991_v50 = vmul.f32 %v6900_v9, %v9007_v62  ;;  %6921 = vpow2.f32 %v5649_v5  ;;  %v4041_v21 = vpack.c.bf16 %v3989_v24, %v3987_v59  ;;  %v9102_v27 = vadd.f32 %v3524_v31, %v8875_v35  ;;  %v3526_v17 = vpop.f32.mrb[105].mxu0 }
 0x4d1   : > { %v6904_v32 = vpop.eup %6903  ;;  %v3992_v15 = vmul.f32 %v6902_v33, %v9011_v54  ;;  %6923 = vpow2.f32 %v5650_v41  ;;  %v4042_v39 = vpack.c.bf16 %v3990_v6, %v3988_v42  ;;  %v9106_v56 = vadd.f32 %v3526_v17, %v8878_v16  ;;  %v3528_v11 = vpop.f32.mrb[106].mxu0 }
 0x4d2   : > { %v6906_v51 = vpop.eup %6905  ;;  %v3993_v7 = vmul.f32 %v6904_v32, %v9018_v19  ;;  %6925 = vpow2.f32 %v5651_v47  ;;  %v5654_v62 = vmul.f32 -1.442695, %v9102_v27  ;;  %v9111_v46 = vadd.f32 %v3528_v11, %v8875_v35  ;;  %v3530_v13 = vpop.f32.mrb[107].mxu0 }
 0x4d3   : > { %v6908_v14 = vpop.eup %6907  ;;  %v3994_v57 = vmul.f32 %v6906_v51, %v9025_v10  ;;  %6927 = vpow2.f32 %v5652_v52  ;;  %4349 = vmatprep.mubr.bf16.mxu1 %v4042_v39  ;;  %v5655_v54 = vmul.f32 -1.442695, %v9106_v56  ;;  %v9116_v48 = vadd.f32 %v3530_v13, %v8878_v16 }
 0x4d4   : > { %v6910_v44 = vpop.eup %6909  ;;  %6929 = vpow2.f32 %v5653_v18  ;;  %4350 = vmatmul.mubr.bf16.gmra.mrb[180].mxu1 %v4041_v21  ;;  %v5656_v19 = vmul.f32 -1.442695, %v9111_v46  ;;  %v4043_v1 = vpack.c.bf16 %v3993_v7, %v3991_v50  ;;  %v9121_v29 = vmul.f32 %v6908_v14, %v9039_v3 }
 0x4d5   : > { %v6912_v63 = vpop.eup %6911  ;;  %v3807_v53 = vadd.f32 1.0, %v6910_v44  ;;  %6931 = vpow2.f32 %v5654_v62  ;;  %v5657_v49 = vmul.f32 -1.442695, %v9116_v48  ;;  %v4044_v8 = vpack.c.bf16 %v3994_v57, %v3992_v15 }
 0x4d6   : > { %v6914_v10 = vpop.eup %6913  ;;  %6933 = vpow2.f32 %v5655_v54  ;;  %v3996_v0 = vmul.f32 %v6912_v63, %v9044_v20 }
 0x4d7   : > { %v6916_v26 = vpop.eup %6915  ;;  %v3997_v61 = vmul.f32 %v6914_v10, %v9052_v25  ;;  %6935 = vrcp.f32 %v3807_v53  ;;  %4359 = vmatprep.mubr.bf16.mxu1 %v4044_v8  ;;  %v3534_v23 = vpop.f32.mrb[108].mxu0 }
 0x4d8   : > { %v6918_v37 = vpop.eup %6917  ;;  %v3998_v2 = vmul.f32 %v6916_v26, %v9056_v12  ;;  %6937 = vpow2.f32 %v5656_v19  ;;  %v3536_v43 = vpop.f32.mrb[109].mxu0  ;;  %v9128_v12 = vadd.f32 %v3534_v23, %v8875_v35 }
 0x4d9   : > { %v6920_v5 = vpop.eup %6919  ;;  %v3808_v45 = vadd.f32 1.0, %v6918_v37  ;;  %6939 = vpow2.f32 %v5657_v49  ;;  %v3538_v59 = vpop.f32.mrb[110].mxu0  ;;  %v4045_v41 = vpack.c.bf16 %v3997_v61, %v9121_v29  ;;  %v9131_v33 = vadd.f32 %v3536_v43, %v8878_v16 }
 0x4da   : > { %v6922_v3 = vpop.eup %6921  ;;  %v3809_v58 = vadd.f32 1.0, %v6920_v5  ;;  %v3540_v24 = vpop.f32.mrb[111].mxu0  ;;  %v4046_v25 = vpack.c.bf16 %v3998_v2, %v3996_v0  ;;  %v5658_v39 = vmul.f32 -1.442695, %v9128_v12  ;;  %v9135_v11 = vadd.f32 %v3538_v59, %v8875_v35 }
 0x4db   : > { %v6924_v47 = vpop.eup %6923  ;;  %6941 = vrcp.f32 %v3808_v45  ;;  %v3810_v52 = vadd.f32 1.0, %v6922_v3  ;;  %v9138_v13 = vadd.f32 %v3540_v24, %v8878_v16  ;;  %v5659_v54 = vmul.f32 -1.442695, %v9131_v33 }
 0x4dc   : > { %v6926_v9 = vpop.eup %6925  ;;  %6943 = vrcp.f32 %v3809_v58  ;;  %v3811_v20 = vadd.f32 1.0, %v6924_v47  ;;  %4360 = vmatmul.mubr.bf16.gmra.mrb[184].mxu1 %v4043_v1  ;;  %v5660_v10 = vmul.f32 -1.442695, %v9135_v11 }
 0x4dd   : > { %v6928_v42 = vpop.eup %6927  ;;  %6945 = vrcp.f32 %v3810_v52  ;;  %v3812_v6 = vadd.f32 1.0, %v6926_v9  ;;  %4369 = vmatprep.mubr.bf16.mxu1 %v4046_v25  ;;  %v5661_v29 = vmul.f32 -1.442695, %v9138_v13 }
 0x4de   : > { %v6930_v18 = vpop.eup %6929  ;;  %6947 = vrcp.f32 %v3811_v20  ;;  %v3813_v31 = vadd.f32 1.0, %v6928_v42 }
 0x4df   : > { %v6932_v50 = vpop.eup %6931  ;;  %6949 = vrcp.f32 %v3812_v6  ;;  %v3814_v21 = vadd.f32 1.0, %v6930_v18  ;;  %v3544_v17 = vpop.f32.mrb[112].mxu0 }
 0x4e0   : > { %v6934_v32 = vpop.eup %6933  ;;  %6951 = vrcp.f32 %v3813_v31  ;;  %v3815_v15 = vadd.f32 1.0, %v6932_v50  ;;  %v3546_v51 = vpop.f32.mrb[113].mxu0  ;;  %v9142_v44 = vadd.f32 %v3544_v17, %v8875_v35 }
 0x4e1   : > { %v6936_v7 = vpop.eup %6935  ;;  %6953 = vrcp.f32 %v3814_v21  ;;  %v3816_v62 = vadd.f32 1.0, %v6934_v32  ;;  %v3548_v14 = vpop.f32.mrb[114].mxu0  ;;  %v9145_v53 = vadd.f32 %v3546_v51, %v8878_v16 }
 0x4e2   : > { %v6938_v57 = vpop.eup %6937  ;;  %6955 = vrcp.f32 %v3815_v15  ;;  %v3550_v19 = vpop.f32.mrb[115].mxu0  ;;  %v9148_v49 = vadd.f32 %v3548_v14, %v8875_v35  ;;  %v3999_v37 = vmul.f32 %v6936_v7, %v9065_v34  ;;  %v5662_v0 = vmul.f32 -1.442695, %v9142_v44 }
 0x4e3   : > { %v6940_v1 = vpop.eup %6939  ;;  %6957 = vrcp.f32 %v3816_v62  ;;  %v3817_v63 = vadd.f32 1.0, %v6938_v57  ;;  %v9153_v61 = vadd.f32 %v3550_v19, %v8878_v16  ;;  %v5663_v5 = vmul.f32 -1.442695, %v9145_v53 }
 0x4e4   : > { %v3818_v8 = vadd.f32 1.0, %v6940_v1  ;;  %6959 = vpow2.f32 %v5658_v39  ;;  %4370 = vmatmul.mubr.bf16.gmra.mrb[188].mxu1 %v4045_v41  ;;  %v5664_v45 = vmul.f32 -1.442695, %v9148_v49 }
 0x4e5   : > { %v6942_v26 = vpop.eup %6941  ;;  %6961 = vrcp.f32 %v3817_v63 }
 0x4e6   : > { %v6944_v23 = vpop.eup %6943  ;;  %6963 = vrcp.f32 %v3818_v8  ;;  %v4000_v3 = vmul.f32 %v6942_v26, %v9068_v60 }
 0x4e7   : > { %v6946_v2 = vpop.eup %6945  ;;  %v4001_v43 = vmul.f32 %v6944_v23, %v9072_v4  ;;  %6965 = vpow2.f32 %v5659_v54  ;;  %v3554_v59 = vpop.f32.mrb[116].mxu0  ;;  %v5665_v4 = vmul.f32 -1.442695, %v9153_v61 }
 0x4e8   : > { %v6948_v41 = vpop.eup %6947  ;;  %v4002_v58 = vmul.f32 %v6946_v2, %v9075_v30  ;;  %6967 = vpow2.f32 %v5660_v10  ;;  %v9163_v34 = vadd.f32 %v3554_v59, %v8875_v35  ;;  %v3556_v24 = vpop.f32.mrb[117].mxu0 }
 0x4e9   : > { %v6950_v25 = vpop.eup %6949  ;;  %6969 = vpow2.f32 %v5661_v29  ;;  %v4047_v47 = vpack.c.bf16 %v4001_v43, %v3999_v37  ;;  %v9167_v52 = vadd.f32 %v3556_v24, %v8878_v16  ;;  %v3558_v9 = vpop.f32.mrb[118].mxu0  ;;  %v4003_v42 = vmul.f32 %v6948_v41, %v9079_v28 }
 0x4ea   : > { %v6952_v20 = vpop.eup %6951  ;;  %6971 = vpow2.f32 %v5662_v0  ;;  %v4048_v60 = vpack.c.bf16 %v4002_v58, %v4000_v3  ;;  %v5666_v30 = vmul.f32 -1.442695, %v9163_v34  ;;  %v3560_v6 = vpop.f32.mrb[119].mxu0  ;;  %v9174_v21 = vadd.f32 %v3558_v9, %v8875_v35 }
 0x4eb   : > { %v6954_v18 = vpop.eup %6953  ;;  %v4005_v31 = vmul.f32 %v6952_v20, %v9085_v55  ;;  %6973 = vpow2.f32 %v5663_v5  ;;  %v5667_v50 = vmul.f32 -1.442695, %v9167_v52  ;;  %v4004_v32 = vmul.f32 %v6950_v25, %v9082_v22 }
 0x4ec   : > { %v6956_v17 = vpop.eup %6955  ;;  %v4006_v15 = vmul.f32 %v6954_v18, %v9089_v36  ;;  %6975 = vpow2.f32 %v5664_v45  ;;  %4379 = vmatprep.mubr.bf16.mxu1 %v4048_v60  ;;  %v9179_v28 = vadd.f32 %v3560_v6, %v8878_v16  ;;  %v5668_v55 = vmul.f32 -1.442695, %v9174_v21 }
 0x4ed   : > { %v6958_v39 = vpop.eup %6957  ;;  %6977 = vpow2.f32 %v5665_v4  ;;  %4380 = vmatmul.mubr.bf16.gmra.mrb[192].mxu1 %v4047_v47  ;;  %v4049_v51 = vpack.c.bf16 %v4005_v31, %v4003_v42  ;;  %v4007_v54 = vmul.f32 %v6956_v17, %v9102_v27 }
 0x4ee   : > { %v6960_v7 = vpop.eup %6959  ;;  %6979 = vpow2.f32 %v5666_v30  ;;  %v5669_v62 = vmul.f32 -1.442695, %v9179_v28  ;;  %v4050_v14 = vpack.c.bf16 %v4006_v15, %v4004_v32  ;;  %v4008_v8 = vmul.f32 %v6958_v39, %v9106_v56 }
 0x4ef   : > { %v6962_v57 = vpop.eup %6961  ;;  %v3819_v22 = vadd.f32 1.0, %v6960_v7  ;;  %6981 = vpow2.f32 %v5667_v50 }
 0x4f0   : > { %v6964_v36 = vpop.eup %6963  ;;  %v4009_v19 = vmul.f32 %v6962_v57, %v9111_v46  ;;  %6983 = vpow2.f32 %v5668_v55  ;;  %4389 = vmatprep.mubr.bf16.mxu1 %v4050_v14  ;;  %v3564_v1 = vpop.f32.mrb[120].mxu0 }
 0x4f1   : > { %v6966_v63 = vpop.eup %6965  ;;  %v4010_v10 = vmul.f32 %v6964_v36, %v9116_v48  ;;  %v3566_v26 = vpop.f32.mrb[121].mxu0  ;;  %6985 = vpow2.f32 %v5669_v62  ;;  %v9188_v3 = vadd.f32 %v3564_v1, %v8875_v35 }
 0x4f2   : > { %v6968_v29 = vpop.eup %6967  ;;  %v3820_v23 = vadd.f32 1.0, %v6966_v63  ;;  %v3568_v37 = vpop.f32.mrb[122].mxu0  ;;  %v4051_v0 = vpack.c.bf16 %v4009_v19, %v4007_v54  ;;  %6987 = vrcp.f32 %v3819_v22  ;;  %v9191_v47 = vadd.f32 %v3566_v26, %v8878_v16 }
 0x4f3   : > { %v6970_v2 = vpop.eup %6969  ;;  %v3821_v43 = vadd.f32 1.0, %v6968_v29  ;;  %v3570_v27 = vpop.f32.mrb[123].mxu0  ;;  %v4052_v5 = vpack.c.bf16 %v4010_v10, %v4008_v8  ;;  %v9194_v60 = vadd.f32 %v3568_v37, %v8875_v35  ;;  %v5670_v31 = vmul.f32 -1.442695, %v9188_v3 }
 0x4f4   : > { %v6972_v46 = vpop.eup %6971  ;;  %6989 = vrcp.f32 %v3820_v23  ;;  %v3822_v45 = vadd.f32 1.0, %v6970_v2  ;;  %v9198_v50 = vadd.f32 %v3570_v27, %v8878_v16 }
 0x4f5   : > { %v6974_v59 = vpop.eup %6973  ;;  %6991 = vrcp.f32 %v3821_v43  ;;  %v3823_v41 = vadd.f32 1.0, %v6972_v46  ;;  %4390 = vmatmul.mubr.bf16.gmra.mrb[196].mxu1 %v4049_v51  ;;  %v5671_v51 = vmul.f32 -1.442695, %v9191_v47  ;;  %v5672_v57 = vmul.f32 -1.442695, %v9194_v60 }
 0x4f6   : > { %v6976_v56 = vpop.eup %6975  ;;  %6993 = vrcp.f32 %v3822_v45  ;;  %v3824_v48 = vadd.f32 1.0, %v6974_v59  ;;  %4399 = vmatprep.mubr.bf16.mxu1 %v4052_v5  ;;  %v5673_v54 = vmul.f32 -1.442695, %v9198_v50 }
 0x4f7   : > { %v6978_v58 = vpop.eup %6977  ;;  %6995 = vrcp.f32 %v3823_v41  ;;  %v3825_v24 = vadd.f32 1.0, %v6976_v56 }
 0x4f8   : > { %v6980_v25 = vpop.eup %6979  ;;  %6997 = vrcp.f32 %v3824_v48  ;;  %v3826_v4 = vadd.f32 1.0, %v6978_v58  ;;  %v3574_v9 = vpop.f32.mrb[124].mxu0 }
 0x4f9   : > { %v6982_v20 = vpop.eup %6981  ;;  %6999 = vrcp.f32 %v3825_v24  ;;  %v3827_v42 = vadd.f32 1.0, %v6980_v25  ;;  %v3576_v30 = vpop.f32.mrb[125].mxu0  ;;  %v9201_v15 = vadd.f32 %v3574_v9, %v8875_v35 }
 0x4fa   : > { %v6984_v6 = vpop.eup %6983  ;;  %7001 = vrcp.f32 %v3826_v4  ;;  %v3828_v18 = vadd.f32 1.0, %v6982_v20  ;;  %v3578_v17 = vpop.f32.mrb[126].mxu0  ;;  %v9205_v7 = vadd.f32 %v3576_v30, %v8878_v16 }
 0x4fb   : > { %7003 = vrcp.f32 %v3827_v42  ;;  %v3829_v32 = vadd.f32 1.0, %v6984_v6  ;;  %v3580_v39 = vpop.f32.mrb[127].mxu0  ;;  %v6986_v55 = vpop.eup %6985  ;;  %v9209_v22 = vadd.f32 %v3578_v17, %v8875_v35  ;;  %v5674_v63 = vmul.f32 -1.442695, %v9201_v15 }
 0x4fc   : > { %7005 = vrcp.f32 %v3828_v18  ;;  %v6988_v62 = vpop.eup %6987  ;;  %v3830_v14 = vadd.f32 1.0, %v6986_v55  ;;  %v9213_v19 = vadd.f32 %v3580_v39, %v8878_v16  ;;  %v5675_v35 = vmul.f32 -1.442695, %v9205_v7 }
 0x4fd   : > { %7007 = vrcp.f32 %v3829_v32  ;;  %4400 = vmatmul.mubr.bf16.gmra.mrb[200].mxu1 %v4051_v0  ;;  %v4011_v10 = vmul.f32 %v6988_v62, %v9128_v12  ;;  %v5676_v16 = vmul.f32 -1.442695, %v9209_v22  ;;  %v6272_v62 = vld [vmem:[%s9706_s13 + $0x30] sm:$0xff]  }
 0x4fe   : > { %v6990_v36 = vpop.eup %6989  ;;  %7009 = vpow2.f32 %v5670_v31  ;;  %v5677_v2 = vmul.f32 -1.442695, %v9213_v19 }
 0x4ff   : > { %v6992_v1 = vpop.eup %6991  ;;  %7011 = vrcp.f32 %v3830_v14  ;;  %v4012_v23 = vmul.f32 %v6990_v36, %v9131_v33 }
 0x500   : > { %v6994_v8 = vpop.eup %6993  ;;  %v4013_v26 = vmul.f32 %v6992_v1, %v9135_v11  ;;  %7013 = vpow2.f32 %v5671_v51  ;;  %v6271_v51 = vld [vmem:[%s9706_s13 + $0x70] sm:$0xff]  }
 0x501   : > { %v6996_v29 = vpop.eup %6995  ;;  %v4014_v37 = vmul.f32 %v6994_v8, %v9138_v13  ;;  %7015 = vpow2.f32 %v5672_v57  ;;  %5805 = vmatprep.subr.bf16.mxu0 %v6271_v51 }
 0x502   : > { %v6998_v0 = vpop.eup %6997  ;;  %7017 = vpow2.f32 %v5673_v54  ;;  %v4053_v43 = vpack.c.bf16 %v4013_v26, %v4011_v10  ;;  %v4015_v5 = vmul.f32 %v6996_v29, %v9142_v44  ;;  %5806 = vmatpush3.bf16.msra.mxu0 %v6272_v62 }
 0x503   : > { %v7000_v27 = vpop.eup %6999  ;;  %7019 = vpow2.f32 %v5674_v63  ;;  %v4054_v12 = vpack.c.bf16 %v4014_v37, %v4012_v23  ;;  %v4016_v13 = vmul.f32 %v6998_v0, %v9145_v53 }
 0x504   : > { %v7002_v11 = vpop.eup %7001  ;;  %v4017_v46 = vmul.f32 %v7000_v27, %v9148_v49  ;;  %7021 = vpow2.f32 %v5675_v35 }
 0x505   : > { %v7004_v33 = vpop.eup %7003  ;;  %v4018_v45 = vmul.f32 %v7002_v11, %v9153_v61  ;;  %7023 = vpow2.f32 %v5676_v16  ;;  %4409 = vmatprep.mubr.bf16.mxu1 %v4054_v12 }
 0x506   : > { %v7006_v59 = vpop.eup %7005  ;;  %7025 = vpow2.f32 %v5677_v2  ;;  %4410 = vmatmul.mubr.bf16.gmra.mrb[204].mxu1 %v4053_v43  ;;  %v4055_v41 = vpack.c.bf16 %v4017_v46, %v4015_v5  ;;  %v4019_v24 = vmul.f32 %v7004_v33, %v9163_v34 }
 0x507   : > { %v7008_v56 = vpop.eup %7007  ;;  %v4056_v48 = vpack.c.bf16 %v4018_v45, %v4016_v13  ;;  %v4020_v53 = vmul.f32 %v7006_v59, %v9167_v52 }
 0x508   : > { %v7010_v58 = vpop.eup %7009  ;;  %v4021_v44 = vmul.f32 %v7008_v56, %v9174_v21 }
 0x509   : > { %v7012_v49 = vpop.eup %7011  ;;  %v3831_v25 = vadd.f32 1.0, %v7010_v58  ;;  %4419 = vmatprep.mubr.bf16.mxu1 %v4056_v48 }
 0x50a   : > { %v7014_v4 = vpop.eup %7013  ;;  %v4022_v61 = vmul.f32 %v7012_v49, %v9179_v28  ;;  %v4057_v9 = vpack.c.bf16 %v4021_v44, %v4019_v24 }
 0x50b   : > { %v7016_v20 = vpop.eup %7015  ;;  %v3832_v42 = vadd.f32 1.0, %v7014_v4  ;;  %7027 = vrcp.f32 %v3831_v25 }
 0x50c   : > { %v7018_v30 = vpop.eup %7017  ;;  %v3833_v6 = vadd.f32 1.0, %v7016_v20  ;;  %v4058_v18 = vpack.c.bf16 %v4022_v61, %v4020_v53 }
 0x50d   : > { %v7020_v31 = vpop.eup %7019  ;;  %7029 = vrcp.f32 %v3832_v42  ;;  %v3834_v34 = vadd.f32 1.0, %v7018_v30 }
 0x50e   : > { %v7022_v17 = vpop.eup %7021  ;;  %7031 = vrcp.f32 %v3833_v6  ;;  %v3835_v21 = vadd.f32 1.0, %v7020_v31  ;;  %4420 = vmatmul.mubr.bf16.gmra.mrb[208].mxu1 %v4055_v41 }
 0x50f   : > { %v7024_v32 = vpop.eup %7023  ;;  %7033 = vrcp.f32 %v3834_v34  ;;  %v3836_v39 = vadd.f32 1.0, %v7022_v17  ;;  %4429 = vmatprep.mubr.bf16.mxu1 %v4058_v18 }
 0x510   : > { %v7026_v52 = vpop.eup %7025  ;;  %7035 = vrcp.f32 %v3835_v21  ;;  %v3837_v28 = vadd.f32 1.0, %v7024_v32 }
 0x511   : > { %7037 = vrcp.f32 %v3836_v39  ;;  %v3838_v55 = vadd.f32 1.0, %v7026_v52 }
 0x512   : > { %7039 = vrcp.f32 %v3837_v28 }
 0x513   : > { %7041 = vrcp.f32 %v3838_v55 }
 0x515   : > { %v7028_v14 = vpop.eup %7027 }
 0x516   : > { %4430 = vmatmul.mubr.bf16.gmra.mrb[212].mxu1 %v4057_v9  ;;  %v4023_v1 = vmul.f32 %v7028_v14, %v9188_v3 }
 0x517   : > { %v7030_v57 = vpop.eup %7029 }
 0x518   : > { %v7032_v36 = vpop.eup %7031  ;;  %v4024_v10 = vmul.f32 %v7030_v57, %v9191_v47  ;;  %v6273_v47 = vld [vmem:[%s9706_s13 + $0x78] sm:$0xff]  }
 0x519   : > { %v7034_v54 = vpop.eup %7033  ;;  %v4025_v63 = vmul.f32 %v7032_v36, %v9194_v60  ;;  %5807 = vmatprep.subr.bf16.mxu0 %v6273_v47 }
 0x51a   : > { %v7036_v8 = vpop.eup %7035  ;;  %v4026_v26 = vmul.f32 %v7034_v54, %v9198_v50  ;;  %v6274_v50 = vld [vmem:[%s9706_s13 + $0x38] sm:$0xff]  }
 0x51b   : > { %v7038_v35 = vpop.eup %7037  ;;  %v4059_v29 = vpack.c.bf16 %v4025_v63, %v4023_v1  ;;  %v4027_v0 = vmul.f32 %v7036_v8, %v9201_v15  ;;  %5808 = vmatpush3.bf16.msra.mxu0 %v6274_v50  ;;  %v4095_v15 = vld [vmem:[%s9705_s12] sm:$0x3] }
 0x51c   : > { %v7040_v23 = vpop.eup %7039  ;;  %v4060_v37 = vpack.c.bf16 %v4026_v26, %v4024_v10  ;;  %v4028_v43 = vmul.f32 %v7038_v35, %v9205_v7  ;;  %v9255_v7 = vrot.slane %v4095_v15, %v7786_v38 }
 0x51d   : > { %v7042_v16 = vpop.eup %7041  ;;  %v4029_v2 = vmul.f32 %v7040_v23, %v9209_v22  ;;  %v9258_v22 = vrot.slane %v4095_v15, %v7790_v40 }
 0x51e   : > { %v4030_v3 = vmul.f32 %v7042_v16, %v9213_v19  ;;  %4439 = vmatprep.mubr.bf16.mxu1 %v4060_v37 }
 0x51f   : > { %4440 = vmatmul.mubr.bf16.gmra.mrb[216].mxu1 %v4059_v29  ;;  %v4061_v60 = vpack.c.bf16 %v4029_v2, %v4027_v0 }
 0x520   : > { %v4062_v27 = vpack.c.bf16 %v4030_v3, %v4028_v43 }
 0x522   : > { %4449 = vmatprep.mubr.bf16.mxu1 %v4062_v27 }
 0x527   : > { %4450 = vmatmul.mubr.bf16.gmra.mrb[220].mxu1 %v4061_v60 }
 0x570   : > { %v4301_v19 = vpop.f32.mrb[160].mxu1 }
 0x571   : > { %v9261_v12 = vadd.f32 %v4301_v19, %v9255_v7  ;;  %v4303_v11 = vpop.f32.mrb[161].mxu1 }
 0x572   : > { %v9264_v5 = vadd.f32 %v4303_v11, %v9258_v22  ;;  %v4305_v46 = vpop.f32.mrb[162].mxu1 }
 0x573   : > { %v5710_v33 = vmul.f32 -1.442695, %v9261_v12  ;;  %v9268_v13 = vadd.f32 %v4305_v46, %v9255_v7  ;;  %v4307_v45 = vpop.f32.mrb[163].mxu1 }
 0x574   : > { %v5711_v38 = vmul.f32 -1.442695, %v9264_v5  ;;  %v9272_v40 = vadd.f32 %v4307_v45, %v9258_v22 }
 0x575   : > { %7043 = vpow2.f32 %v5710_v33  ;;  %v5712_v59 = vmul.f32 -1.442695, %v9268_v13 }
 0x576   : > { %7045 = vpow2.f32 %v5711_v38  ;;  %v5713_v41 = vmul.f32 -1.442695, %v9272_v40 }
 0x577   : > { %7047 = vpow2.f32 %v5712_v59 }
 0x578   : > { %7049 = vpow2.f32 %v5713_v41  ;;  %v4311_v56 = vpop.f32.mrb[164].mxu1 }
 0x579   : > { %v9277_v48 = vadd.f32 %v4311_v56, %v9255_v7  ;;  %v4313_v58 = vpop.f32.mrb[165].mxu1 }
 0x57a   : > { %v9280_v24 = vadd.f32 %v4313_v58, %v9258_v22  ;;  %v4315_v44 = vpop.f32.mrb[166].mxu1 }
 0x57b   : > { %v5714_v49 = vmul.f32 -1.442695, %v9277_v48  ;;  %v9284_v25 = vadd.f32 %v4315_v44, %v9255_v7  ;;  %v4317_v4 = vpop.f32.mrb[167].mxu1 }
 0x57c   : > { %v5715_v53 = vmul.f32 -1.442695, %v9280_v24  ;;  %v9288_v61 = vadd.f32 %v4317_v4, %v9258_v22 }
 0x57d   : > { %7051 = vpow2.f32 %v5714_v49  ;;  %v5716_v9 = vmul.f32 -1.442695, %v9284_v25 }
 0x57e   : > { %7053 = vpow2.f32 %v5715_v53  ;;  %v5717_v20 = vmul.f32 -1.442695, %v9288_v61 }
 0x57f   : > { %v7044_v42 = vpop.eup %7043  ;;  %7055 = vpow2.f32 %v5716_v9 }
 0x580   : > { %v7046_v30 = vpop.eup %7045  ;;  %v4652_v6 = vadd.f32 1.0, %v7044_v42  ;;  %7057 = vpow2.f32 %v5717_v20 }
 0x581   : > { %v7048_v18 = vpop.eup %7047  ;;  %v4653_v31 = vadd.f32 1.0, %v7046_v30  ;;  %v4321_v34 = vpop.f32.mrb[168].mxu1 }
 0x582   : > { %v7050_v17 = vpop.eup %7049  ;;  %7059 = vrcp.f32 %v4652_v6  ;;  %v4654_v21 = vadd.f32 1.0, %v7048_v18  ;;  %v9293_v32 = vadd.f32 %v4321_v34, %v9255_v7  ;;  %v4323_v39 = vpop.f32.mrb[169].mxu1 }
 0x583   : > { %7061 = vrcp.f32 %v4653_v31  ;;  %v4655_v52 = vadd.f32 1.0, %v7050_v17  ;;  %v9296_v28 = vadd.f32 %v4323_v39, %v9258_v22  ;;  %v4325_v55 = vpop.f32.mrb[170].mxu1 }
 0x584   : > { %7063 = vrcp.f32 %v4654_v21  ;;  %v5718_v51 = vmul.f32 -1.442695, %v9293_v32  ;;  %v9300_v62 = vadd.f32 %v4325_v55, %v9255_v7  ;;  %v4327_v14 = vpop.f32.mrb[171].mxu1 }
 0x585   : > { %7065 = vrcp.f32 %v4655_v52  ;;  %v5719_v57 = vmul.f32 -1.442695, %v9296_v28  ;;  %v9304_v36 = vadd.f32 %v4327_v14, %v9258_v22 }
 0x586   : > { %7067 = vpow2.f32 %v5718_v51  ;;  %v5720_v54 = vmul.f32 -1.442695, %v9300_v62 }
 0x587   : > { %v7052_v1 = vpop.eup %7051  ;;  %7069 = vpow2.f32 %v5719_v57  ;;  %v5721_v63 = vmul.f32 -1.442695, %v9304_v36 }
 0x588   : > { %v7054_v8 = vpop.eup %7053  ;;  %v4656_v10 = vadd.f32 1.0, %v7052_v1  ;;  %7071 = vpow2.f32 %v5720_v54 }
 0x589   : > { %v7056_v26 = vpop.eup %7055  ;;  %v4657_v35 = vadd.f32 1.0, %v7054_v8  ;;  %7073 = vpow2.f32 %v5721_v63 }
 0x58a   : > { %v7058_v29 = vpop.eup %7057  ;;  %7075 = vrcp.f32 %v4656_v10  ;;  %v4658_v23 = vadd.f32 1.0, %v7056_v26 }
 0x58b   : > { %7077 = vrcp.f32 %v4657_v35  ;;  %v4659_v37 = vadd.f32 1.0, %v7058_v29 }
 0x58c   : > { %v7060_v16 = vpop.eup %7059  ;;  %7079 = vrcp.f32 %v4658_v23 }
 0x58d   : > { %v7062_v0 = vpop.eup %7061  ;;  %7081 = vrcp.f32 %v4659_v37  ;;  %v4844_v3 = vmul.f32 %v7060_v16, %v9261_v12 }
 0x58e   : > { %v7064_v2 = vpop.eup %7063  ;;  %v4845_v47 = vmul.f32 %v7062_v0, %v9264_v5 }
 0x58f   : > { %v7066_v43 = vpop.eup %7065  ;;  %v4846_v60 = vmul.f32 %v7064_v2, %v9268_v13 }
 0x590   : > { %v7068_v27 = vpop.eup %7067  ;;  %v4847_v50 = vmul.f32 %v7066_v43, %v9272_v40 }
 0x591   : > { %v7070_v15 = vpop.eup %7069  ;;  %v4908_v19 = vpack.c.bf16 %v4846_v60, %v4844_v3  ;;  %v4660_v11 = vadd.f32 1.0, %v7068_v27 }
 0x592   : > { %v7072_v46 = vpop.eup %7071  ;;  %v4661_v33 = vadd.f32 1.0, %v7070_v15  ;;  %v4331_v45 = vpop.f32.mrb[172].mxu1  ;;  %v4909_v38 = vpack.c.bf16 %v4847_v50, %v4845_v47 }
 0x593   : > { %v7074_v59 = vpop.eup %7073  ;;  %7083 = vrcp.f32 %v4660_v11  ;;  %v4662_v41 = vadd.f32 1.0, %v7072_v46  ;;  %v9313_v56 = vadd.f32 %v4331_v45, %v9255_v7  ;;  %v4333_v12 = vpop.f32.mrb[173].mxu1 }
 0x594   : > { %v7076_v13 = vpop.eup %7075  ;;  %7085 = vrcp.f32 %v4661_v33  ;;  %v4663_v58 = vadd.f32 1.0, %v7074_v59  ;;  %v9316_v5 = vadd.f32 %v4333_v12, %v9258_v22  ;;  %v4335_v40 = vpop.f32.mrb[174].mxu1  ;;  %5107 = vmatprep.mubr.bf16.mxu0 %v4909_v38 }
 0x595   : > { %v7078_v44 = vpop.eup %7077  ;;  %7087 = vrcp.f32 %v4662_v41  ;;  %v5722_v49 = vmul.f32 -1.442695, %v9313_v56  ;;  %v9320_v4 = vadd.f32 %v4335_v40, %v9255_v7  ;;  %v4337_v53 = vpop.f32.mrb[175].mxu1  ;;  %5108 = vmatmul.mubr.bf16.vlgmr.msra.gmra.mrb[128].mxu0 %v4908_v19  ;;  %v4848_v6 = vmul.f32 %v7076_v13, %v9277_v48 }
 0x596   : > { %v7080_v9 = vpop.eup %7079  ;;  %7089 = vrcp.f32 %v4663_v58  ;;  %v5723_v20 = vmul.f32 -1.442695, %v9316_v5  ;;  %v9324_v42 = vadd.f32 %v4337_v53, %v9258_v22  ;;  %v4849_v34 = vmul.f32 %v7078_v44, %v9280_v24 }
 0x597   : > { %v7082_v30 = vpop.eup %7081  ;;  %v4850_v18 = vmul.f32 %v7080_v9, %v9284_v25  ;;  %7091 = vpow2.f32 %v5722_v49  ;;  %v5724_v31 = vmul.f32 -1.442695, %v9320_v4 }
 0x598   : > { %v4851_v17 = vmul.f32 %v7082_v30, %v9288_v61  ;;  %7093 = vpow2.f32 %v5723_v20  ;;  %v5725_v21 = vmul.f32 -1.442695, %v9324_v42 }
 0x599   : > { %7095 = vpow2.f32 %v5724_v31  ;;  %v4910_v39 = vpack.c.bf16 %v4850_v18, %v4848_v6 }
 0x59a   : > { %7097 = vpow2.f32 %v5725_v21  ;;  %v4341_v52 = vpop.f32.mrb[176].mxu1  ;;  %v4911_v55 = vpack.c.bf16 %v4851_v17, %v4849_v34 }
 0x59b   : > { %v9333_v51 = vadd.f32 %v4341_v52, %v9255_v7  ;;  %v4343_v48 = vpop.f32.mrb[177].mxu1 }
 0x59c   : > { %v9336_v25 = vadd.f32 %v4343_v48, %v9258_v22  ;;  %v4345_v14 = vpop.f32.mrb[178].mxu1  ;;  %5115 = vmatprep.mubr.bf16.mxu0 %v4911_v55 }
 0x59d   : > { %v7084_v24 = vpop.eup %7083  ;;  %v5726_v61 = vmul.f32 -1.442695, %v9333_v51  ;;  %v9340_v57 = vadd.f32 %v4345_v14, %v9255_v7  ;;  %v4347_v54 = vpop.f32.mrb[179].mxu1  ;;  %5116 = vmatmul.mubr.bf16.gmra.mrb[132].mxu0 %v4910_v39 }
 0x59e   : > { %v7086_v1 = vpop.eup %7085  ;;  %v5727_v63 = vmul.f32 -1.442695, %v9336_v25  ;;  %v9344_v8 = vadd.f32 %v4347_v54, %v9258_v22  ;;  %v4852_v29 = vmul.f32 %v7084_v24, %v9293_v32 }
 0x59f   : > { %v7088_v10 = vpop.eup %7087  ;;  %7099 = vpow2.f32 %v5726_v61  ;;  %v5728_v26 = vmul.f32 -1.442695, %v9340_v57  ;;  %v4853_v0 = vmul.f32 %v7086_v1, %v9296_v28 }
 0x5a0   : > { %v7090_v35 = vpop.eup %7089  ;;  %v4854_v23 = vmul.f32 %v7088_v10, %v9300_v62  ;;  %7101 = vpow2.f32 %v5727_v63  ;;  %v5729_v37 = vmul.f32 -1.442695, %v9344_v8 }
 0x5a1   : > { %v7092_v16 = vpop.eup %7091  ;;  %v4855_v2 = vmul.f32 %v7090_v35, %v9304_v36  ;;  %7103 = vpow2.f32 %v5728_v26 }
 0x5a2   : > { %v7094_v43 = vpop.eup %7093  ;;  %v4664_v3 = vadd.f32 1.0, %v7092_v16  ;;  %7105 = vpow2.f32 %v5729_v37  ;;  %v4912_v60 = vpack.c.bf16 %v4854_v23, %v4852_v29 }
 0x5a3   : > { %v7096_v27 = vpop.eup %7095  ;;  %v4665_v47 = vadd.f32 1.0, %v7094_v43  ;;  %v4913_v50 = vpack.c.bf16 %v4855_v2, %v4853_v0 }
 0x5a4   : > { %v7098_v15 = vpop.eup %7097  ;;  %7107 = vrcp.f32 %v4664_v3  ;;  %v4666_v32 = vadd.f32 1.0, %v7096_v27 }
 0x5a5   : > { %7109 = vrcp.f32 %v4665_v47  ;;  %v4667_v62 = vadd.f32 1.0, %v7098_v15  ;;  %5123 = vmatprep.mubr.bf16.mxu0 %v4913_v50 }
 0x5a6   : > { %7111 = vrcp.f32 %v4666_v32  ;;  %5124 = vmatmul.mubr.bf16.gmra.mrb[136].mxu0 %v4912_v60 }
 0x5a7   : > { %7113 = vrcp.f32 %v4667_v62  ;;  %v4351_v28 = vpop.f32.mrb[180].mxu1 }
 0x5a8   : > { %v9353_v36 = vadd.f32 %v4351_v28, %v9255_v7  ;;  %v4353_v19 = vpop.f32.mrb[181].mxu1 }
 0x5a9   : > { %v7100_v11 = vpop.eup %7099  ;;  %v9356_v46 = vadd.f32 %v4353_v19, %v9258_v22  ;;  %v4355_v33 = vpop.f32.mrb[182].mxu1 }
 0x5aa   : > { %v7102_v45 = vpop.eup %7101  ;;  %v4668_v38 = vadd.f32 1.0, %v7100_v11  ;;  %v9359_v59 = vadd.f32 %v4355_v33, %v9255_v7  ;;  %v4357_v41 = vpop.f32.mrb[183].mxu1  ;;  %v5730_v49 = vmul.f32 -1.442695, %v9353_v36 }
 0x5ab   : > { %v7104_v12 = vpop.eup %7103  ;;  %v4669_v13 = vadd.f32 1.0, %v7102_v45  ;;  %v9362_v58 = vadd.f32 %v4357_v41, %v9258_v22  ;;  %v5731_v9 = vmul.f32 -1.442695, %v9356_v46 }
 0x5ac   : > { %v7106_v40 = vpop.eup %7105  ;;  %7115 = vrcp.f32 %v4668_v38  ;;  %v4670_v44 = vadd.f32 1.0, %v7104_v12  ;;  %v5732_v30 = vmul.f32 -1.442695, %v9359_v59 }
 0x5ad   : > { %7117 = vrcp.f32 %v4669_v13  ;;  %v4671_v53 = vadd.f32 1.0, %v7106_v40  ;;  %v5733_v18 = vmul.f32 -1.442695, %v9362_v58 }
 0x5ae   : > { %v7108_v20 = vpop.eup %7107  ;;  %7119 = vrcp.f32 %v4670_v44 }
 0x5af   : > { %v7110_v6 = vpop.eup %7109  ;;  %7121 = vrcp.f32 %v4671_v53  ;;  %v4361_v31 = vpop.f32.mrb[184].mxu1  ;;  %v4856_v17 = vmul.f32 %v7108_v20, %v9313_v56 }
 0x5b0   : > { %v7112_v34 = vpop.eup %7111  ;;  %7123 = vpow2.f32 %v5730_v49  ;;  %v9370_v21 = vadd.f32 %v4361_v31, %v9255_v7  ;;  %v4363_v39 = vpop.f32.mrb[185].mxu1  ;;  %v4857_v55 = vmul.f32 %v7110_v6, %v9316_v5 }
 0x5b1   : > { %v7114_v52 = vpop.eup %7113  ;;  %v4858_v48 = vmul.f32 %v7112_v34, %v9320_v4  ;;  %7125 = vpow2.f32 %v5731_v9  ;;  %v9375_v14 = vadd.f32 %v4363_v39, %v9258_v22  ;;  %v4365_v24 = vpop.f32.mrb[186].mxu1 }
 0x5b2   : > { %v4859_v61 = vmul.f32 %v7114_v52, %v9324_v42  ;;  %7127 = vpow2.f32 %v5732_v30  ;;  %v5734_v56 = vmul.f32 -1.442695, %v9370_v21  ;;  %v9380_v54 = vadd.f32 %v4365_v24, %v9255_v7  ;;  %v4367_v1 = vpop.f32.mrb[187].mxu1 }
 0x5b3   : > { %7129 = vpow2.f32 %v5733_v18  ;;  %v5735_v63 = vmul.f32 -1.442695, %v9375_v14  ;;  %v9384_v5 = vadd.f32 %v4367_v1, %v9258_v22  ;;  %v4914_v4 = vpack.c.bf16 %v4858_v48, %v4856_v17 }
 0x5b4   : > { %7131 = vpow2.f32 %v5734_v56  ;;  %v5736_v10 = vmul.f32 -1.442695, %v9380_v54  ;;  %v4915_v26 = vpack.c.bf16 %v4859_v61, %v4857_v55 }
 0x5b5   : > { %7133 = vpow2.f32 %v5735_v63  ;;  %v5737_v42 = vmul.f32 -1.442695, %v9384_v5 }
 0x5b6   : > { %v7116_v35 = vpop.eup %7115  ;;  %7135 = vpow2.f32 %v5736_v10  ;;  %5131 = vmatprep.mubr.bf16.mxu0 %v4915_v26 }
 0x5b7   : > { %v7118_v29 = vpop.eup %7117  ;;  %7137 = vpow2.f32 %v5737_v42  ;;  %v4371_v23 = vpop.f32.mrb[188].mxu1  ;;  %5132 = vmatmul.mubr.bf16.gmra.mrb[140].mxu0 %v4914_v4  ;;  %v4860_v43 = vmul.f32 %v7116_v35, %v9333_v51 }
 0x5b8   : > { %v7120_v37 = vpop.eup %7119  ;;  %v9389_v16 = vadd.f32 %v4371_v23, %v9255_v7  ;;  %v4373_v0 = vpop.f32.mrb[189].mxu1  ;;  %v4861_v47 = vmul.f32 %v7118_v29, %v9336_v25 }
 0x5b9   : > { %v7122_v2 = vpop.eup %7121  ;;  %v4862_v3 = vmul.f32 %v7120_v37, %v9340_v57  ;;  %v4375_v60 = vpop.f32.mrb[190].mxu1  ;;  %v9397_v57 = vadd.f32 %v4373_v0, %v9258_v22 }
 0x5ba   : > { %v7124_v27 = vpop.eup %7123  ;;  %v4863_v50 = vmul.f32 %v7122_v2, %v9344_v8  ;;  %v5738_v15 = vmul.f32 -1.442695, %v9389_v16  ;;  %v4377_v32 = vpop.f32.mrb[191].mxu1  ;;  %v9400_v8 = vadd.f32 %v4375_v60, %v9255_v7 }
 0x5bb   : > { %v7126_v62 = vpop.eup %7125  ;;  %v4672_v28 = vadd.f32 1.0, %v7124_v27  ;;  %v4916_v19 = vpack.c.bf16 %v4862_v3, %v4860_v43  ;;  %v9403_v40 = vadd.f32 %v4377_v32, %v9258_v22  ;;  %v5739_v30 = vmul.f32 -1.442695, %v9397_v57 }
 0x5bc   : > { %v7128_v11 = vpop.eup %7127  ;;  %v4673_v33 = vadd.f32 1.0, %v7126_v62  ;;  %7139 = vpow2.f32 %v5738_v15  ;;  %v4917_v45 = vpack.c.bf16 %v4863_v50, %v4861_v47  ;;  %v5740_v34 = vmul.f32 -1.442695, %v9400_v8 }
 0x5bd   : > { %v7130_v38 = vpop.eup %7129  ;;  %7141 = vrcp.f32 %v4672_v28  ;;  %v4674_v51 = vadd.f32 1.0, %v7128_v11  ;;  %v5741_v52 = vmul.f32 -1.442695, %v9403_v40 }
 0x5be   : > { %v7132_v41 = vpop.eup %7131  ;;  %7143 = vrcp.f32 %v4673_v33  ;;  %v4675_v25 = vadd.f32 1.0, %v7130_v38  ;;  %5139 = vmatprep.mubr.bf16.mxu0 %v4917_v45 }
 0x5bf   : > { %v7134_v12 = vpop.eup %7133  ;;  %7145 = vrcp.f32 %v4674_v51  ;;  %v4676_v13 = vadd.f32 1.0, %v7132_v41  ;;  %5140 = vmatmul.mubr.bf16.gmra.mrb[144].mxu0 %v4916_v19 }
 0x5c0   : > { %v7136_v44 = vpop.eup %7135  ;;  %7147 = vrcp.f32 %v4675_v25  ;;  %v4677_v49 = vadd.f32 1.0, %v7134_v12  ;;  %v4381_v53 = vpop.f32.mrb[192].mxu1 }
 0x5c1   : > { %v7138_v9 = vpop.eup %7137  ;;  %7149 = vrcp.f32 %v4676_v13  ;;  %v4678_v20 = vadd.f32 1.0, %v7136_v44  ;;  %v9407_v6 = vadd.f32 %v4381_v53, %v9255_v7  ;;  %v4383_v18 = vpop.f32.mrb[193].mxu1 }
 0x5c2   : > { %7151 = vrcp.f32 %v4677_v49  ;;  %v4679_v31 = vadd.f32 1.0, %v7138_v9  ;;  %v9411_v17 = vadd.f32 %v4383_v18, %v9258_v22  ;;  %v4385_v39 = vpop.f32.mrb[194].mxu1 }
 0x5c3   : > { %7153 = vrcp.f32 %v4678_v20  ;;  %v9415_v55 = vadd.f32 %v4385_v39, %v9255_v7  ;;  %v4387_v48 = vpop.f32.mrb[195].mxu1  ;;  %v5742_v24 = vmul.f32 -1.442695, %v9407_v6 }
 0x5c4   : > { %7155 = vrcp.f32 %v4679_v31  ;;  %v9419_v61 = vadd.f32 %v4387_v48, %v9258_v22  ;;  %v5743_v1 = vmul.f32 -1.442695, %v9411_v17 }
 0x5c5   : > { %7157 = vpow2.f32 %v5739_v30  ;;  %v5744_v4 = vmul.f32 -1.442695, %v9415_v55 }
 0x5c6   : > { %v7140_v56 = vpop.eup %7139  ;;  %7159 = vpow2.f32 %v5740_v34  ;;  %v5745_v26 = vmul.f32 -1.442695, %v9419_v61 }
 0x5c7   : > { %v7142_v63 = vpop.eup %7141  ;;  %7161 = vpow2.f32 %v5741_v52  ;;  %v4680_v29 = vadd.f32 1.0, %v7140_v56 }
 0x5c8   : > { %v7144_v10 = vpop.eup %7143  ;;  %7163 = vpow2.f32 %v5742_v24  ;;  %v4391_v42 = vpop.f32.mrb[196].mxu1 }
 0x5c9   : > { %v7146_v35 = vpop.eup %7145  ;;  %v9425_v23 = vadd.f32 %v4391_v42, %v9255_v7  ;;  %v4393_v37 = vpop.f32.mrb[197].mxu1  ;;  %v4865_v2 = vmul.f32 %v7144_v10, %v9356_v46  ;;  %7165 = vpow2.f32 %v5743_v1  ;;  %v4864_v46 = vmul.f32 %v7142_v63, %v9353_v36 }
 0x5ca   : > { %v7148_v0 = vpop.eup %7147  ;;  %v4866_v43 = vmul.f32 %v7146_v35, %v9359_v59  ;;  %v9430_v3 = vadd.f32 %v4393_v37, %v9258_v22  ;;  %v4395_v60 = vpop.f32.mrb[198].mxu1  ;;  %7167 = vpow2.f32 %v5744_v4 }
 0x5cb   : > { %v7150_v27 = vpop.eup %7149  ;;  %v4867_v47 = vmul.f32 %v7148_v0, %v9362_v58  ;;  %v5746_v50 = vmul.f32 -1.442695, %v9425_v23  ;;  %v9435_v15 = vadd.f32 %v4395_v60, %v9255_v7  ;;  %v4397_v32 = vpop.f32.mrb[199].mxu1  ;;  %7169 = vpow2.f32 %v5745_v26 }
 0x5cc   : > { %v7152_v62 = vpop.eup %7151  ;;  %v5747_v59 = vmul.f32 -1.442695, %v9430_v3  ;;  %v9440_v28 = vadd.f32 %v4397_v32, %v9258_v22  ;;  %v4868_v11 = vmul.f32 %v7150_v27, %v9370_v21  ;;  %v4918_v36 = vpack.c.bf16 %v4866_v43, %v4864_v46 }
 0x5cd   : > { %v7154_v19 = vpop.eup %7153  ;;  %7171 = vpow2.f32 %v5746_v50  ;;  %v5748_v58 = vmul.f32 -1.442695, %v9435_v15  ;;  %v4919_v33 = vpack.c.bf16 %v4867_v47, %v4865_v2  ;;  %v4869_v25 = vmul.f32 %v7152_v62, %v9375_v14 }
 0x5ce   : > { %v7156_v45 = vpop.eup %7155  ;;  %v4870_v38 = vmul.f32 %v7154_v19, %v9380_v54  ;;  %7173 = vpow2.f32 %v5747_v59  ;;  %v5749_v51 = vmul.f32 -1.442695, %v9440_v28 }
 0x5cf   : > { %v7158_v41 = vpop.eup %7157  ;;  %v4871_v12 = vmul.f32 %v7156_v45, %v9384_v5  ;;  %7175 = vpow2.f32 %v5748_v58  ;;  %5147 = vmatprep.mubr.bf16.mxu0 %v4919_v33 }
 0x5d0   : > { %v7160_v13 = vpop.eup %7159  ;;  %v4681_v21 = vadd.f32 1.0, %v7158_v41  ;;  %7177 = vpow2.f32 %v5749_v51  ;;  %5148 = vmatmul.mubr.bf16.gmra.mrb[148].mxu0 %v4918_v36  ;;  %v4401_v44 = vpop.f32.mrb[200].mxu1  ;;  %v4920_v49 = vpack.c.bf16 %v4870_v38, %v4868_v11 }
 0x5d1   : > { %v7162_v53 = vpop.eup %7161  ;;  %7179 = vrcp.f32 %v4680_v29  ;;  %v4682_v54 = vadd.f32 1.0, %v7160_v13  ;;  %v9449_v9 = vadd.f32 %v4401_v44, %v9255_v7  ;;  %v4403_v20 = vpop.f32.mrb[201].mxu1  ;;  %v4921_v30 = vpack.c.bf16 %v4871_v12, %v4869_v25 }
 0x5d2   : > { %v7164_v18 = vpop.eup %7163  ;;  %7181 = vrcp.f32 %v4681_v21  ;;  %v4683_v14 = vadd.f32 1.0, %v7162_v53  ;;  %v4405_v5 = vpop.f32.mrb[202].mxu1  ;;  %v9453_v63 = vadd.f32 %v4403_v20, %v9258_v22 }
 0x5d3   : > { %7183 = vrcp.f32 %v4682_v54  ;;  %v4684_v31 = vadd.f32 1.0, %v7164_v18  ;;  %v5750_v34 = vmul.f32 -1.442695, %v9449_v9  ;;  %v4407_v39 = vpop.f32.mrb[203].mxu1  ;;  %5155 = vmatprep.mubr.bf16.mxu0 %v4921_v30  ;;  %v7166_v52 = vpop.eup %7165  ;;  %v9456_v26 = vadd.f32 %v4405_v5, %v9255_v7 }
 0x5d4   : > { %7185 = vrcp.f32 %v4683_v14  ;;  %v7168_v48 = vpop.eup %7167  ;;  %v4685_v24 = vadd.f32 1.0, %v7166_v52  ;;  %v9459_v29 = vadd.f32 %v4407_v39, %v9258_v22  ;;  %v5751_v27 = vmul.f32 -1.442695, %v9453_v63 }
 0x5d5   : > { %7187 = vrcp.f32 %v4684_v31  ;;  %v7170_v56 = vpop.eup %7169  ;;  %v4686_v1 = vadd.f32 1.0, %v7168_v48  ;;  %v5752_v46 = vmul.f32 -1.442695, %v9456_v26 }
 0x5d6   : > { %7189 = vpow2.f32 %v5750_v34  ;;  %v4687_v10 = vadd.f32 1.0, %v7170_v56  ;;  %v5753_v58 = vmul.f32 -1.442695, %v9459_v29 }
 0x5d7   : > { %v7172_v4 = vpop.eup %7171  ;;  %7191 = vrcp.f32 %v4685_v24 }
 0x5d8   : > { %v7174_v42 = vpop.eup %7173  ;;  %7193 = vrcp.f32 %v4686_v1  ;;  %v4688_v35 = vadd.f32 1.0, %v7172_v4  ;;  %5156 = vmatmul.mubr.bf16.gmra.mrb[152].mxu0 %v4920_v49 }
 0x5d9   : > { %v7176_v37 = vpop.eup %7175  ;;  %7195 = vrcp.f32 %v4687_v10  ;;  %v4689_v0 = vadd.f32 1.0, %v7174_v42  ;;  %v4411_v2 = vpop.f32.mrb[204].mxu1 }
 0x5da   : > { %v7178_v43 = vpop.eup %7177  ;;  %7197 = vrcp.f32 %v4688_v35  ;;  %v4690_v60 = vadd.f32 1.0, %v7176_v37  ;;  %v9463_v47 = vadd.f32 %v4411_v2, %v9255_v7  ;;  %v4413_v50 = vpop.f32.mrb[205].mxu1 }
 0x5db   : > { %v7180_v32 = vpop.eup %7179  ;;  %7199 = vrcp.f32 %v4689_v0  ;;  %v4691_v62 = vadd.f32 1.0, %v7178_v43  ;;  %v9467_v59 = vadd.f32 %v4413_v50, %v9258_v22  ;;  %v4415_v19 = vpop.f32.mrb[206].mxu1 }
 0x5dc   : > { %v7182_v11 = vpop.eup %7181  ;;  %7201 = vrcp.f32 %v4690_v60  ;;  %v9471_v33 = vadd.f32 %v4415_v19, %v9255_v7  ;;  %v4417_v45 = vpop.f32.mrb[207].mxu1  ;;  %v5754_v51 = vmul.f32 -1.442695, %v9463_v47  ;;  %v4872_v25 = vmul.f32 %v7180_v32, %v9389_v16 }
 0x5dd   : > { %v7184_v38 = vpop.eup %7183  ;;  %7203 = vrcp.f32 %v4691_v62  ;;  %v9475_v36 = vadd.f32 %v4417_v45, %v9258_v22  ;;  %v5755_v13 = vmul.f32 -1.442695, %v9467_v59  ;;  %v4873_v44 = vmul.f32 %v7182_v11, %v9397_v57 }
 0x5de   : > { %v7186_v41 = vpop.eup %7185  ;;  %v4874_v12 = vmul.f32 %v7184_v38, %v9400_v8  ;;  %7205 = vpow2.f32 %v5751_v27  ;;  %v5756_v54 = vmul.f32 -1.442695, %v9471_v33 }
 0x5df   : > { %v7188_v21 = vpop.eup %7187  ;;  %v4875_v49 = vmul.f32 %v7186_v41, %v9403_v40  ;;  %7207 = vpow2.f32 %v5752_v46  ;;  %v5757_v16 = vmul.f32 -1.442695, %v9475_v36 }
 0x5e0   : > { %v7190_v53 = vpop.eup %7189  ;;  %7209 = vpow2.f32 %v5753_v58  ;;  %v4922_v20 = vpack.c.bf16 %v4874_v12, %v4872_v25  ;;  %v4876_v40 = vmul.f32 %v7188_v21, %v9407_v6 }
 0x5e1   : > { %v7192_v30 = vpop.eup %7191  ;;  %7211 = vpow2.f32 %v5754_v51  ;;  %v4923_v18 = vpack.c.bf16 %v4875_v49, %v4873_v44  ;;  %v4421_v8 = vpop.f32.mrb[208].mxu1 }
 0x5e2   : > { %v7194_v14 = vpop.eup %7193  ;;  %7213 = vpow2.f32 %v5755_v13  ;;  %v9485_v5 = vadd.f32 %v4421_v8, %v9255_v7  ;;  %v4423_v57 = vpop.f32.mrb[209].mxu1  ;;  %v4877_v34 = vmul.f32 %v7192_v30, %v9411_v17  ;;  %v4692_v17 = vadd.f32 1.0, %v7190_v53 }
 0x5e3   : > { %v7196_v31 = vpop.eup %7195  ;;  %v4878_v39 = vmul.f32 %v7194_v14, %v9415_v55  ;;  %5163 = vmatprep.mubr.bf16.mxu0 %v4923_v18  ;;  %v9491_v52 = vadd.f32 %v4423_v57, %v9258_v22  ;;  %v4425_v48 = vpop.f32.mrb[210].mxu1  ;;  %7215 = vpow2.f32 %v5756_v54 }
 0x5e4   : > { %v7198_v24 = vpop.eup %7197  ;;  %v4879_v56 = vmul.f32 %v7196_v31, %v9419_v61  ;;  %5164 = vmatmul.mubr.bf16.gmra.mrb[156].mxu0 %v4922_v20  ;;  %v5758_v1 = vmul.f32 -1.442695, %v9485_v5  ;;  %v9496_v4 = vadd.f32 %v4425_v48, %v9255_v7  ;;  %v4427_v6 = vpop.f32.mrb[211].mxu1  ;;  %7217 = vpow2.f32 %v5757_v16 }
 0x5e5   : > { %v7200_v10 = vpop.eup %7199  ;;  %v5759_v55 = vmul.f32 -1.442695, %v9491_v52  ;;  %v9500_v42 = vadd.f32 %v4427_v6, %v9258_v22  ;;  %v9503_v37 = vmul.f32 %v7198_v24, %v9425_v23  ;;  %v4924_v27 = vpack.c.bf16 %v4878_v39, %v4876_v40 }
 0x5e6   : > { %v7202_v35 = vpop.eup %7201  ;;  %7219 = vpow2.f32 %v5758_v1  ;;  %v5760_v61 = vmul.f32 -1.442695, %v9496_v4  ;;  %v4925_v0 = vpack.c.bf16 %v4879_v56, %v4877_v34  ;;  %v4881_v32 = vmul.f32 %v7200_v10, %v9430_v3 }
 0x5e7   : > { %v7204_v2 = vpop.eup %7203  ;;  %v4882_v43 = vmul.f32 %v7202_v35, %v9435_v15  ;;  %7221 = vpow2.f32 %v5759_v55  ;;  %v5761_v60 = vmul.f32 -1.442695, %v9500_v42 }
 0x5e8   : > { %v7206_v50 = vpop.eup %7205  ;;  %v4883_v62 = vmul.f32 %v7204_v2, %v9440_v28  ;;  %7223 = vpow2.f32 %v5760_v61  ;;  %5171 = vmatprep.mubr.bf16.mxu0 %v4925_v0 }
 0x5e9   : > { %v7208_v23 = vpop.eup %7207  ;;  %v4693_v46 = vadd.f32 1.0, %v7206_v50  ;;  %7225 = vpow2.f32 %v5761_v60  ;;  %v4431_v19 = vpop.f32.mrb[212].mxu1  ;;  %v4926_v11 = vpack.c.bf16 %v4882_v43, %v9503_v37 }
 0x5ea   : > { %v7210_v58 = vpop.eup %7209  ;;  %7227 = vrcp.f32 %v4692_v17  ;;  %v4694_v15 = vadd.f32 1.0, %v7208_v23  ;;  %v9512_v45 = vadd.f32 %v4431_v19, %v9255_v7  ;;  %v4433_v38 = vpop.f32.mrb[213].mxu1  ;;  %v4927_v51 = vpack.c.bf16 %v4883_v62, %v4881_v32 }
 0x5eb   : > { %v7212_v41 = vpop.eup %7211  ;;  %7229 = vrcp.f32 %v4693_v46  ;;  %v4695_v3 = vadd.f32 1.0, %v7210_v58  ;;  %v4435_v28 = vpop.f32.mrb[214].mxu1  ;;  %v9516_v20 = vadd.f32 %v4433_v38, %v9258_v22 }
 0x5ec   : > { %v7214_v25 = vpop.eup %7213  ;;  %7231 = vrcp.f32 %v4694_v15  ;;  %v4696_v12 = vadd.f32 1.0, %v7212_v41  ;;  %5172 = vmatmul.mubr.bf16.gmra.mrb[160].mxu0 %v4924_v27  ;;  %v5762_v13 = vmul.f32 -1.442695, %v9512_v45  ;;  %v4437_v21 = vpop.f32.mrb[215].mxu1  ;;  %v9519_v18 = vadd.f32 %v4435_v28, %v9255_v7 }
 0x5ed   : > { %7233 = vrcp.f32 %v4695_v3  ;;  %v4697_v44 = vadd.f32 1.0, %v7214_v25  ;;  %5179 = vmatprep.mubr.bf16.mxu0 %v4927_v51  ;;  %v7216_v49 = vpop.eup %7215  ;;  %v9522_v57 = vadd.f32 %v4437_v21, %v9258_v22  ;;  %v5763_v24 = vmul.f32 -1.442695, %v9516_v20 }
 0x5ee   : > { %7235 = vrcp.f32 %v4696_v12  ;;  %v7218_v53 = vpop.eup %7217  ;;  %v4698_v54 = vadd.f32 1.0, %v7216_v49  ;;  %v5764_v17 = vmul.f32 -1.442695, %v9519_v18 }
 0x5ef   : > { %7237 = vrcp.f32 %v4697_v44  ;;  %v4699_v16 = vadd.f32 1.0, %v7218_v53  ;;  %v5765_v61 = vmul.f32 -1.442695, %v9522_v57 }
 0x5f0   : > { %v7220_v30 = vpop.eup %7219  ;;  %7239 = vpow2.f32 %v5762_v13 }
 0x5f1   : > { %v7222_v8 = vpop.eup %7221  ;;  %7241 = vrcp.f32 %v4698_v54  ;;  %v4700_v14 = vadd.f32 1.0, %v7220_v30 }
 0x5f2   : > { %v7224_v31 = vpop.eup %7223  ;;  %7243 = vrcp.f32 %v4699_v16  ;;  %v4701_v40 = vadd.f32 1.0, %v7222_v8  ;;  %v4441_v34 = vpop.f32.mrb[216].mxu1 }
 0x5f3   : > { %v7226_v39 = vpop.eup %7225  ;;  %7245 = vrcp.f32 %v4700_v14  ;;  %v4702_v48 = vadd.f32 1.0, %v7224_v31  ;;  %v9526_v56 = vadd.f32 %v4441_v34, %v9255_v7  ;;  %v4443_v1 = vpop.f32.mrb[217].mxu1 }
 0x5f4   : > { %v7228_v6 = vpop.eup %7227  ;;  %7247 = vrcp.f32 %v4701_v40  ;;  %v4703_v10 = vadd.f32 1.0, %v7226_v39  ;;  %5180 = vmatmul.mubr.bf16.gmra.mrb[164].mxu0 %v4926_v11  ;;  %v9530_v55 = vadd.f32 %v4443_v1, %v9258_v22  ;;  %v4445_v35 = vpop.f32.mrb[218].mxu1 }
 0x5f5   : > { %v7230_v37 = vpop.eup %7229  ;;  %7249 = vrcp.f32 %v4702_v48  ;;  %v9534_v0 = vadd.f32 %v4445_v35, %v9255_v7  ;;  %v4447_v2 = vpop.f32.mrb[219].mxu1  ;;  %v5766_v60 = vmul.f32 -1.442695, %v9526_v56  ;;  %v4884_v32 = vmul.f32 %v7228_v6, %v9449_v9 }
 0x5f6   : > { %v7232_v43 = vpop.eup %7231  ;;  %7251 = vrcp.f32 %v4703_v10  ;;  %v9538_v27 = vadd.f32 %v4447_v2, %v9258_v22  ;;  %v5767_v23 = vmul.f32 -1.442695, %v9530_v55  ;;  %v4885_v19 = vmul.f32 %v7230_v37, %v9453_v63 }
 0x5f7   : > { %v7234_v50 = vpop.eup %7233  ;;  %v4886_v62 = vmul.f32 %v7232_v43, %v9456_v26  ;;  %7253 = vpow2.f32 %v5763_v24  ;;  %v5768_v58 = vmul.f32 -1.442695, %v9534_v0 }
 0x5f8   : > { %v7236_v46 = vpop.eup %7235  ;;  %v4887_v11 = vmul.f32 %v7234_v50, %v9459_v29  ;;  %7255 = vpow2.f32 %v5764_v17  ;;  %v5769_v9 = vmul.f32 -1.442695, %v9538_v27 }
 0x5f9   : > { %v7238_v15 = vpop.eup %7237  ;;  %7257 = vpow2.f32 %v5765_v61  ;;  %v4928_v38 = vpack.c.bf16 %v4886_v62, %v4884_v32  ;;  %v4888_v29 = vmul.f32 %v7236_v46, %v9463_v47 }
 0x5fa   : > { %v7240_v51 = vpop.eup %7239  ;;  %7259 = vpow2.f32 %v5766_v60  ;;  %v4929_v41 = vpack.c.bf16 %v4887_v11, %v4885_v19  ;;  %v4451_v26 = vpop.f32.mrb[220].mxu1  ;;  %v4889_v49 = vmul.f32 %v7238_v15, %v9467_v59 }
 0x5fb   : > { %v7242_v3 = vpop.eup %7241  ;;  %7261 = vpow2.f32 %v5767_v23  ;;  %v9548_v28 = vadd.f32 %v4451_v26, %v9255_v7  ;;  %v4453_v63 = vpop.f32.mrb[221].mxu1 }
 0x5fc   : > { %v7244_v25 = vpop.eup %7243  ;;  %v4890_v12 = vmul.f32 %v7242_v3, %v9471_v33  ;;  %7263 = vpow2.f32 %v5768_v58  ;;  %5187 = vmatprep.mubr.bf16.mxu0 %v4929_v41  ;;  %v9553_v13 = vadd.f32 %v4453_v63, %v9258_v22  ;;  %v4455_v21 = vpop.f32.mrb[222].mxu1  ;;  %v4704_v33 = vadd.f32 1.0, %v7240_v51 }
 0x5fd   : > { %v7246_v44 = vpop.eup %7245  ;;  %v4891_v53 = vmul.f32 %v7244_v25, %v9475_v36  ;;  %5188 = vmatmul.mubr.bf16.gmra.mrb[168].mxu0 %v4928_v38  ;;  %v5770_v54 = vmul.f32 -1.442695, %v9548_v28  ;;  %v9559_v30 = vadd.f32 %v4455_v21, %v9255_v7  ;;  %v4457_v47 = vpop.f32.mrb[223].mxu1  ;;  %7265 = vpow2.f32 %v5769_v9 }
 0x5fe   : > { %v7248_v16 = vpop.eup %7247  ;;  %v5771_v8 = vmul.f32 -1.442695, %v9553_v13  ;;  %v9563_v14 = vadd.f32 %v4457_v47, %v9258_v22  ;;  %v4892_v59 = vmul.f32 %v7246_v44, %v9485_v5  ;;  %v4930_v48 = vpack.c.bf16 %v4890_v12, %v4888_v29 }
 0x5ff   : > { %v7250_v31 = vpop.eup %7249  ;;  %7267 = vpow2.f32 %v5770_v54  ;;  %v5772_v36 = vmul.f32 -1.442695, %v9559_v30  ;;  %v4931_v40 = vpack.c.bf16 %v4891_v53, %v4889_v49  ;;  %v4893_v1 = vmul.f32 %v7248_v16, %v9491_v52 }
 0x600   : > { %v7252_v34 = vpop.eup %7251  ;;  %v4894_v7 = vmul.f32 %v7250_v31, %v9496_v4  ;;  %7269 = vpow2.f32 %v5771_v8  ;;  %v5773_v39 = vmul.f32 -1.442695, %v9563_v14 }
 0x601   : > { %v7254_v24 = vpop.eup %7253  ;;  %v4895_v22 = vmul.f32 %v7252_v34, %v9500_v42  ;;  %7271 = vpow2.f32 %v5772_v36  ;;  %5195 = vmatprep.mubr.bf16.mxu0 %v4931_v40 }
 0x602   : > { %v7256_v6 = vpop.eup %7255  ;;  %v4705_v5 = vadd.f32 1.0, %v7254_v24  ;;  %7273 = vpow2.f32 %v5773_v39  ;;  %v4932_v10 = vpack.c.bf16 %v4894_v7, %v4892_v59  ;;  %v9586_v7 = vld [vmem:[%s9707_s14] ss:$0 sm:$0xff] }
 0x603   : > { %v7258_v17 = vpop.eup %7257  ;;  %7275 = vrcp.f32 %v4704_v33  ;;  %v4706_v35 = vadd.f32 1.0, %v7256_v6  ;;  %v4933_v37 = vpack.c.bf16 %v4895_v22, %v4893_v1 }
 0x604   : > { %v7260_v4 = vpop.eup %7259  ;;  %7277 = vrcp.f32 %v4705_v5  ;;  %v4707_v61 = vadd.f32 1.0, %v7258_v17 }
 0x605   : > { %v7262_v2 = vpop.eup %7261  ;;  %7279 = vrcp.f32 %v4706_v35  ;;  %v4708_v43 = vadd.f32 1.0, %v7260_v4  ;;  %5196 = vmatmul.mubr.bf16.gmra.mrb[172].mxu0 %v4930_v48 }
 0x606   : > { %v7264_v52 = vpop.eup %7263  ;;  %7281 = vrcp.f32 %v4707_v61  ;;  %v4709_v42 = vadd.f32 1.0, %v7262_v2  ;;  %5203 = vmatprep.mubr.bf16.mxu0 %v4933_v37 }
 0x607   : > { %7283 = vrcp.f32 %v4708_v43  ;;  %v4710_v60 = vadd.f32 1.0, %v7264_v52  ;;  %v7266_v50 = vpop.eup %7265 }
 0x608   : > { %7285 = vrcp.f32 %v4709_v42  ;;  %v4711_v62 = vadd.f32 1.0, %v7266_v50 }
 0x609   : > { %v7268_v32 = vpop.eup %7267  ;;  %7287 = vrcp.f32 %v4710_v60 }
 0x60a   : > { %v7270_v23 = vpop.eup %7269  ;;  %v4712_v46 = vadd.f32 1.0, %v7268_v32  ;;  %7289 = vrcp.f32 %v4711_v62 }
 0x60b   : > { %v7272_v19 = vpop.eup %7271  ;;  %v4713_v11 = vadd.f32 1.0, %v7270_v23 }
 0x60c   : > { %v7274_v58 = vpop.eup %7273  ;;  %7291 = vrcp.f32 %v4712_v46  ;;  %v4714_v15 = vadd.f32 1.0, %v7272_v19 }
 0x60d   : > { %v7276_v38 = vpop.eup %7275  ;;  %7293 = vrcp.f32 %v4713_v11  ;;  %v4715_v51 = vadd.f32 1.0, %v7274_v58  ;;  %5204 = vmatmul.mubr.bf16.gmra.mrb[176].mxu0 %v4932_v10 }
 0x60e   : > { %v7278_v9 = vpop.eup %7277  ;;  %7295 = vrcp.f32 %v4714_v15  ;;  %v4896_v3 = vmul.f32 %v7276_v38, %v9512_v45 }
 0x60f   : > { %v7280_v41 = vpop.eup %7279  ;;  %7297 = vrcp.f32 %v4715_v51  ;;  %v4897_v29 = vmul.f32 %v7278_v9, %v9516_v20 }
 0x610   : > { %v7282_v26 = vpop.eup %7281  ;;  %v4898_v63 = vmul.f32 %v7280_v41, %v9519_v18 }
 0x611   : > { %v7284_v25 = vpop.eup %7283  ;;  %v4899_v12 = vmul.f32 %v7282_v26, %v9522_v57 }
 0x612   : > { %v7286_v21 = vpop.eup %7285  ;;  %v4934_v44 = vpack.c.bf16 %v4898_v63, %v4896_v3  ;;  %v4900_v54 = vmul.f32 %v7284_v25, %v9526_v56 }
 0x613   : > { %v7288_v49 = vpop.eup %7287  ;;  %v4935_v53 = vpack.c.bf16 %v4899_v12, %v4897_v29  ;;  %v4901_v45 = vmul.f32 %v7286_v21, %v9530_v55 }
 0x614   : > { %v4902_v47 = vmul.f32 %v7288_v49, %v9534_v0  ;;  %v7290_v16 = vpop.eup %7289 }
 0x615   : > { %5211 = vmatprep.mubr.bf16.mxu0 %v4935_v53  ;;  %v4903_v18 = vmul.f32 %v7290_v16, %v9538_v27 }
 0x616   : > { %v7292_v33 = vpop.eup %7291  ;;  %5212 = vmatmul.mubr.bf16.gmra.mrb[180].mxu0 %v4934_v44  ;;  %v4936_v8 = vpack.c.bf16 %v4902_v47, %v4900_v54 }
 0x617   : > { %v7294_v20 = vpop.eup %7293  ;;  %v4937_v57 = vpack.c.bf16 %v4903_v18, %v4901_v45  ;;  %v4904_v36 = vmul.f32 %v7292_v33, %v9548_v28 }
 0x618   : > { %v7296_v31 = vpop.eup %7295  ;;  %v4905_v0 = vmul.f32 %v7294_v20, %v9553_v13 }
 0x619   : > { %v7298_v59 = vpop.eup %7297  ;;  %v4906_v56 = vmul.f32 %v7296_v31, %v9559_v30  ;;  %5219 = vmatprep.mubr.bf16.mxu0 %v4937_v57 }
 0x61a   : > { %v4907_v40 = vmul.f32 %v7298_v59, %v9563_v14 }
 0x61b   : > { %v4938_v34 = vpack.c.bf16 %v4906_v56, %v4904_v36 }
 0x61c   : > { %v4939_v55 = vpack.c.bf16 %v4907_v40, %v4905_v0 }
 0x61e   : > { %5220 = vmatmul.mubr.bf16.gmra.mrb[184].mxu0 %v4936_v8 }
 0x61f   : > { %5227 = vmatprep.mubr.bf16.mxu0 %v4939_v55 }
 0x626   : > { %5228 = vmatmul.mubr.bf16.gmra.mrb[188].mxu0 %v4938_v34 }
 0x668   : > { %v5809_v27 = vpop.f32.mrb[128].mxu0 }
 0x669   : > { %v5810_v39 = vpop.f32.mrb[129].mxu0 }
 0x66a   : > { %v5811_v28 = vadd.f32 %v5810_v39, %v5809_v27  ;;  %v5812_v48 = vpop.f32.mrb[130].mxu0 }
 0x66b   : > { %v5813_v13 = vpop.f32.mrb[131].mxu0 }
 0x66c   : > { %v5110_v30 = vadd.f32 %v5811_v28, %v9586_v7  ;;  %v5814_v14 = vadd.f32 %v5813_v13, %v5812_v48 }
 0x66e   : > { %5236 = vst.msk [vmem:[%s9592_s26] sm:$0xff] %vm1087_vm4, %v5110_v30  ;;  %v5113_v24 = vadd.f32 %v5814_v14, %v9586_v7 }
 0x670   : > { %5237 = vst.msk [vmem:[%s9592_s26 + $0x8] sm:$0xff] %vm1087_vm4, %v5113_v24  ;;  %v5815_v1 = vpop.f32.mrb[132].mxu0 }
 0x671   : > { %v5816_v22 = vpop.f32.mrb[133].mxu0 }
 0x672   : > { %v5817_v6 = vadd.f32 %v5816_v22, %v5815_v1  ;;  %v5818_v5 = vpop.f32.mrb[134].mxu0 }
 0x673   : > { %v5819_v10 = vpop.f32.mrb[135].mxu0 }
 0x674   : > { %v5118_v17 = vadd.f32 %v5817_v6, %v9586_v7  ;;  %v5820_v35 = vadd.f32 %v5819_v10, %v5818_v5 }
 0x676   : > { %5238 = vst.msk [vmem:[%s9592_s26 + $0x10] sm:$0xff] %vm1087_vm4, %v5118_v17  ;;  %v5121_v37 = vadd.f32 %v5820_v35, %v9586_v7 }
 0x678   : > { %5239 = vst.msk [vmem:[%s9592_s26 + $0x18] sm:$0xff] %vm1087_vm4, %v5121_v37 }
 0x679   : > { %v5821_v4 = vpop.f32.mrb[136].mxu0 }
 0x67a   : > { %v5822_v61 = vpop.f32.mrb[137].mxu0 }
 0x67b   : > { %v5823_v2 = vadd.f32 %v5822_v61, %v5821_v4  ;;  %v5824_v43 = vpop.f32.mrb[138].mxu0 }
 0x67c   : > { %v5825_v52 = vpop.f32.mrb[139].mxu0 }
 0x67d   : > { %v5126_v42 = vadd.f32 %v5823_v2, %v9586_v7  ;;  %v5826_v60 = vadd.f32 %v5825_v52, %v5824_v43 }
 0x67f   : > { %5240 = vst.msk [vmem:[%s9592_s26 + $0x20] sm:$0xff] %vm1087_vm4, %v5126_v42  ;;  %v5129_v50 = vadd.f32 %v5826_v60, %v9586_v7 }
 0x681   : > { %5241 = vst.msk [vmem:[%s9592_s26 + $0x28] sm:$0xff] %vm1087_vm4, %v5129_v50 }
 0x68a   : > { %v5827_v32 = vpop.f32.mrb[140].mxu0 }
 0x68b   : > { %v5828_v62 = vpop.f32.mrb[141].mxu0 }
 0x68c   : > { %v5829_v23 = vadd.f32 %v5828_v62, %v5827_v32  ;;  %v5830_v46 = vpop.f32.mrb[142].mxu0 }
 0x68d   : > { %v5831_v19 = vpop.f32.mrb[143].mxu0 }
 0x68e   : > { %v5134_v11 = vadd.f32 %v5829_v23, %v9586_v7  ;;  %v5832_v58 = vadd.f32 %v5831_v19, %v5830_v46 }
 0x690   : > { %5242 = vst.msk [vmem:[%s9592_s26 + $0x30] sm:$0xff] %vm1087_vm4, %v5134_v11  ;;  %v5137_v15 = vadd.f32 %v5832_v58, %v9586_v7 }
 0x692   : > { %5243 = vst.msk [vmem:[%s9592_s26 + $0x38] sm:$0xff] %vm1087_vm4, %v5137_v15  ;;  %v5833_v38 = vpop.f32.mrb[144].mxu0 }
 0x693   : > { %v5834_v51 = vpop.f32.mrb[145].mxu0 }
 0x694   : > { %v5835_v9 = vadd.f32 %v5834_v51, %v5833_v38  ;;  %v5836_v41 = vpop.f32.mrb[146].mxu0 }
 0x695   : > { %v5837_v26 = vpop.f32.mrb[147].mxu0 }
 0x696   : > { %v5142_v3 = vadd.f32 %v5835_v9, %v9586_v7  ;;  %v5838_v63 = vadd.f32 %v5837_v26, %v5836_v41 }
 0x698   : > { %5244 = vst.msk [vmem:[%s9592_s26 + $0x40] sm:$0xff] %vm1087_vm4, %v5142_v3  ;;  %v5145_v25 = vadd.f32 %v5838_v63, %v9586_v7 }
 0x69a   : > { %5245 = vst.msk [vmem:[%s9592_s26 + $0x48] sm:$0xff] %vm1087_vm4, %v5145_v25 }
 0x6a3   : > { %v5839_v29 = vpop.f32.mrb[148].mxu0 }
 0x6a4   : > { %v5840_v12 = vpop.f32.mrb[149].mxu0 }
 0x6a5   : > { %v5841_v21 = vadd.f32 %v5840_v12, %v5839_v29  ;;  %v5842_v44 = vpop.f32.mrb[150].mxu0 }
 0x6a6   : > { %v5843_v49 = vpop.f32.mrb[151].mxu0 }
 0x6a7   : > { %v5150_v53 = vadd.f32 %v5841_v21, %v9586_v7  ;;  %v5844_v54 = vadd.f32 %v5843_v49, %v5842_v44 }
 0x6a9   : > { %5246 = vst.msk [vmem:[%s9592_s26 + $0x50] sm:$0xff] %vm1087_vm4, %v5150_v53  ;;  %v5153_v47 = vadd.f32 %v5844_v54, %v9586_v7 }
 0x6ab   : > { %5247 = vst.msk [vmem:[%s9592_s26 + $0x58] sm:$0xff] %vm1087_vm4, %v5153_v47  ;;  %v5845_v16 = vpop.f32.mrb[152].mxu0 }
 0x6ac   : > { %v5846_v33 = vpop.f32.mrb[153].mxu0 }
 0x6ad   : > { %v5847_v45 = vadd.f32 %v5846_v33, %v5845_v16  ;;  %v5848_v18 = vpop.f32.mrb[154].mxu0 }
 0x6ae   : > { %v5849_v8 = vpop.f32.mrb[155].mxu0 }
 0x6af   : > { %v5158_v20 = vadd.f32 %v5847_v45, %v9586_v7  ;;  %v5850_v31 = vadd.f32 %v5849_v8, %v5848_v18 }
 0x6b1   : > { %5248 = vst.msk [vmem:[%s9592_s26 + $0x60] sm:$0xff] %vm1087_vm4, %v5158_v20  ;;  %v5161_v57 = vadd.f32 %v5850_v31, %v9586_v7 }
 0x6b3   : > { %5249 = vst.msk [vmem:[%s9592_s26 + $0x68] sm:$0xff] %vm1087_vm4, %v5161_v57 }
 0x6b7   : > { %v5851_v59 = vpop.f32.mrb[156].mxu0 }
 0x6b8   : > { %v5852_v36 = vpop.f32.mrb[157].mxu0 }
 0x6b9   : > { %v5853_v56 = vadd.f32 %v5852_v36, %v5851_v59  ;;  %v5854_v0 = vpop.f32.mrb[158].mxu0 }
 0x6ba   : > { %v5855_v40 = vpop.f32.mrb[159].mxu0 }
 0x6bb   : > { %v5166_v34 = vadd.f32 %v5853_v56, %v9586_v7  ;;  %v5856_v55 = vadd.f32 %v5855_v40, %v5854_v0 }
 0x6bd   : > { %5250 = vst.msk [vmem:[%s9592_s26 + $0x70] sm:$0xff] %vm1087_vm4, %v5166_v34  ;;  %v5169_v27 = vadd.f32 %v5856_v55, %v9586_v7 }
 0x6bf   : > { %5251 = vst.msk [vmem:[%s9592_s26 + $0x78] sm:$0xff] %vm1087_vm4, %v5169_v27  ;;  %v5857_v39 = vpop.f32.mrb[160].mxu0 }
 0x6c0   : > { %v5858_v28 = vpop.f32.mrb[161].mxu0 }
 0x6c1   : > { %v5859_v48 = vadd.f32 %v5858_v28, %v5857_v39  ;;  %v5860_v13 = vpop.f32.mrb[162].mxu0 }
 0x6c2   : > { %v5861_v30 = vpop.f32.mrb[163].mxu0 }
 0x6c3   : > { %v5174_v14 = vadd.f32 %v5859_v48, %v9586_v7  ;;  %v5862_v24 = vadd.f32 %v5861_v30, %v5860_v13 }
 0x6c5   : > { %5252 = vst.msk [vmem:[%s9592_s26 + $0x80] sm:$0xff] %vm1087_vm4, %v5174_v14  ;;  %v5177_v1 = vadd.f32 %v5862_v24, %v9586_v7 }
 0x6c7   : > { %5253 = vst.msk [vmem:[%s9592_s26 + $0x88] sm:$0xff] %vm1087_vm4, %v5177_v1  ;;  %v5863_v22 = vpop.f32.mrb[164].mxu0 }
 0x6c8   : > { %v5864_v6 = vpop.f32.mrb[165].mxu0 }
 0x6c9   : > { %v5865_v5 = vadd.f32 %v5864_v6, %v5863_v22  ;;  %v5866_v10 = vpop.f32.mrb[166].mxu0 }
 0x6ca   : > { %v5867_v17 = vpop.f32.mrb[167].mxu0 }
 0x6cb   : > { %v5182_v35 = vadd.f32 %v5865_v5, %v9586_v7  ;;  %v5868_v37 = vadd.f32 %v5867_v17, %v5866_v10 }
 0x6cd   : > { %5254 = vst.msk [vmem:[%s9592_s26 + $0x90] sm:$0xff] %vm1087_vm4, %v5182_v35  ;;  %v5185_v4 = vadd.f32 %v5868_v37, %v9586_v7 }
 0x6cf   : > { %5255 = vst.msk [vmem:[%s9592_s26 + $0x98] sm:$0xff] %vm1087_vm4, %v5185_v4 }
 0x6d0   : > { %v5869_v61 = vpop.f32.mrb[168].mxu0 }
 0x6d1   : > { %v5870_v2 = vpop.f32.mrb[169].mxu0 }
 0x6d2   : > { %v5871_v43 = vadd.f32 %v5870_v2, %v5869_v61  ;;  %v5872_v52 = vpop.f32.mrb[170].mxu0 }
 0x6d3   : > { %v5873_v42 = vpop.f32.mrb[171].mxu0 }
 0x6d4   : > { %v5190_v60 = vadd.f32 %v5871_v43, %v9586_v7  ;;  %v5874_v50 = vadd.f32 %v5873_v42, %v5872_v52 }
 0x6d6   : > { %5256 = vst.msk [vmem:[%s9592_s26 + $0xa0] sm:$0xff] %vm1087_vm4, %v5190_v60  ;;  %v5193_v32 = vadd.f32 %v5874_v50, %v9586_v7 }
 0x6d8   : > { %5257 = vst.msk [vmem:[%s9592_s26 + $0xa8] sm:$0xff] %vm1087_vm4, %v5193_v32  ;;  %v5875_v62 = vpop.f32.mrb[172].mxu0 }
 0x6d9   : > { %v5876_v23 = vpop.f32.mrb[173].mxu0 }
 0x6da   : > { %v5877_v46 = vadd.f32 %v5876_v23, %v5875_v62  ;;  %v5878_v19 = vpop.f32.mrb[174].mxu0 }
 0x6db   : > { %v5879_v11 = vpop.f32.mrb[175].mxu0 }
 0x6dc   : > { %v5198_v58 = vadd.f32 %v5877_v46, %v9586_v7  ;;  %v5880_v15 = vadd.f32 %v5879_v11, %v5878_v19 }
 0x6de   : > { %5258 = vst.msk [vmem:[%s9592_s26 + $0xb0] sm:$0xff] %vm1087_vm4, %v5198_v58  ;;  %v5201_v38 = vadd.f32 %v5880_v15, %v9586_v7 }
 0x6e0   : > { %5259 = vst.msk [vmem:[%s9592_s26 + $0xb8] sm:$0xff] %vm1087_vm4, %v5201_v38  ;;  %v5881_v51 = vpop.f32.mrb[176].mxu0 }
 0x6e1   : > { %v5882_v9 = vpop.f32.mrb[177].mxu0 }
 0x6e2   : > { %v5883_v41 = vadd.f32 %v5882_v9, %v5881_v51  ;;  %v5884_v26 = vpop.f32.mrb[178].mxu0 }
 0x6e3   : > { %v5885_v3 = vpop.f32.mrb[179].mxu0 }
 0x6e4   : > { %v5206_v63 = vadd.f32 %v5883_v41, %v9586_v7  ;;  %v5886_v25 = vadd.f32 %v5885_v3, %v5884_v26 }
 0x6e6   : > { %5260 = vst.msk [vmem:[%s9592_s26 + $0xc0] sm:$0xff] %vm1087_vm4, %v5206_v63  ;;  %v5209_v29 = vadd.f32 %v5886_v25, %v9586_v7 }
 0x6e8   : > { %5261 = vst.msk [vmem:[%s9592_s26 + $0xc8] sm:$0xff] %vm1087_vm4, %v5209_v29 }
 0x6e9   : > { %v5887_v12 = vpop.f32.mrb[180].mxu0 }
 0x6ea   : > { %v5888_v21 = vpop.f32.mrb[181].mxu0 }
 0x6eb   : > { %v5889_v44 = vadd.f32 %v5888_v21, %v5887_v12  ;;  %v5890_v49 = vpop.f32.mrb[182].mxu0 }
 0x6ec   : > { %v5891_v53 = vpop.f32.mrb[183].mxu0 }
 0x6ed   : > { %v5214_v54 = vadd.f32 %v5889_v44, %v9586_v7  ;;  %v5892_v47 = vadd.f32 %v5891_v53, %v5890_v49 }
 0x6ef   : > { %5262 = vst.msk [vmem:[%s9592_s26 + $0xd0] sm:$0xff] %vm1087_vm4, %v5214_v54  ;;  %v5217_v16 = vadd.f32 %v5892_v47, %v9586_v7 }
 0x6f1   : > { %5263 = vst.msk [vmem:[%s9592_s26 + $0xd8] sm:$0xff] %vm1087_vm4, %v5217_v16  ;;  %v5893_v33 = vpop.f32.mrb[184].mxu0 }
 0x6f2   : > { %v5894_v45 = vpop.f32.mrb[185].mxu0 }
 0x6f3   : > { %v5895_v18 = vadd.f32 %v5894_v45, %v5893_v33  ;;  %v5896_v8 = vpop.f32.mrb[186].mxu0 }
 0x6f4   : > { %v5897_v20 = vpop.f32.mrb[187].mxu0 }
 0x6f5   : > { %v5222_v31 = vadd.f32 %v5895_v18, %v9586_v7  ;;  %v5898_v57 = vadd.f32 %v5897_v20, %v5896_v8 }
 0x6f7   : > { %5264 = vst.msk [vmem:[%s9592_s26 + $0xe0] sm:$0xff] %vm1087_vm4, %v5222_v31  ;;  %v5225_v59 = vadd.f32 %v5898_v57, %v9586_v7 }
 0x6f9   : > { %5265 = vst.msk [vmem:[%s9592_s26 + $0xe8] sm:$0xff] %vm1087_vm4, %v5225_v59  ;;  %v5899_v36 = vpop.f32.mrb[188].mxu0 }
 0x6fa   : > { %v5900_v56 = vpop.f32.mrb[189].mxu0 }
 0x6fb   : > { %v5901_v0 = vadd.f32 %v5900_v56, %v5899_v36  ;;  %v5902_v40 = vpop.f32.mrb[190].mxu0 }
 0x6fc   : > { %v5903_v34 = vpop.f32.mrb[191].mxu0 }
 0x6fd   : > { %v5230_v55 = vadd.f32 %v5901_v0, %v9586_v7  ;;  %v5904_v27 = vadd.f32 %v5903_v34, %v5902_v40 }
 0x6ff   : > { %5266 = vst.msk [vmem:[%s9592_s26 + $0xf0] sm:$0xff] %vm1087_vm4, %v5230_v55  ;;  %v5233_v39 = vadd.f32 %v5904_v27, %v9586_v7 }
 0x701   : > { %5267 = vst.msk [vmem:[%s9592_s26 + $0xf8] sm:$0xff] %vm1087_vm4, %v5233_v39 }
 0x702 PF: > { %s25_s18 = sadd.s32 1, %s7305_s18  }
 0x703   : > { %p22_p4 = scmp.ge.s32.totalorder %s25_s18, 4  }
 0x705   :  { %24 = sbr.rel (!%p22_p4) target bundleno = 1 (0x1), region = 113 }

</bundles_post_ra>
